<compile_context>
chip_gen: v6e
topology: v6e:2x2x1
jax: 0.10.0
libtpu: 0.0.40
codegen_flags: <defaults>
</compile_context>

<pallas_src>
import functools

import jax
import jax.numpy as jnp
from jax.experimental import pallas as pl
from jax.experimental.pallas import tpu as pltpu


# ----------------------------- fused stack kernel -----------------------------
def _make_stack_kernel(num_layers, unroll):
    def kernel(*refs):
        if num_layers > 1:
            (x_ref, a0_ref, b0_ref, bias0_ref, whh_ref,
             a_ref, b_ref, bias_ref, out_ref, gxbuf, hbuf) = refs
        else:
            (x_ref, a0_ref, b0_ref, bias0_ref, whh_ref,
             out_ref, gxbuf, hbuf) = refs

        T = x_ref.shape[0]
        Bsz = x_ref.shape[1]
        G = gxbuf.shape[2]          # 8H (full fused gate width, 128 lanes for H=16)
        H2 = G // 4                 # 2H (packed [fwd | bwd] state width)

        # ---- layer 0 input projection: gx[t] = x(t) @ A0 + x(T-1-t) @ B0 + bias0 ----
        # A0 holds only forward-gate columns, B0 only backward-gate columns, so the
        # backward half of gx is already time-reversed ("pre-reversed gx").
        a0 = a0_ref[...]
        b0 = b0_ref[...]
        bias0 = bias0_ref[...]

        def gx0_body(t, carry):
            gx_t = (jnp.dot(x_ref[t], a0, preferred_element_type=jnp.float32)
                    + jnp.dot(x_ref[T - 1 - t], b0,
                              preferred_element_type=jnp.float32)
                    + bias0)
            gxbuf[pl.ds(t, 1)] = gx_t[None]
            return carry

        jax.lax.fori_loop(0, T, gx0_body, 0, unroll=unroll)

        # ---- one bidirectional recurrence over the packed state [h_f | h_b] ----
        def run_layer(whh_mat, store_to_out):
            def body(t, carry):
                h, c = carry
                # single MXU push: (B,2H) @ block-diag (2H,8H) -> full 128-lane gate row
                gates = gxbuf[t] + jnp.dot(h, whh_mat,
                                           preferred_element_type=jnp.float32)
                # gate column order: [i_f,i_b | f_f,f_b | o_f,o_b | g_f,g_b]
                sig = jax.nn.sigmoid(gates[:, 0:3 * H2])      # one wide sigmoid (i,f,o)
                i_g = sig[:, 0:H2]
                f_g = sig[:, H2:2 * H2]
                o_g = sig[:, 2 * H2:3 * H2]
                g_g = jnp.tanh(gates[:, 3 * H2:4 * H2])       # one tanh (g)
                c = f_g * c + i_g * g_g
                h = o_g * jnp.tanh(c)
                if store_to_out:
                    out_ref[pl.ds(t, 1)] = h[None].astype(out_ref.dtype)
                else:
                    hbuf[pl.ds(t, 1)] = h[None]               # single lane-dense store
                return h, c

            z = jnp.zeros((Bsz, H2), jnp.float32)
            jax.lax.fori_loop(0, T, body, (z, z), unroll=unroll)

        # layer 0 (weights loaded once, outside the recurrence loop)
        run_layer(whh_ref[0], store_to_out=(num_layers == 1))

        # ---- layers 1..L-1: in-kernel input projection from the packed hbuf slab ----
        for layer in range(1, num_layers):
            a_m = a_ref[layer - 1]          # (2H, 8H)
            b_m = b_ref[layer - 1]          # (2H, 8H)
            bias_m = bias_ref[layer - 1]    # (1, 8H)

            def gx_body(t, carry, a_m=a_m, b_m=b_m, bias_m=bias_m):
                gx_t = (jnp.dot(hbuf[t], a_m, preferred_element_type=jnp.float32)
                        + jnp.dot(hbuf[T - 1 - t], b_m,
                                  preferred_element_type=jnp.float32)
                        + bias_m)
                gxbuf[pl.ds(t, 1)] = gx_t[None]
                return carry

            jax.lax.fori_loop(0, T, gx_body, 0, unroll=unroll)
            run_layer(whh_ref[layer], store_to_out=(layer == num_layers - 1))

    return kernel


# ----------------------------- parameter preparation -----------------------------
def init_bilstm_params(key, input_dim, hidden_dim, layer_num):
    """Raw nn.LSTM-style parameters (transposed), uniform(-k, k) init."""
    H = hidden_dim // 2
    k = 1.0 / float(H) ** 0.5
    params = []
    for layer in range(layer_num):
        in_dim = input_dim if layer == 0 else hidden_dim
        dirs = []
        for _ in range(2):  # forward, backward
            key, k1, k2, k3, k4 = jax.random.split(key, 5)
            w_ih = jax.random.uniform(k1, (4 * H, in_dim), jnp.float32, -k, k)
            w_hh = jax.random.uniform(k2, (4 * H, H), jnp.float32, -k, k)
            b_ih = jax.random.uniform(k3, (4 * H,), jnp.float32, -k, k)
            b_hh = jax.random.uniform(k4, (4 * H,), jnp.float32, -k, k)
            dirs.append({"wih_t": w_ih.T,                  # (in_dim, 4H) order [i,f,g,o]
                         "whh_t": w_hh.T,                  # (H, 4H)
                         "bias": (b_ih + b_hh)[None, :]})  # (1, 4H)
        params.append(tuple(dirs))
    return params


def _permute_cols(w_f, w_b, H):
    """(rows,4H) PyTorch [i,f,g,o] per direction -> (rows,8H) [i_f,i_b,f_f,f_b,o_f,o_b,g_f,g_b]."""
    def sp(w):
        return w[:, 0:H], w[:, H:2 * H], w[:, 2 * H:3 * H], w[:, 3 * H:4 * H]
    i_f, f_f, g_f, o_f = sp(w_f)
    i_b, f_b, g_b, o_b = sp(w_b)
    return jnp.concatenate([i_f, i_b, f_f, f_b, o_f, o_b, g_f, g_b], axis=1)


def prepare_kernel_params(raw_params):
    """One-time fusion / gate-column permutation of nn.LSTM parameters for the kernel."""
    H = raw_params[0][0]["whh_t"].shape[0]
    L = len(raw_params)
    fwd_col = (jnp.arange(8 * H) // H) % 2 == 0        # True on forward-gate columns

    # Layer 0 input projection split by which time index it consumes.
    f0, b0p = raw_params[0]
    w0_perm = _permute_cols(f0["wih_t"], b0p["wih_t"], H)          # (E, 8H)
    a0 = jnp.where(fwd_col[None, :], w0_perm, 0.0)                 # consumes x(t)
    b0 = w0_perm - a0                                              # consumes x(T-1-t)
    bias0 = _permute_cols(f0["bias"], b0p["bias"], H)              # (1, 8H)

    # Block-diagonal recurrent weights per layer: rows 0:H act on h_f, rows H:2H on h_b.
    whh_list = []
    for fwd, bwd in raw_params:
        top = _permute_cols(fwd["whh_t"], jnp.zeros_like(bwd["whh_t"]), H)   # (H, 8H)
        bot = _permute_cols(jnp.zeros_like(fwd["whh_t"]), bwd["whh_t"], H)   # (H, 8H)
        whh_list.append(jnp.concatenate([top, bot], axis=0))                # (2H, 8H)
    out = {"a0": a0, "b0": b0, "bias0": bias0, "whh_blk": jnp.stack(whh_list, 0)}

    if L > 1:
        a_list, b_list, bias_list = [], [], []
        rows_fwd = (jnp.arange(2 * H) < H)[:, None]                # h_f rows of the packed input
        for fwd, bwd in raw_params[1:]:
            w_perm = _permute_cols(fwd["wih_t"], bwd["wih_t"], H)  # (2H, 8H)
            a_mask = jnp.where(rows_fwd, fwd_col[None, :], ~fwd_col[None, :])
            a_mat = jnp.where(a_mask, w_perm, 0.0)                 # consumes hbuf[t]
            b_mat = w_perm - a_mat                                 # consumes hbuf[T-1-t]
            a_list.append(a_mat)
            b_list.append(b_mat)
            bias_list.append(_permute_cols(fwd["bias"], bwd["bias"], H))
        out["a_rest"] = jnp.stack(a_list, 0)                       # (L-1, 2H, 8H)
        out["b_rest"] = jnp.stack(b_list, 0)                       # (L-1, 2H, 8H)
        out["bias_rest"] = jnp.stack(bias_list, 0)                 # (L-1, 1, 8H)
    return out


# ----------------------------- forward wrapper -----------------------------
@functools.partial(jax.jit, static_argnames=("layer_num",))
def bilstm_forward(words_embedded, kernel_params, *, layer_num):
    x = jnp.transpose(words_embedded.astype(jnp.float32), (1, 0, 2))   # (T, B, E)
    T, B, E = x.shape
    H2 = kernel_params["whh_blk"].shape[1]    # 2H
    G = kernel_params["whh_blk"].shape[2]     # 8H
    H = H2 // 2
    unroll = True if T <= 16 else 8

    inputs = [x, kernel_params["a0"], kernel_params["b0"], kernel_params["bias0"],
              kernel_params["whh_blk"]]
    in_specs = [
        pl.BlockSpec((T, B, E), lambda i: (0, 0, 0)),
        pl.BlockSpec((E, G), lambda i: (0, 0)),
        pl.BlockSpec((E, G), lambda i: (0, 0)),
        pl.BlockSpec((1, G), lambda i: (0, 0)),
        pl.BlockSpec((layer_num, H2, G), lambda i: (0, 0, 0)),
    ]
    if layer_num > 1:
        inputs += [kernel_params["a_rest"], kernel_params["b_rest"],
                   kernel_params["bias_rest"]]
        in_specs += [
            pl.BlockSpec((layer_num - 1, H2, G), lambda i: (0, 0, 0)),
            pl.BlockSpec((layer_num - 1, H2, G), lambda i: (0, 0, 0)),
            pl.BlockSpec((layer_num - 1, 1, G), lambda i: (0, 0, 0)),
        ]

    out_tbh = pl.pallas_call(
        _make_stack_kernel(layer_num, unroll),
        out_shape=jax.ShapeDtypeStruct((T, B, H2), jnp.float32),
        grid=(1,),
        in_specs=in_specs,
        out_specs=pl.BlockSpec((T, B, H2), lambda i: (0, 0, 0)),
        scratch_shapes=[pltpu.VMEM((T, B, G), jnp.float32),     # gx of current layer
                        pltpu.VMEM((T, B, H2), jnp.float32)],   # packed h of current layer
        compiler_params=pltpu.CompilerParams(
            dimension_semantics=("arbitrary",)),                # sequential recurrence inside
    )(*inputs)

    # Backward half of the packed output is in reversed step order; fix once per call.
    out_tbh = jnp.concatenate([out_tbh[:, :, :H], out_tbh[::-1, :, H:]], axis=-1)
    return jnp.transpose(out_tbh, (1, 0, 2))                    # (B, T, hidden)


# ---------------- pure-JAX reference (for correctness check) ----------------
def _ref_dir(x, wih_t, whh_t, bias, reverse):
    B, T, _ = x.shape
    H = whh_t.shape[0]
    xs = x[:, ::-1, :] if reverse else x
    xs_t = jnp.transpose(xs, (1, 0, 2))

    def step(carry, x_t):
        h, c = carry
        gates = x_t @ wih_t + h @ whh_t + bias
        i = jax.nn.sigmoid(gates[:, 0 * H:1 * H])
        f = jax.nn.sigmoid(gates[:, 1 * H:2 * H])
        g = jnp.tanh(gates[:, 2 * H:3 * H])
        o = jax.nn.sigmoid(gates[:, 3 * H:4 * H])
        c = f * c + i * g
        h = o * jnp.tanh(c)
        return (h, c), h

    init = (jnp.zeros((B, H), jnp.float32), jnp.zeros((B, H), jnp.float32))
    _, hs = jax.lax.scan(step, init, xs_t)
    hs = jnp.transpose(hs, (1, 0, 2))
    return hs[:, ::-1, :] if reverse else hs


def bilstm_reference(x, params, layer_num):
    x = x.astype(jnp.float32)
    for layer in range(layer_num):
        fwd_p, bwd_p = params[layer]
        h_f = _ref_dir(x, fwd_p["wih_t"], fwd_p["whh_t"], fwd_p["bias"], False)
        h_b = _ref_dir(x, bwd_p["wih_t"], bwd_p["whh_t"], bwd_p["bias"], True)
        x = jnp.concatenate([h_f, h_b], axis=-1)
    return x


if __name__ == "__main__":
    # BiLSTM(input_dim=16, hidden_dim=32, layer_num=2, dropout=0.0)
    B, T, E, HIDDEN, LAYERS = 2, 8, 16, 32, 2

    key = jax.random.PRNGKey(0)
    key, xk, pk = jax.random.split(key, 3)
    words_embedded = jax.random.normal(xk, (B, T, E), jnp.float32)
    raw_params = init_bilstm_params(pk, E, HIDDEN, LAYERS)
    kernel_params = prepare_kernel_params(raw_params)

    out = bilstm_forward(words_embedded, kernel_params, layer_num=LAYERS)
    out = jax.block_until_ready(out)

    assert out.shape == (B, T, HIDDEN), out.shape

    ref = bilstm_reference(words_embedded, raw_params, LAYERS)
    if not jnp.allclose(out, ref, atol=5e-4, rtol=5e-4):
        err = float(jnp.max(jnp.abs(out - ref)))
        raise AssertionError(f"Pallas BiLSTM output mismatch vs reference, max err {err}")

    print("KERNEL_OK")
</pallas_src>

<mosaic_0001>
module attributes {stable_mosaic.version = 11 : i64} {
  func.func @kernel(%arg0: i32, %arg1: memref<8x2x16xf32, #tpu.memory_space<vmem>>, %arg2: memref<16x128xf32, #tpu.memory_space<vmem>>, %arg3: memref<16x128xf32, #tpu.memory_space<vmem>>, %arg4: memref<1x128xf32, #tpu.memory_space<vmem>>, %arg5: memref<2x32x128xf32, #tpu.memory_space<vmem>>, %arg6: memref<1x32x128xf32, #tpu.memory_space<vmem>>, %arg7: memref<1x32x128xf32, #tpu.memory_space<vmem>>, %arg8: memref<1x1x128xf32, #tpu.memory_space<vmem>>, %arg9: memref<8x2x32xf32, #tpu.memory_space<vmem>>, %arg10: memref<8x2x128xf32, #tpu.memory_space<vmem>>, %arg11: memref<8x2x32xf32, #tpu.memory_space<vmem>>) attributes {dimension_semantics = [#tpu.dimension_semantics<arbitrary>], iteration_bounds = array<i64: 1>, scalar_prefetch = 0 : i64, scratch_operands = 2 : i64, tpu.core_type = #tpu.core_type<tc>, window_params = [{pipeline_mode = #tpu.pipeline_mode<synchronous>, transform_indices = @transform_0, window_bounds = array<i64: 8, 2, 16>}, {pipeline_mode = #tpu.pipeline_mode<synchronous>, transform_indices = @transform_1, window_bounds = array<i64: 16, 128>}, {pipeline_mode = #tpu.pipeline_mode<synchronous>, transform_indices = @transform_2, window_bounds = array<i64: 16, 128>}, {pipeline_mode = #tpu.pipeline_mode<synchronous>, transform_indices = @transform_3, window_bounds = array<i64: 1, 128>}, {pipeline_mode = #tpu.pipeline_mode<synchronous>, transform_indices = @transform_4, window_bounds = array<i64: 2, 32, 128>}, {pipeline_mode = #tpu.pipeline_mode<synchronous>, transform_indices = @transform_5, window_bounds = array<i64: 1, 32, 128>}, {pipeline_mode = #tpu.pipeline_mode<synchronous>, transform_indices = @transform_6, window_bounds = array<i64: 1, 32, 128>}, {pipeline_mode = #tpu.pipeline_mode<synchronous>, transform_indices = @transform_7, window_bounds = array<i64: 1, 1, 128>}, {pipeline_mode = #tpu.pipeline_mode<synchronous>, transform_indices = @transform_8, window_bounds = array<i64: 8, 2, 32>}]} {
    %c0 = arith.constant 0 : index
    %c0_0 = arith.constant 0 : index
    %0 = vector.load %arg2[%c0, %c0_0] : memref<16x128xf32, #tpu.memory_space<vmem>>, vector<16x128xf32>
    %c0_1 = arith.constant 0 : index
    %c0_2 = arith.constant 0 : index
    %1 = vector.load %arg3[%c0_1, %c0_2] : memref<16x128xf32, #tpu.memory_space<vmem>>, vector<16x128xf32>
    %c0_3 = arith.constant 0 : index
    %c0_4 = arith.constant 0 : index
    %2 = vector.load %arg4[%c0_3, %c0_4] : memref<1x128xf32, #tpu.memory_space<vmem>>, vector<1x128xf32>
    %c0_i32 = arith.constant 0 : i32
    %3 = arith.index_cast %c0_i32 : i32 to index
    %c0_5 = arith.constant 0 : index
    %c0_6 = arith.constant 0 : index
    %4 = vector.load %arg1[%3, %c0_5, %c0_6] : memref<8x2x16xf32, #tpu.memory_space<vmem>>, vector<1x2x16xf32>
    %5 = vector.shape_cast %4 : vector<1x2x16xf32> to vector<2x16xf32>
    %cst = arith.constant dense<0.000000e+00> : vector<2x128xf32>
    %6 = tpu.matmul %5, %0, %cst {dimension_numbers = #tpu.dot_dimension_numbers<[1], [0], [0], [1], [0, 0, 1, 1], [], []>} : vector<2x16xf32>, vector<16x128xf32>, vector<2x128xf32> -> vector<2x128xf32>
    %c7_i32 = arith.constant 7 : i32
    %7 = arith.subi %c7_i32, %c0_i32 : i32
    %8 = arith.index_cast %7 : i32 to index
    %c0_7 = arith.constant 0 : index
    %c0_8 = arith.constant 0 : index
    %9 = vector.load %arg1[%8, %c0_7, %c0_8] : memref<8x2x16xf32, #tpu.memory_space<vmem>>, vector<1x2x16xf32>
    %10 = vector.shape_cast %9 : vector<1x2x16xf32> to vector<2x16xf32>
    %cst_9 = arith.constant dense<0.000000e+00> : vector<2x128xf32>
    %11 = tpu.matmul %10, %1, %cst_9 {dimension_numbers = #tpu.dot_dimension_numbers<[1], [0], [0], [1], [0, 0, 1, 1], [], []>} : vector<2x16xf32>, vector<16x128xf32>, vector<2x128xf32> -> vector<2x128xf32>
    %12 = arith.addf %6, %11 : vector<2x128xf32>
    %13 = vector.broadcast %2 : vector<1x128xf32> to vector<2x128xf32>
    %14 = arith.addf %12, %13 : vector<2x128xf32>
    %15 = vector.shape_cast %14 : vector<2x128xf32> to vector<1x2x128xf32>
    %16 = arith.index_cast %c0_i32 : i32 to index
    %c0_10 = arith.constant 0 : index
    %c0_11 = arith.constant 0 : index
    %17 = vector.load %arg10[%16, %c0_10, %c0_11] : memref<8x2x128xf32, #tpu.memory_space<vmem>>, vector<1x2x128xf32>
    tpu.vector_store %arg10[%16, %c0_10, %c0_11], %15 {strides = array<i32>} : memref<8x2x128xf32, #tpu.memory_space<vmem>>, vector<1x2x128xf32>,
    %c1_i32 = arith.constant 1 : i32
    %18 = arith.index_cast %c1_i32 : i32 to index
    %c0_12 = arith.constant 0 : index
    %c0_13 = arith.constant 0 : index
    %19 = vector.load %arg1[%18, %c0_12, %c0_13] : memref<8x2x16xf32, #tpu.memory_space<vmem>>, vector<1x2x16xf32>
    %20 = vector.shape_cast %19 : vector<1x2x16xf32> to vector<2x16xf32>
    %cst_14 = arith.constant dense<0.000000e+00> : vector<2x128xf32>
    %21 = tpu.matmul %20, %0, %cst_14 {dimension_numbers = #tpu.dot_dimension_numbers<[1], [0], [0], [1], [0, 0, 1, 1], [], []>} : vector<2x16xf32>, vector<16x128xf32>, vector<2x128xf32> -> vector<2x128xf32>
    %c7_i32_15 = arith.constant 7 : i32
    %22 = arith.subi %c7_i32_15, %c1_i32 : i32
    %23 = arith.index_cast %22 : i32 to index
    %c0_16 = arith.constant 0 : index
    %c0_17 = arith.constant 0 : index
    %24 = vector.load %arg1[%23, %c0_16, %c0_17] : memref<8x2x16xf32, #tpu.memory_space<vmem>>, vector<1x2x16xf32>
    %25 = vector.shape_cast %24 : vector<1x2x16xf32> to vector<2x16xf32>
    %cst_18 = arith.constant dense<0.000000e+00> : vector<2x128xf32>
    %26 = tpu.matmul %25, %1, %cst_18 {dimension_numbers = #tpu.dot_dimension_numbers<[1], [0], [0], [1], [0, 0, 1, 1], [], []>} : vector<2x16xf32>, vector<16x128xf32>, vector<2x128xf32> -> vector<2x128xf32>
    %27 = arith.addf %21, %26 : vector<2x128xf32>
    %28 = vector.broadcast %2 : vector<1x128xf32> to vector<2x128xf32>
    %29 = arith.addf %27, %28 : vector<2x128xf32>
    %30 = vector.shape_cast %29 : vector<2x128xf32> to vector<1x2x128xf32>
    %31 = arith.index_cast %c1_i32 : i32 to index
    %c0_19 = arith.constant 0 : index
    %c0_20 = arith.constant 0 : index
    %32 = vector.load %arg10[%31, %c0_19, %c0_20] : memref<8x2x128xf32, #tpu.memory_space<vmem>>, vector<1x2x128xf32>
    tpu.vector_store %arg10[%31, %c0_19, %c0_20], %30 {strides = array<i32>} : memref<8x2x128xf32, #tpu.memory_space<vmem>>, vector<1x2x128xf32>,
    %c2_i32 = arith.constant 2 : i32
    %33 = arith.index_cast %c2_i32 : i32 to index
    %c0_21 = arith.constant 0 : index
    %c0_22 = arith.constant 0 : index
    %34 = vector.load %arg1[%33, %c0_21, %c0_22] : memref<8x2x16xf32, #tpu.memory_space<vmem>>, vector<1x2x16xf32>
    %35 = vector.shape_cast %34 : vector<1x2x16xf32> to vector<2x16xf32>
    %cst_23 = arith.constant dense<0.000000e+00> : vector<2x128xf32>
    %36 = tpu.matmul %35, %0, %cst_23 {dimension_numbers = #tpu.dot_dimension_numbers<[1], [0], [0], [1], [0, 0, 1, 1], [], []>} : vector<2x16xf32>, vector<16x128xf32>, vector<2x128xf32> -> vector<2x128xf32>
    %c7_i32_24 = arith.constant 7 : i32
    %37 = arith.subi %c7_i32_24, %c2_i32 : i32
    %38 = arith.index_cast %37 : i32 to index
    %c0_25 = arith.constant 0 : index
    %c0_26 = arith.constant 0 : index
    %39 = vector.load %arg1[%38, %c0_25, %c0_26] : memref<8x2x16xf32, #tpu.memory_space<vmem>>, vector<1x2x16xf32>
    %40 = vector.shape_cast %39 : vector<1x2x16xf32> to vector<2x16xf32>
    %cst_27 = arith.constant dense<0.000000e+00> : vector<2x128xf32>
    %41 = tpu.matmul %40, %1, %cst_27 {dimension_numbers = #tpu.dot_dimension_numbers<[1], [0], [0], [1], [0, 0, 1, 1], [], []>} : vector<2x16xf32>, vector<16x128xf32>, vector<2x128xf32> -> vector<2x128xf32>
    %42 = arith.addf %36, %41 : vector<2x128xf32>
    %43 = vector.broadcast %2 : vector<1x128xf32> to vector<2x128xf32>
    %44 = arith.addf %42, %43 : vector<2x128xf32>
    %45 = vector.shape_cast %44 : vector<2x128xf32> to vector<1x2x128xf32>
    %46 = arith.index_cast %c2_i32 : i32 to index
    %c0_28 = arith.constant 0 : index
    %c0_29 = arith.constant 0 : index
    %47 = vector.load %arg10[%46, %c0_28, %c0_29] : memref<8x2x128xf32, #tpu.memory_space<vmem>>, vector<1x2x128xf32>
    tpu.vector_store %arg10[%46, %c0_28, %c0_29], %45 {strides = array<i32>} : memref<8x2x128xf32, #tpu.memory_space<vmem>>, vector<1x2x128xf32>,
    %c3_i32 = arith.constant 3 : i32
    %48 = arith.index_cast %c3_i32 : i32 to index
    %c0_30 = arith.constant 0 : index
    %c0_31 = arith.constant 0 : index
    %49 = vector.load %arg1[%48, %c0_30, %c0_31] : memref<8x2x16xf32, #tpu.memory_space<vmem>>, vector<1x2x16xf32>
    %50 = vector.shape_cast %49 : vector<1x2x16xf32> to vector<2x16xf32>
    %cst_32 = arith.constant dense<0.000000e+00> : vector<2x128xf32>
    %51 = tpu.matmul %50, %0, %cst_32 {dimension_numbers = #tpu.dot_dimension_numbers<[1], [0], [0], [1], [0, 0, 1, 1], [], []>} : vector<2x16xf32>, vector<16x128xf32>, vector<2x128xf32> -> vector<2x128xf32>
    %c7_i32_33 = arith.constant 7 : i32
    %52 = arith.subi %c7_i32_33, %c3_i32 : i32
    %53 = arith.index_cast %52 : i32 to index
    %c0_34 = arith.constant 0 : index
    %c0_35 = arith.constant 0 : index
    %54 = vector.load %arg1[%53, %c0_34, %c0_35] : memref<8x2x16xf32, #tpu.memory_space<vmem>>, vector<1x2x16xf32>
    %55 = vector.shape_cast %54 : vector<1x2x16xf32> to vector<2x16xf32>
    %cst_36 = arith.constant dense<0.000000e+00> : vector<2x128xf32>
    %56 = tpu.matmul %55, %1, %cst_36 {dimension_numbers = #tpu.dot_dimension_numbers<[1], [0], [0], [1], [0, 0, 1, 1], [], []>} : vector<2x16xf32>, vector<16x128xf32>, vector<2x128xf32> -> vector<2x128xf32>
    %57 = arith.addf %51, %56 : vector<2x128xf32>
    %58 = vector.broadcast %2 : vector<1x128xf32> to vector<2x128xf32>
    %59 = arith.addf %57, %58 : vector<2x128xf32>
    %60 = vector.shape_cast %59 : vector<2x128xf32> to vector<1x2x128xf32>
    %61 = arith.index_cast %c3_i32 : i32 to index
    %c0_37 = arith.constant 0 : index
    %c0_38 = arith.constant 0 : index
    %62 = vector.load %arg10[%61, %c0_37, %c0_38] : memref<8x2x128xf32, #tpu.memory_space<vmem>>, vector<1x2x128xf32>
    tpu.vector_store %arg10[%61, %c0_37, %c0_38], %60 {strides = array<i32>} : memref<8x2x128xf32, #tpu.memory_space<vmem>>, vector<1x2x128xf32>,
    %c4_i32 = arith.constant 4 : i32
    %63 = arith.index_cast %c4_i32 : i32 to index
    %c0_39 = arith.constant 0 : index
    %c0_40 = arith.constant 0 : index
    %64 = vector.load %arg1[%63, %c0_39, %c0_40] : memref<8x2x16xf32, #tpu.memory_space<vmem>>, vector<1x2x16xf32>
    %65 = vector.shape_cast %64 : vector<1x2x16xf32> to vector<2x16xf32>
    %cst_41 = arith.constant dense<0.000000e+00> : vector<2x128xf32>
    %66 = tpu.matmul %65, %0, %cst_41 {dimension_numbers = #tpu.dot_dimension_numbers<[1], [0], [0], [1], [0, 0, 1, 1], [], []>} : vector<2x16xf32>, vector<16x128xf32>, vector<2x128xf32> -> vector<2x128xf32>
    %c7_i32_42 = arith.constant 7 : i32
    %67 = arith.subi %c7_i32_42, %c4_i32 : i32
    %68 = arith.index_cast %67 : i32 to index
    %c0_43 = arith.constant 0 : index
    %c0_44 = arith.constant 0 : index
    %69 = vector.load %arg1[%68, %c0_43, %c0_44] : memref<8x2x16xf32, #tpu.memory_space<vmem>>, vector<1x2x16xf32>
    %70 = vector.shape_cast %69 : vector<1x2x16xf32> to vector<2x16xf32>
    %cst_45 = arith.constant dense<0.000000e+00> : vector<2x128xf32>
    %71 = tpu.matmul %70, %1, %cst_45 {dimension_numbers = #tpu.dot_dimension_numbers<[1], [0], [0], [1], [0, 0, 1, 1], [], []>} : vector<2x16xf32>, vector<16x128xf32>, vector<2x128xf32> -> vector<2x128xf32>
    %72 = arith.addf %66, %71 : vector<2x128xf32>
    %73 = vector.broadcast %2 : vector<1x128xf32> to vector<2x128xf32>
    %74 = arith.addf %72, %73 : vector<2x128xf32>
    %75 = vector.shape_cast %74 : vector<2x128xf32> to vector<1x2x128xf32>
    %76 = arith.index_cast %c4_i32 : i32 to index
    %c0_46 = arith.constant 0 : index
    %c0_47 = arith.constant 0 : index
    %77 = vector.load %arg10[%76, %c0_46, %c0_47] : memref<8x2x128xf32, #tpu.memory_space<vmem>>, vector<1x2x128xf32>
    tpu.vector_store %arg10[%76, %c0_46, %c0_47], %75 {strides = array<i32>} : memref<8x2x128xf32, #tpu.memory_space<vmem>>, vector<1x2x128xf32>,
    %c5_i32 = arith.constant 5 : i32
    %78 = arith.index_cast %c5_i32 : i32 to index
    %c0_48 = arith.constant 0 : index
    %c0_49 = arith.constant 0 : index
    %79 = vector.load %arg1[%78, %c0_48, %c0_49] : memref<8x2x16xf32, #tpu.memory_space<vmem>>, vector<1x2x16xf32>
    %80 = vector.shape_cast %79 : vector<1x2x16xf32> to vector<2x16xf32>
    %cst_50 = arith.constant dense<0.000000e+00> : vector<2x128xf32>
    %81 = tpu.matmul %80, %0, %cst_50 {dimension_numbers = #tpu.dot_dimension_numbers<[1], [0], [0], [1], [0, 0, 1, 1], [], []>} : vector<2x16xf32>, vector<16x128xf32>, vector<2x128xf32> -> vector<2x128xf32>
    %c7_i32_51 = arith.constant 7 : i32
    %82 = arith.subi %c7_i32_51, %c5_i32 : i32
    %83 = arith.index_cast %82 : i32 to index
    %c0_52 = arith.constant 0 : index
    %c0_53 = arith.constant 0 : index
    %84 = vector.load %arg1[%83, %c0_52, %c0_53] : memref<8x2x16xf32, #tpu.memory_space<vmem>>, vector<1x2x16xf32>
    %85 = vector.shape_cast %84 : vector<1x2x16xf32> to vector<2x16xf32>
    %cst_54 = arith.constant dense<0.000000e+00> : vector<2x128xf32>
    %86 = tpu.matmul %85, %1, %cst_54 {dimension_numbers = #tpu.dot_dimension_numbers<[1], [0], [0], [1], [0, 0, 1, 1], [], []>} : vector<2x16xf32>, vector<16x128xf32>, vector<2x128xf32> -> vector<2x128xf32>
    %87 = arith.addf %81, %86 : vector<2x128xf32>
    %88 = vector.broadcast %2 : vector<1x128xf32> to vector<2x128xf32>
    %89 = arith.addf %87, %88 : vector<2x128xf32>
    %90 = vector.shape_cast %89 : vector<2x128xf32> to vector<1x2x128xf32>
    %91 = arith.index_cast %c5_i32 : i32 to index
    %c0_55 = arith.constant 0 : index
    %c0_56 = arith.constant 0 : index
    %92 = vector.load %arg10[%91, %c0_55, %c0_56] : memref<8x2x128xf32, #tpu.memory_space<vmem>>, vector<1x2x128xf32>
    tpu.vector_store %arg10[%91, %c0_55, %c0_56], %90 {strides = array<i32>} : memref<8x2x128xf32, #tpu.memory_space<vmem>>, vector<1x2x128xf32>,
    %c6_i32 = arith.constant 6 : i32
    %93 = arith.index_cast %c6_i32 : i32 to index
    %c0_57 = arith.constant 0 : index
    %c0_58 = arith.constant 0 : index
    %94 = vector.load %arg1[%93, %c0_57, %c0_58] : memref<8x2x16xf32, #tpu.memory_space<vmem>>, vector<1x2x16xf32>
    %95 = vector.shape_cast %94 : vector<1x2x16xf32> to vector<2x16xf32>
    %cst_59 = arith.constant dense<0.000000e+00> : vector<2x128xf32>
    %96 = tpu.matmul %95, %0, %cst_59 {dimension_numbers = #tpu.dot_dimension_numbers<[1], [0], [0], [1], [0, 0, 1, 1], [], []>} : vector<2x16xf32>, vector<16x128xf32>, vector<2x128xf32> -> vector<2x128xf32>
    %c7_i32_60 = arith.constant 7 : i32
    %97 = arith.subi %c7_i32_60, %c6_i32 : i32
    %98 = arith.index_cast %97 : i32 to index
    %c0_61 = arith.constant 0 : index
    %c0_62 = arith.constant 0 : index
    %99 = vector.load %arg1[%98, %c0_61, %c0_62] : memref<8x2x16xf32, #tpu.memory_space<vmem>>, vector<1x2x16xf32>
    %100 = vector.shape_cast %99 : vector<1x2x16xf32> to vector<2x16xf32>
    %cst_63 = arith.constant dense<0.000000e+00> : vector<2x128xf32>
    %101 = tpu.matmul %100, %1, %cst_63 {dimension_numbers = #tpu.dot_dimension_numbers<[1], [0], [0], [1], [0, 0, 1, 1], [], []>} : vector<2x16xf32>, vector<16x128xf32>, vector<2x128xf32> -> vector<2x128xf32>
    %102 = arith.addf %96, %101 : vector<2x128xf32>
    %103 = vector.broadcast %2 : vector<1x128xf32> to vector<2x128xf32>
    %104 = arith.addf %102, %103 : vector<2x128xf32>
    %105 = vector.shape_cast %104 : vector<2x128xf32> to vector<1x2x128xf32>
    %106 = arith.index_cast %c6_i32 : i32 to index
    %c0_64 = arith.constant 0 : index
    %c0_65 = arith.constant 0 : index
    %107 = vector.load %arg10[%106, %c0_64, %c0_65] : memref<8x2x128xf32, #tpu.memory_space<vmem>>, vector<1x2x128xf32>
    tpu.vector_store %arg10[%106, %c0_64, %c0_65], %105 {strides = array<i32>} : memref<8x2x128xf32, #tpu.memory_space<vmem>>, vector<1x2x128xf32>,
    %c7_i32_66 = arith.constant 7 : i32
    %108 = arith.index_cast %c7_i32_66 : i32 to index
    %c0_67 = arith.constant 0 : index
    %c0_68 = arith.constant 0 : index
    %109 = vector.load %arg1[%108, %c0_67, %c0_68] : memref<8x2x16xf32, #tpu.memory_space<vmem>>, vector<1x2x16xf32>
    %110 = vector.shape_cast %109 : vector<1x2x16xf32> to vector<2x16xf32>
    %cst_69 = arith.constant dense<0.000000e+00> : vector<2x128xf32>
    %111 = tpu.matmul %110, %0, %cst_69 {dimension_numbers = #tpu.dot_dimension_numbers<[1], [0], [0], [1], [0, 0, 1, 1], [], []>} : vector<2x16xf32>, vector<16x128xf32>, vector<2x128xf32> -> vector<2x128xf32>
    %c7_i32_70 = arith.constant 7 : i32
    %112 = arith.subi %c7_i32_70, %c7_i32_66 : i32
    %113 = arith.index_cast %112 : i32 to index
    %c0_71 = arith.constant 0 : index
    %c0_72 = arith.constant 0 : index
    %114 = vector.load %arg1[%113, %c0_71, %c0_72] : memref<8x2x16xf32, #tpu.memory_space<vmem>>, vector<1x2x16xf32>
    %115 = vector.shape_cast %114 : vector<1x2x16xf32> to vector<2x16xf32>
    %cst_73 = arith.constant dense<0.000000e+00> : vector<2x128xf32>
    %116 = tpu.matmul %115, %1, %cst_73 {dimension_numbers = #tpu.dot_dimension_numbers<[1], [0], [0], [1], [0, 0, 1, 1], [], []>} : vector<2x16xf32>, vector<16x128xf32>, vector<2x128xf32> -> vector<2x128xf32>
    %117 = arith.addf %111, %116 : vector<2x128xf32>
    %118 = vector.broadcast %2 : vector<1x128xf32> to vector<2x128xf32>
    %119 = arith.addf %117, %118 : vector<2x128xf32>
    %120 = vector.shape_cast %119 : vector<2x128xf32> to vector<1x2x128xf32>
    %121 = arith.index_cast %c7_i32_66 : i32 to index
    %c0_74 = arith.constant 0 : index
    %c0_75 = arith.constant 0 : index
    %122 = vector.load %arg10[%121, %c0_74, %c0_75] : memref<8x2x128xf32, #tpu.memory_space<vmem>>, vector<1x2x128xf32>
    tpu.vector_store %arg10[%121, %c0_74, %c0_75], %120 {strides = array<i32>} : memref<8x2x128xf32, #tpu.memory_space<vmem>>, vector<1x2x128xf32>,
    %c8_i32 = arith.constant 8 : i32
    %c0_76 = arith.constant 0 : index
    %c0_77 = arith.constant 0 : index
    %c0_78 = arith.constant 0 : index
    %123 = vector.load %arg5[%c0_76, %c0_77, %c0_78] : memref<2x32x128xf32, #tpu.memory_space<vmem>>, vector<1x32x128xf32>
    %124 = vector.shape_cast %123 : vector<1x32x128xf32> to vector<32x128xf32>
    %cst_79 = arith.constant 0.000000e+00 : f32
    %125 = vector.broadcast %cst_79 : f32 to vector<2x32xf32>
    %c0_i32_80 = arith.constant 0 : i32
    %126 = arith.index_cast %c0_i32_80 : i32 to index
    %c0_81 = arith.constant 0 : index
    %c0_82 = arith.constant 0 : index
    %127 = vector.load %arg10[%126, %c0_81, %c0_82] : memref<8x2x128xf32, #tpu.memory_space<vmem>>, vector<1x2x128xf32>
    %128 = vector.shape_cast %127 : vector<1x2x128xf32> to vector<2x128xf32>
    %cst_83 = arith.constant dense<0.000000e+00> : vector<2x128xf32>
    %129 = tpu.matmul %125, %124, %cst_83 {dimension_numbers = #tpu.dot_dimension_numbers<[1], [0], [0], [1], [0, 0, 1, 1], [], []>} : vector<2x32xf32>, vector<32x128xf32>, vector<2x128xf32> -> vector<2x128xf32>
    %130 = arith.addf %128, %129 : vector<2x128xf32>
    %131 = vector.extract_strided_slice %130 {offsets = [0, 0], sizes = [2, 96], strides = [1, 1]} : vector<2x128xf32> to vector<2x96xf32>
    %132 = arith.negf %131 : vector<2x96xf32>
    %133 = math.exp %132 : vector<2x96xf32>
    %cst_84 = arith.constant 1.000000e+00 : f32
    %134 = vector.broadcast %cst_84 : f32 to vector<2x96xf32>
    %135 = arith.addf %134, %133 : vector<2x96xf32>
    %136 = arith.divf %134, %135 : vector<2x96xf32>
    %137 = vector.extract_strided_slice %136 {offsets = [0, 0], sizes = [2, 32], strides = [1, 1]} : vector<2x96xf32> to vector<2x32xf32>
    %138 = vector.extract_strided_slice %136 {offsets = [0, 32], sizes = [2, 32], strides = [1, 1]} : vector<2x96xf32> to vector<2x32xf32>
    %139 = vector.extract_strided_slice %136 {offsets = [0, 64], sizes = [2, 32], strides = [1, 1]} : vector<2x96xf32> to vector<2x32xf32>
    %140 = vector.extract_strided_slice %130 {offsets = [0, 96], sizes = [2, 32], strides = [1, 1]} : vector<2x128xf32> to vector<2x32xf32>
    %141 = math.tanh %140 : vector<2x32xf32>
    %142 = arith.mulf %138, %125 : vector<2x32xf32>
    %143 = arith.mulf %137, %141 : vector<2x32xf32>
    %144 = arith.addf %142, %143 : vector<2x32xf32>
    %145 = math.tanh %144 : vector<2x32xf32>
    %146 = arith.mulf %139, %145 : vector<2x32xf32>
    %147 = vector.shape_cast %146 : vector<2x32xf32> to vector<1x2x32xf32>
    %148 = arith.index_cast %c0_i32_80 : i32 to index
    %c0_85 = arith.constant 0 : index
    %c0_86 = arith.constant 0 : index
    %149 = vector.load %arg11[%148, %c0_85, %c0_86] : memref<8x2x32xf32, #tpu.memory_space<vmem>>, vector<1x2x32xf32>
    tpu.vector_store %arg11[%148, %c0_85, %c0_86], %147 {strides = array<i32>} : memref<8x2x32xf32, #tpu.memory_space<vmem>>, vector<1x2x32xf32>,
    %c1_i32_87 = arith.constant 1 : i32
    %150 = arith.index_cast %c1_i32_87 : i32 to index
    %c0_88 = arith.constant 0 : index
    %c0_89 = arith.constant 0 : index
    %151 = vector.load %arg10[%150, %c0_88, %c0_89] : memref<8x2x128xf32, #tpu.memory_space<vmem>>, vector<1x2x128xf32>
    %152 = vector.shape_cast %151 : vector<1x2x128xf32> to vector<2x128xf32>
    %cst_90 = arith.constant dense<0.000000e+00> : vector<2x128xf32>
    %153 = tpu.matmul %146, %124, %cst_90 {dimension_numbers = #tpu.dot_dimension_numbers<[1], [0], [0], [1], [0, 0, 1, 1], [], []>} : vector<2x32xf32>, vector<32x128xf32>, vector<2x128xf32> -> vector<2x128xf32>
    %154 = arith.addf %152, %153 : vector<2x128xf32>
    %155 = vector.extract_strided_slice %154 {offsets = [0, 0], sizes = [2, 96], strides = [1, 1]} : vector<2x128xf32> to vector<2x96xf32>
    %156 = arith.negf %155 : vector<2x96xf32>
    %157 = math.exp %156 : vector<2x96xf32>
    %cst_91 = arith.constant 1.000000e+00 : f32
    %158 = vector.broadcast %cst_91 : f32 to vector<2x96xf32>
    %159 = arith.addf %158, %157 : vector<2x96xf32>
    %160 = arith.divf %158, %159 : vector<2x96xf32>
    %161 = vector.extract_strided_slice %160 {offsets = [0, 0], sizes = [2, 32], strides = [1, 1]} : vector<2x96xf32> to vector<2x32xf32>
    %162 = vector.extract_strided_slice %160 {offsets = [0, 32], sizes = [2, 32], strides = [1, 1]} : vector<2x96xf32> to vector<2x32xf32>
    %163 = vector.extract_strided_slice %160 {offsets = [0, 64], sizes = [2, 32], strides = [1, 1]} : vector<2x96xf32> to vector<2x32xf32>
    %164 = vector.extract_strided_slice %154 {offsets = [0, 96], sizes = [2, 32], strides = [1, 1]} : vector<2x128xf32> to vector<2x32xf32>
    %165 = math.tanh %164 : vector<2x32xf32>
    %166 = arith.mulf %162, %144 : vector<2x32xf32>
    %167 = arith.mulf %161, %165 : vector<2x32xf32>
    %168 = arith.addf %166, %167 : vector<2x32xf32>
    %169 = math.tanh %168 : vector<2x32xf32>
    %170 = arith.mulf %163, %169 : vector<2x32xf32>
    %171 = vector.shape_cast %170 : vector<2x32xf32> to vector<1x2x32xf32>
    %172 = arith.index_cast %c1_i32_87 : i32 to index
    %c0_92 = arith.constant 0 : index
    %c0_93 = arith.constant 0 : index
    %173 = vector.load %arg11[%172, %c0_92, %c0_93] : memref<8x2x32xf32, #tpu.memory_space<vmem>>, vector<1x2x32xf32>
    tpu.vector_store %arg11[%172, %c0_92, %c0_93], %171 {strides = array<i32>} : memref<8x2x32xf32, #tpu.memory_space<vmem>>, vector<1x2x32xf32>,
    %c2_i32_94 = arith.constant 2 : i32
    %174 = arith.index_cast %c2_i32_94 : i32 to index
    %c0_95 = arith.constant 0 : index
    %c0_96 = arith.constant 0 : index
    %175 = vector.load %arg10[%174, %c0_95, %c0_96] : memref<8x2x128xf32, #tpu.memory_space<vmem>>, vector<1x2x128xf32>
    %176 = vector.shape_cast %175 : vector<1x2x128xf32> to vector<2x128xf32>
    %cst_97 = arith.constant dense<0.000000e+00> : vector<2x128xf32>
    %177 = tpu.matmul %170, %124, %cst_97 {dimension_numbers = #tpu.dot_dimension_numbers<[1], [0], [0], [1], [0, 0, 1, 1], [], []>} : vector<2x32xf32>, vector<32x128xf32>, vector<2x128xf32> -> vector<2x128xf32>
    %178 = arith.addf %176, %177 : vector<2x128xf32>
    %179 = vector.extract_strided_slice %178 {offsets = [0, 0], sizes = [2, 96], strides = [1, 1]} : vector<2x128xf32> to vector<2x96xf32>
    %180 = arith.negf %179 : vector<2x96xf32>
    %181 = math.exp %180 : vector<2x96xf32>
    %cst_98 = arith.constant 1.000000e+00 : f32
    %182 = vector.broadcast %cst_98 : f32 to vector<2x96xf32>
    %183 = arith.addf %182, %181 : vector<2x96xf32>
    %184 = arith.divf %182, %183 : vector<2x96xf32>
    %185 = vector.extract_strided_slice %184 {offsets = [0, 0], sizes = [2, 32], strides = [1, 1]} : vector<2x96xf32> to vector<2x32xf32>
    %186 = vector.extract_strided_slice %184 {offsets = [0, 32], sizes = [2, 32], strides = [1, 1]} : vector<2x96xf32> to vector<2x32xf32>
    %187 = vector.extract_strided_slice %184 {offsets = [0, 64], sizes = [2, 32], strides = [1, 1]} : vector<2x96xf32> to vector<2x32xf32>
    %188 = vector.extract_strided_slice %178 {offsets = [0, 96], sizes = [2, 32], strides = [1, 1]} : vector<2x128xf32> to vector<2x32xf32>
    %189 = math.tanh %188 : vector<2x32xf32>
    %190 = arith.mulf %186, %168 : vector<2x32xf32>
    %191 = arith.mulf %185, %189 : vector<2x32xf32>
    %192 = arith.addf %190, %191 : vector<2x32xf32>
    %193 = math.tanh %192 : vector<2x32xf32>
    %194 = arith.mulf %187, %193 : vector<2x32xf32>
    %195 = vector.shape_cast %194 : vector<2x32xf32> to vector<1x2x32xf32>
    %196 = arith.index_cast %c2_i32_94 : i32 to index
    %c0_99 = arith.constant 0 : index
    %c0_100 = arith.constant 0 : index
    %197 = vector.load %arg11[%196, %c0_99, %c0_100] : memref<8x2x32xf32, #tpu.memory_space<vmem>>, vector<1x2x32xf32>
    tpu.vector_store %arg11[%196, %c0_99, %c0_100], %195 {strides = array<i32>} : memref<8x2x32xf32, #tpu.memory_space<vmem>>, vector<1x2x32xf32>,
    %c3_i32_101 = arith.constant 3 : i32
    %198 = arith.index_cast %c3_i32_101 : i32 to index
    %c0_102 = arith.constant 0 : index
    %c0_103 = arith.constant 0 : index
    %199 = vector.load %arg10[%198, %c0_102, %c0_103] : memref<8x2x128xf32, #tpu.memory_space<vmem>>, vector<1x2x128xf32>
    %200 = vector.shape_cast %199 : vector<1x2x128xf32> to vector<2x128xf32>
    %cst_104 = arith.constant dense<0.000000e+00> : vector<2x128xf32>
    %201 = tpu.matmul %194, %124, %cst_104 {dimension_numbers = #tpu.dot_dimension_numbers<[1], [0], [0], [1], [0, 0, 1, 1], [], []>} : vector<2x32xf32>, vector<32x128xf32>, vector<2x128xf32> -> vector<2x128xf32>
    %202 = arith.addf %200, %201 : vector<2x128xf32>
    %203 = vector.extract_strided_slice %202 {offsets = [0, 0], sizes = [2, 96], strides = [1, 1]} : vector<2x128xf32> to vector<2x96xf32>
    %204 = arith.negf %203 : vector<2x96xf32>
    %205 = math.exp %204 : vector<2x96xf32>
    %cst_105 = arith.constant 1.000000e+00 : f32
    %206 = vector.broadcast %cst_105 : f32 to vector<2x96xf32>
    %207 = arith.addf %206, %205 : vector<2x96xf32>
    %208 = arith.divf %206, %207 : vector<2x96xf32>
    %209 = vector.extract_strided_slice %208 {offsets = [0, 0], sizes = [2, 32], strides = [1, 1]} : vector<2x96xf32> to vector<2x32xf32>
    %210 = vector.extract_strided_slice %208 {offsets = [0, 32], sizes = [2, 32], strides = [1, 1]} : vector<2x96xf32> to vector<2x32xf32>
    %211 = vector.extract_strided_slice %208 {offsets = [0, 64], sizes = [2, 32], strides = [1, 1]} : vector<2x96xf32> to vector<2x32xf32>
    %212 = vector.extract_strided_slice %202 {offsets = [0, 96], sizes = [2, 32], strides = [1, 1]} : vector<2x128xf32> to vector<2x32xf32>
    %213 = math.tanh %212 : vector<2x32xf32>
    %214 = arith.mulf %210, %192 : vector<2x32xf32>
    %215 = arith.mulf %209, %213 : vector<2x32xf32>
    %216 = arith.addf %214, %215 : vector<2x32xf32>
    %217 = math.tanh %216 : vector<2x32xf32>
    %218 = arith.mulf %211, %217 : vector<2x32xf32>
    %219 = vector.shape_cast %218 : vector<2x32xf32> to vector<1x2x32xf32>
    %220 = arith.index_cast %c3_i32_101 : i32 to index
    %c0_106 = arith.constant 0 : index
    %c0_107 = arith.constant 0 : index
    %221 = vector.load %arg11[%220, %c0_106, %c0_107] : memref<8x2x32xf32, #tpu.memory_space<vmem>>, vector<1x2x32xf32>
    tpu.vector_store %arg11[%220, %c0_106, %c0_107], %219 {strides = array<i32>} : memref<8x2x32xf32, #tpu.memory_space<vmem>>, vector<1x2x32xf32>,
    %c4_i32_108 = arith.constant 4 : i32
    %222 = arith.index_cast %c4_i32_108 : i32 to index
    %c0_109 = arith.constant 0 : index
    %c0_110 = arith.constant 0 : index
    %223 = vector.load %arg10[%222, %c0_109, %c0_110] : memref<8x2x128xf32, #tpu.memory_space<vmem>>, vector<1x2x128xf32>
    %224 = vector.shape_cast %223 : vector<1x2x128xf32> to vector<2x128xf32>
    %cst_111 = arith.constant dense<0.000000e+00> : vector<2x128xf32>
    %225 = tpu.matmul %218, %124, %cst_111 {dimension_numbers = #tpu.dot_dimension_numbers<[1], [0], [0], [1], [0, 0, 1, 1], [], []>} : vector<2x32xf32>, vector<32x128xf32>, vector<2x128xf32> -> vector<2x128xf32>
    %226 = arith.addf %224, %225 : vector<2x128xf32>
    %227 = vector.extract_strided_slice %226 {offsets = [0, 0], sizes = [2, 96], strides = [1, 1]} : vector<2x128xf32> to vector<2x96xf32>
    %228 = arith.negf %227 : vector<2x96xf32>
    %229 = math.exp %228 : vector<2x96xf32>
    %cst_112 = arith.constant 1.000000e+00 : f32
    %230 = vector.broadcast %cst_112 : f32 to vector<2x96xf32>
    %231 = arith.addf %230, %229 : vector<2x96xf32>
    %232 = arith.divf %230, %231 : vector<2x96xf32>
    %233 = vector.extract_strided_slice %232 {offsets = [0, 0], sizes = [2, 32], strides = [1, 1]} : vector<2x96xf32> to vector<2x32xf32>
    %234 = vector.extract_strided_slice %232 {offsets = [0, 32], sizes = [2, 32], strides = [1, 1]} : vector<2x96xf32> to vector<2x32xf32>
    %235 = vector.extract_strided_slice %232 {offsets = [0, 64], sizes = [2, 32], strides = [1, 1]} : vector<2x96xf32> to vector<2x32xf32>
    %236 = vector.extract_strided_slice %226 {offsets = [0, 96], sizes = [2, 32], strides = [1, 1]} : vector<2x128xf32> to vector<2x32xf32>
    %237 = math.tanh %236 : vector<2x32xf32>
    %238 = arith.mulf %234, %216 : vector<2x32xf32>
    %239 = arith.mulf %233, %237 : vector<2x32xf32>
    %240 = arith.addf %238, %239 : vector<2x32xf32>
    %241 = math.tanh %240 : vector<2x32xf32>
    %242 = arith.mulf %235, %241 : vector<2x32xf32>
    %243 = vector.shape_cast %242 : vector<2x32xf32> to vector<1x2x32xf32>
    %244 = arith.index_cast %c4_i32_108 : i32 to index
    %c0_113 = arith.constant 0 : index
    %c0_114 = arith.constant 0 : index
    %245 = vector.load %arg11[%244, %c0_113, %c0_114] : memref<8x2x32xf32, #tpu.memory_space<vmem>>, vector<1x2x32xf32>
    tpu.vector_store %arg11[%244, %c0_113, %c0_114], %243 {strides = array<i32>} : memref<8x2x32xf32, #tpu.memory_space<vmem>>, vector<1x2x32xf32>,
    %c5_i32_115 = arith.constant 5 : i32
    %246 = arith.index_cast %c5_i32_115 : i32 to index
    %c0_116 = arith.constant 0 : index
    %c0_117 = arith.constant 0 : index
    %247 = vector.load %arg10[%246, %c0_116, %c0_117] : memref<8x2x128xf32, #tpu.memory_space<vmem>>, vector<1x2x128xf32>
    %248 = vector.shape_cast %247 : vector<1x2x128xf32> to vector<2x128xf32>
    %cst_118 = arith.constant dense<0.000000e+00> : vector<2x128xf32>
    %249 = tpu.matmul %242, %124, %cst_118 {dimension_numbers = #tpu.dot_dimension_numbers<[1], [0], [0], [1], [0, 0, 1, 1], [], []>} : vector<2x32xf32>, vector<32x128xf32>, vector<2x128xf32> -> vector<2x128xf32>
    %250 = arith.addf %248, %249 : vector<2x128xf32>
    %251 = vector.extract_strided_slice %250 {offsets = [0, 0], sizes = [2, 96], strides = [1, 1]} : vector<2x128xf32> to vector<2x96xf32>
    %252 = arith.negf %251 : vector<2x96xf32>
    %253 = math.exp %252 : vector<2x96xf32>
    %cst_119 = arith.constant 1.000000e+00 : f32
    %254 = vector.broadcast %cst_119 : f32 to vector<2x96xf32>
    %255 = arith.addf %254, %253 : vector<2x96xf32>
    %256 = arith.divf %254, %255 : vector<2x96xf32>
    %257 = vector.extract_strided_slice %256 {offsets = [0, 0], sizes = [2, 32], strides = [1, 1]} : vector<2x96xf32> to vector<2x32xf32>
    %258 = vector.extract_strided_slice %256 {offsets = [0, 32], sizes = [2, 32], strides = [1, 1]} : vector<2x96xf32> to vector<2x32xf32>
    %259 = vector.extract_strided_slice %256 {offsets = [0, 64], sizes = [2, 32], strides = [1, 1]} : vector<2x96xf32> to vector<2x32xf32>
    %260 = vector.extract_strided_slice %250 {offsets = [0, 96], sizes = [2, 32], strides = [1, 1]} : vector<2x128xf32> to vector<2x32xf32>
    %261 = math.tanh %260 : vector<2x32xf32>
    %262 = arith.mulf %258, %240 : vector<2x32xf32>
    %263 = arith.mulf %257, %261 : vector<2x32xf32>
    %264 = arith.addf %262, %263 : vector<2x32xf32>
    %265 = math.tanh %264 : vector<2x32xf32>
    %266 = arith.mulf %259, %265 : vector<2x32xf32>
    %267 = vector.shape_cast %266 : vector<2x32xf32> to vector<1x2x32xf32>
    %268 = arith.index_cast %c5_i32_115 : i32 to index
    %c0_120 = arith.constant 0 : index
    %c0_121 = arith.constant 0 : index
    %269 = vector.load %arg11[%268, %c0_120, %c0_121] : memref<8x2x32xf32, #tpu.memory_space<vmem>>, vector<1x2x32xf32>
    tpu.vector_store %arg11[%268, %c0_120, %c0_121], %267 {strides = array<i32>} : memref<8x2x32xf32, #tpu.memory_space<vmem>>, vector<1x2x32xf32>,
    %c6_i32_122 = arith.constant 6 : i32
    %270 = arith.index_cast %c6_i32_122 : i32 to index
    %c0_123 = arith.constant 0 : index
    %c0_124 = arith.constant 0 : index
    %271 = vector.load %arg10[%270, %c0_123, %c0_124] : memref<8x2x128xf32, #tpu.memory_space<vmem>>, vector<1x2x128xf32>
    %272 = vector.shape_cast %271 : vector<1x2x128xf32> to vector<2x128xf32>
    %cst_125 = arith.constant dense<0.000000e+00> : vector<2x128xf32>
    %273 = tpu.matmul %266, %124, %cst_125 {dimension_numbers = #tpu.dot_dimension_numbers<[1], [0], [0], [1], [0, 0, 1, 1], [], []>} : vector<2x32xf32>, vector<32x128xf32>, vector<2x128xf32> -> vector<2x128xf32>
    %274 = arith.addf %272, %273 : vector<2x128xf32>
    %275 = vector.extract_strided_slice %274 {offsets = [0, 0], sizes = [2, 96], strides = [1, 1]} : vector<2x128xf32> to vector<2x96xf32>
    %276 = arith.negf %275 : vector<2x96xf32>
    %277 = math.exp %276 : vector<2x96xf32>
    %cst_126 = arith.constant 1.000000e+00 : f32
    %278 = vector.broadcast %cst_126 : f32 to vector<2x96xf32>
    %279 = arith.addf %278, %277 : vector<2x96xf32>
    %280 = arith.divf %278, %279 : vector<2x96xf32>
    %281 = vector.extract_strided_slice %280 {offsets = [0, 0], sizes = [2, 32], strides = [1, 1]} : vector<2x96xf32> to vector<2x32xf32>
    %282 = vector.extract_strided_slice %280 {offsets = [0, 32], sizes = [2, 32], strides = [1, 1]} : vector<2x96xf32> to vector<2x32xf32>
    %283 = vector.extract_strided_slice %280 {offsets = [0, 64], sizes = [2, 32], strides = [1, 1]} : vector<2x96xf32> to vector<2x32xf32>
    %284 = vector.extract_strided_slice %274 {offsets = [0, 96], sizes = [2, 32], strides = [1, 1]} : vector<2x128xf32> to vector<2x32xf32>
    %285 = math.tanh %284 : vector<2x32xf32>
    %286 = arith.mulf %282, %264 : vector<2x32xf32>
    %287 = arith.mulf %281, %285 : vector<2x32xf32>
    %288 = arith.addf %286, %287 : vector<2x32xf32>
    %289 = math.tanh %288 : vector<2x32xf32>
    %290 = arith.mulf %283, %289 : vector<2x32xf32>
    %291 = vector.shape_cast %290 : vector<2x32xf32> to vector<1x2x32xf32>
    %292 = arith.index_cast %c6_i32_122 : i32 to index
    %c0_127 = arith.constant 0 : index
    %c0_128 = arith.constant 0 : index
    %293 = vector.load %arg11[%292, %c0_127, %c0_128] : memref<8x2x32xf32, #tpu.memory_space<vmem>>, vector<1x2x32xf32>
    tpu.vector_store %arg11[%292, %c0_127, %c0_128], %291 {strides = array<i32>} : memref<8x2x32xf32, #tpu.memory_space<vmem>>, vector<1x2x32xf32>,
    %c7_i32_129 = arith.constant 7 : i32
    %294 = arith.index_cast %c7_i32_129 : i32 to index
    %c0_130 = arith.constant 0 : index
    %c0_131 = arith.constant 0 : index
    %295 = vector.load %arg10[%294, %c0_130, %c0_131] : memref<8x2x128xf32, #tpu.memory_space<vmem>>, vector<1x2x128xf32>
    %296 = vector.shape_cast %295 : vector<1x2x128xf32> to vector<2x128xf32>
    %cst_132 = arith.constant dense<0.000000e+00> : vector<2x128xf32>
    %297 = tpu.matmul %290, %124, %cst_132 {dimension_numbers = #tpu.dot_dimension_numbers<[1], [0], [0], [1], [0, 0, 1, 1], [], []>} : vector<2x32xf32>, vector<32x128xf32>, vector<2x128xf32> -> vector<2x128xf32>
    %298 = arith.addf %296, %297 : vector<2x128xf32>
    %299 = vector.extract_strided_slice %298 {offsets = [0, 0], sizes = [2, 96], strides = [1, 1]} : vector<2x128xf32> to vector<2x96xf32>
    %300 = arith.negf %299 : vector<2x96xf32>
    %301 = math.exp %300 : vector<2x96xf32>
    %cst_133 = arith.constant 1.000000e+00 : f32
    %302 = vector.broadcast %cst_133 : f32 to vector<2x96xf32>
    %303 = arith.addf %302, %301 : vector<2x96xf32>
    %304 = arith.divf %302, %303 : vector<2x96xf32>
    %305 = vector.extract_strided_slice %304 {offsets = [0, 0], sizes = [2, 32], strides = [1, 1]} : vector<2x96xf32> to vector<2x32xf32>
    %306 = vector.extract_strided_slice %304 {offsets = [0, 32], sizes = [2, 32], strides = [1, 1]} : vector<2x96xf32> to vector<2x32xf32>
    %307 = vector.extract_strided_slice %304 {offsets = [0, 64], sizes = [2, 32], strides = [1, 1]} : vector<2x96xf32> to vector<2x32xf32>
    %308 = vector.extract_strided_slice %298 {offsets = [0, 96], sizes = [2, 32], strides = [1, 1]} : vector<2x128xf32> to vector<2x32xf32>
    %309 = math.tanh %308 : vector<2x32xf32>
    %310 = arith.mulf %306, %288 : vector<2x32xf32>
    %311 = arith.mulf %305, %309 : vector<2x32xf32>
    %312 = arith.addf %310, %311 : vector<2x32xf32>
    %313 = math.tanh %312 : vector<2x32xf32>
    %314 = arith.mulf %307, %313 : vector<2x32xf32>
    %315 = vector.shape_cast %314 : vector<2x32xf32> to vector<1x2x32xf32>
    %316 = arith.index_cast %c7_i32_129 : i32 to index
    %c0_134 = arith.constant 0 : index
    %c0_135 = arith.constant 0 : index
    %317 = vector.load %arg11[%316, %c0_134, %c0_135] : memref<8x2x32xf32, #tpu.memory_space<vmem>>, vector<1x2x32xf32>
    tpu.vector_store %arg11[%316, %c0_134, %c0_135], %315 {strides = array<i32>} : memref<8x2x32xf32, #tpu.memory_space<vmem>>, vector<1x2x32xf32>,
    %c8_i32_136 = arith.constant 8 : i32
    %c0_137 = arith.constant 0 : index
    %c0_138 = arith.constant 0 : index
    %c0_139 = arith.constant 0 : index
    %318 = vector.load %arg6[%c0_137, %c0_138, %c0_139] : memref<1x32x128xf32, #tpu.memory_space<vmem>>, vector<1x32x128xf32>
    %319 = vector.shape_cast %318 : vector<1x32x128xf32> to vector<32x128xf32>
    %c0_140 = arith.constant 0 : index
    %c0_141 = arith.constant 0 : index
    %c0_142 = arith.constant 0 : index
    %320 = vector.load %arg7[%c0_140, %c0_141, %c0_142] : memref<1x32x128xf32, #tpu.memory_space<vmem>>, vector<1x32x128xf32>
    %321 = vector.shape_cast %320 : vector<1x32x128xf32> to vector<32x128xf32>
    %c0_143 = arith.constant 0 : index
    %c0_144 = arith.constant 0 : index
    %c0_145 = arith.constant 0 : index
    %322 = vector.load %arg8[%c0_143, %c0_144, %c0_145] : memref<1x1x128xf32, #tpu.memory_space<vmem>>, vector<1x1x128xf32>
    %323 = vector.shape_cast %322 : vector<1x1x128xf32> to vector<1x128xf32>
    %c0_i32_146 = arith.constant 0 : i32
    %324 = arith.index_cast %c0_i32_146 : i32 to index
    %c0_147 = arith.constant 0 : index
    %c0_148 = arith.constant 0 : index
    %325 = vector.load %arg11[%324, %c0_147, %c0_148] : memref<8x2x32xf32, #tpu.memory_space<vmem>>, vector<1x2x32xf32>
    %326 = vector.shape_cast %325 : vector<1x2x32xf32> to vector<2x32xf32>
    %cst_149 = arith.constant dense<0.000000e+00> : vector<2x128xf32>
    %327 = tpu.matmul %326, %319, %cst_149 {dimension_numbers = #tpu.dot_dimension_numbers<[1], [0], [0], [1], [0, 0, 1, 1], [], []>} : vector<2x32xf32>, vector<32x128xf32>, vector<2x128xf32> -> vector<2x128xf32>
    %c7_i32_150 = arith.constant 7 : i32
    %328 = arith.subi %c7_i32_150, %c0_i32_146 : i32
    %329 = arith.index_cast %328 : i32 to index
    %c0_151 = arith.constant 0 : index
    %c0_152 = arith.constant 0 : index
    %330 = vector.load %arg11[%329, %c0_151, %c0_152] : memref<8x2x32xf32, #tpu.memory_space<vmem>>, vector<1x2x32xf32>
    %331 = vector.shape_cast %330 : vector<1x2x32xf32> to vector<2x32xf32>
    %cst_153 = arith.constant dense<0.000000e+00> : vector<2x128xf32>
    %332 = tpu.matmul %331, %321, %cst_153 {dimension_numbers = #tpu.dot_dimension_numbers<[1], [0], [0], [1], [0, 0, 1, 1], [], []>} : vector<2x32xf32>, vector<32x128xf32>, vector<2x128xf32> -> vector<2x128xf32>
    %333 = arith.addf %327, %332 : vector<2x128xf32>
    %334 = vector.broadcast %323 : vector<1x128xf32> to vector<2x128xf32>
    %335 = arith.addf %333, %334 : vector<2x128xf32>
    %336 = vector.shape_cast %335 : vector<2x128xf32> to vector<1x2x128xf32>
    %337 = arith.index_cast %c0_i32_146 : i32 to index
    %c0_154 = arith.constant 0 : index
    %c0_155 = arith.constant 0 : index
    %338 = vector.load %arg10[%337, %c0_154, %c0_155] : memref<8x2x128xf32, #tpu.memory_space<vmem>>, vector<1x2x128xf32>
    tpu.vector_store %arg10[%337, %c0_154, %c0_155], %336 {strides = array<i32>} : memref<8x2x128xf32, #tpu.memory_space<vmem>>, vector<1x2x128xf32>,
    %c1_i32_156 = arith.constant 1 : i32
    %339 = arith.index_cast %c1_i32_156 : i32 to index
    %c0_157 = arith.constant 0 : index
    %c0_158 = arith.constant 0 : index
    %340 = vector.load %arg11[%339, %c0_157, %c0_158] : memref<8x2x32xf32, #tpu.memory_space<vmem>>, vector<1x2x32xf32>
    %341 = vector.shape_cast %340 : vector<1x2x32xf32> to vector<2x32xf32>
    %cst_159 = arith.constant dense<0.000000e+00> : vector<2x128xf32>
    %342 = tpu.matmul %341, %319, %cst_159 {dimension_numbers = #tpu.dot_dimension_numbers<[1], [0], [0], [1], [0, 0, 1, 1], [], []>} : vector<2x32xf32>, vector<32x128xf32>, vector<2x128xf32> -> vector<2x128xf32>
    %c7_i32_160 = arith.constant 7 : i32
    %343 = arith.subi %c7_i32_160, %c1_i32_156 : i32
    %344 = arith.index_cast %343 : i32 to index
    %c0_161 = arith.constant 0 : index
    %c0_162 = arith.constant 0 : index
    %345 = vector.load %arg11[%344, %c0_161, %c0_162] : memref<8x2x32xf32, #tpu.memory_space<vmem>>, vector<1x2x32xf32>
    %346 = vector.shape_cast %345 : vector<1x2x32xf32> to vector<2x32xf32>
    %cst_163 = arith.constant dense<0.000000e+00> : vector<2x128xf32>
    %347 = tpu.matmul %346, %321, %cst_163 {dimension_numbers = #tpu.dot_dimension_numbers<[1], [0], [0], [1], [0, 0, 1, 1], [], []>} : vector<2x32xf32>, vector<32x128xf32>, vector<2x128xf32> -> vector<2x128xf32>
    %348 = arith.addf %342, %347 : vector<2x128xf32>
    %349 = vector.broadcast %323 : vector<1x128xf32> to vector<2x128xf32>
    %350 = arith.addf %348, %349 : vector<2x128xf32>
    %351 = vector.shape_cast %350 : vector<2x128xf32> to vector<1x2x128xf32>
    %352 = arith.index_cast %c1_i32_156 : i32 to index
    %c0_164 = arith.constant 0 : index
    %c0_165 = arith.constant 0 : index
    %353 = vector.load %arg10[%352, %c0_164, %c0_165] : memref<8x2x128xf32, #tpu.memory_space<vmem>>, vector<1x2x128xf32>
    tpu.vector_store %arg10[%352, %c0_164, %c0_165], %351 {strides = array<i32>} : memref<8x2x128xf32, #tpu.memory_space<vmem>>, vector<1x2x128xf32>,
    %c2_i32_166 = arith.constant 2 : i32
    %354 = arith.index_cast %c2_i32_166 : i32 to index
    %c0_167 = arith.constant 0 : index
    %c0_168 = arith.constant 0 : index
    %355 = vector.load %arg11[%354, %c0_167, %c0_168] : memref<8x2x32xf32, #tpu.memory_space<vmem>>, vector<1x2x32xf32>
    %356 = vector.shape_cast %355 : vector<1x2x32xf32> to vector<2x32xf32>
    %cst_169 = arith.constant dense<0.000000e+00> : vector<2x128xf32>
    %357 = tpu.matmul %356, %319, %cst_169 {dimension_numbers = #tpu.dot_dimension_numbers<[1], [0], [0], [1], [0, 0, 1, 1], [], []>} : vector<2x32xf32>, vector<32x128xf32>, vector<2x128xf32> -> vector<2x128xf32>
    %c7_i32_170 = arith.constant 7 : i32
    %358 = arith.subi %c7_i32_170, %c2_i32_166 : i32
    %359 = arith.index_cast %358 : i32 to index
    %c0_171 = arith.constant 0 : index
    %c0_172 = arith.constant 0 : index
    %360 = vector.load %arg11[%359, %c0_171, %c0_172] : memref<8x2x32xf32, #tpu.memory_space<vmem>>, vector<1x2x32xf32>
    %361 = vector.shape_cast %360 : vector<1x2x32xf32> to vector<2x32xf32>
    %cst_173 = arith.constant dense<0.000000e+00> : vector<2x128xf32>
    %362 = tpu.matmul %361, %321, %cst_173 {dimension_numbers = #tpu.dot_dimension_numbers<[1], [0], [0], [1], [0, 0, 1, 1], [], []>} : vector<2x32xf32>, vector<32x128xf32>, vector<2x128xf32> -> vector<2x128xf32>
    %363 = arith.addf %357, %362 : vector<2x128xf32>
    %364 = vector.broadcast %323 : vector<1x128xf32> to vector<2x128xf32>
    %365 = arith.addf %363, %364 : vector<2x128xf32>
    %366 = vector.shape_cast %365 : vector<2x128xf32> to vector<1x2x128xf32>
    %367 = arith.index_cast %c2_i32_166 : i32 to index
    %c0_174 = arith.constant 0 : index
    %c0_175 = arith.constant 0 : index
    %368 = vector.load %arg10[%367, %c0_174, %c0_175] : memref<8x2x128xf32, #tpu.memory_space<vmem>>, vector<1x2x128xf32>
    tpu.vector_store %arg10[%367, %c0_174, %c0_175], %366 {strides = array<i32>} : memref<8x2x128xf32, #tpu.memory_space<vmem>>, vector<1x2x128xf32>,
    %c3_i32_176 = arith.constant 3 : i32
    %369 = arith.index_cast %c3_i32_176 : i32 to index
    %c0_177 = arith.constant 0 : index
    %c0_178 = arith.constant 0 : index
    %370 = vector.load %arg11[%369, %c0_177, %c0_178] : memref<8x2x32xf32, #tpu.memory_space<vmem>>, vector<1x2x32xf32>
    %371 = vector.shape_cast %370 : vector<1x2x32xf32> to vector<2x32xf32>
    %cst_179 = arith.constant dense<0.000000e+00> : vector<2x128xf32>
    %372 = tpu.matmul %371, %319, %cst_179 {dimension_numbers = #tpu.dot_dimension_numbers<[1], [0], [0], [1], [0, 0, 1, 1], [], []>} : vector<2x32xf32>, vector<32x128xf32>, vector<2x128xf32> -> vector<2x128xf32>
    %c7_i32_180 = arith.constant 7 : i32
    %373 = arith.subi %c7_i32_180, %c3_i32_176 : i32
    %374 = arith.index_cast %373 : i32 to index
    %c0_181 = arith.constant 0 : index
    %c0_182 = arith.constant 0 : index
    %375 = vector.load %arg11[%374, %c0_181, %c0_182] : memref<8x2x32xf32, #tpu.memory_space<vmem>>, vector<1x2x32xf32>
    %376 = vector.shape_cast %375 : vector<1x2x32xf32> to vector<2x32xf32>
    %cst_183 = arith.constant dense<0.000000e+00> : vector<2x128xf32>
    %377 = tpu.matmul %376, %321, %cst_183 {dimension_numbers = #tpu.dot_dimension_numbers<[1], [0], [0], [1], [0, 0, 1, 1], [], []>} : vector<2x32xf32>, vector<32x128xf32>, vector<2x128xf32> -> vector<2x128xf32>
    %378 = arith.addf %372, %377 : vector<2x128xf32>
    %379 = vector.broadcast %323 : vector<1x128xf32> to vector<2x128xf32>
    %380 = arith.addf %378, %379 : vector<2x128xf32>
    %381 = vector.shape_cast %380 : vector<2x128xf32> to vector<1x2x128xf32>
    %382 = arith.index_cast %c3_i32_176 : i32 to index
    %c0_184 = arith.constant 0 : index
    %c0_185 = arith.constant 0 : index
    %383 = vector.load %arg10[%382, %c0_184, %c0_185] : memref<8x2x128xf32, #tpu.memory_space<vmem>>, vector<1x2x128xf32>
    tpu.vector_store %arg10[%382, %c0_184, %c0_185], %381 {strides = array<i32>} : memref<8x2x128xf32, #tpu.memory_space<vmem>>, vector<1x2x128xf32>,
    %c4_i32_186 = arith.constant 4 : i32
    %384 = arith.index_cast %c4_i32_186 : i32 to index
    %c0_187 = arith.constant 0 : index
    %c0_188 = arith.constant 0 : index
    %385 = vector.load %arg11[%384, %c0_187, %c0_188] : memref<8x2x32xf32, #tpu.memory_space<vmem>>, vector<1x2x32xf32>
    %386 = vector.shape_cast %385 : vector<1x2x32xf32> to vector<2x32xf32>
    %cst_189 = arith.constant dense<0.000000e+00> : vector<2x128xf32>
    %387 = tpu.matmul %386, %319, %cst_189 {dimension_numbers = #tpu.dot_dimension_numbers<[1], [0], [0], [1], [0, 0, 1, 1], [], []>} : vector<2x32xf32>, vector<32x128xf32>, vector<2x128xf32> -> vector<2x128xf32>
    %c7_i32_190 = arith.constant 7 : i32
    %388 = arith.subi %c7_i32_190, %c4_i32_186 : i32
    %389 = arith.index_cast %388 : i32 to index
    %c0_191 = arith.constant 0 : index
    %c0_192 = arith.constant 0 : index
    %390 = vector.load %arg11[%389, %c0_191, %c0_192] : memref<8x2x32xf32, #tpu.memory_space<vmem>>, vector<1x2x32xf32>
    %391 = vector.shape_cast %390 : vector<1x2x32xf32> to vector<2x32xf32>
    %cst_193 = arith.constant dense<0.000000e+00> : vector<2x128xf32>
    %392 = tpu.matmul %391, %321, %cst_193 {dimension_numbers = #tpu.dot_dimension_numbers<[1], [0], [0], [1], [0, 0, 1, 1], [], []>} : vector<2x32xf32>, vector<32x128xf32>, vector<2x128xf32> -> vector<2x128xf32>
    %393 = arith.addf %387, %392 : vector<2x128xf32>
    %394 = vector.broadcast %323 : vector<1x128xf32> to vector<2x128xf32>
    %395 = arith.addf %393, %394 : vector<2x128xf32>
    %396 = vector.shape_cast %395 : vector<2x128xf32> to vector<1x2x128xf32>
    %397 = arith.index_cast %c4_i32_186 : i32 to index
    %c0_194 = arith.constant 0 : index
    %c0_195 = arith.constant 0 : index
    %398 = vector.load %arg10[%397, %c0_194, %c0_195] : memref<8x2x128xf32, #tpu.memory_space<vmem>>, vector<1x2x128xf32>
    tpu.vector_store %arg10[%397, %c0_194, %c0_195], %396 {strides = array<i32>} : memref<8x2x128xf32, #tpu.memory_space<vmem>>, vector<1x2x128xf32>,
    %c5_i32_196 = arith.constant 5 : i32
    %399 = arith.index_cast %c5_i32_196 : i32 to index
    %c0_197 = arith.constant 0 : index
    %c0_198 = arith.constant 0 : index
    %400 = vector.load %arg11[%399, %c0_197, %c0_198] : memref<8x2x32xf32, #tpu.memory_space<vmem>>, vector<1x2x32xf32>
    %401 = vector.shape_cast %400 : vector<1x2x32xf32> to vector<2x32xf32>
    %cst_199 = arith.constant dense<0.000000e+00> : vector<2x128xf32>
    %402 = tpu.matmul %401, %319, %cst_199 {dimension_numbers = #tpu.dot_dimension_numbers<[1], [0], [0], [1], [0, 0, 1, 1], [], []>} : vector<2x32xf32>, vector<32x128xf32>, vector<2x128xf32> -> vector<2x128xf32>
    %c7_i32_200 = arith.constant 7 : i32
    %403 = arith.subi %c7_i32_200, %c5_i32_196 : i32
    %404 = arith.index_cast %403 : i32 to index
    %c0_201 = arith.constant 0 : index
    %c0_202 = arith.constant 0 : index
    %405 = vector.load %arg11[%404, %c0_201, %c0_202] : memref<8x2x32xf32, #tpu.memory_space<vmem>>, vector<1x2x32xf32>
    %406 = vector.shape_cast %405 : vector<1x2x32xf32> to vector<2x32xf32>
    %cst_203 = arith.constant dense<0.000000e+00> : vector<2x128xf32>
    %407 = tpu.matmul %406, %321, %cst_203 {dimension_numbers = #tpu.dot_dimension_numbers<[1], [0], [0], [1], [0, 0, 1, 1], [], []>} : vector<2x32xf32>, vector<32x128xf32>, vector<2x128xf32> -> vector<2x128xf32>
    %408 = arith.addf %402, %407 : vector<2x128xf32>
    %409 = vector.broadcast %323 : vector<1x128xf32> to vector<2x128xf32>
    %410 = arith.addf %408, %409 : vector<2x128xf32>
    %411 = vector.shape_cast %410 : vector<2x128xf32> to vector<1x2x128xf32>
    %412 = arith.index_cast %c5_i32_196 : i32 to index
    %c0_204 = arith.constant 0 : index
    %c0_205 = arith.constant 0 : index
    %413 = vector.load %arg10[%412, %c0_204, %c0_205] : memref<8x2x128xf32, #tpu.memory_space<vmem>>, vector<1x2x128xf32>
    tpu.vector_store %arg10[%412, %c0_204, %c0_205], %411 {strides = array<i32>} : memref<8x2x128xf32, #tpu.memory_space<vmem>>, vector<1x2x128xf32>,
    %c6_i32_206 = arith.constant 6 : i32
    %414 = arith.index_cast %c6_i32_206 : i32 to index
    %c0_207 = arith.constant 0 : index
    %c0_208 = arith.constant 0 : index
    %415 = vector.load %arg11[%414, %c0_207, %c0_208] : memref<8x2x32xf32, #tpu.memory_space<vmem>>, vector<1x2x32xf32>
    %416 = vector.shape_cast %415 : vector<1x2x32xf32> to vector<2x32xf32>
    %cst_209 = arith.constant dense<0.000000e+00> : vector<2x128xf32>
    %417 = tpu.matmul %416, %319, %cst_209 {dimension_numbers = #tpu.dot_dimension_numbers<[1], [0], [0], [1], [0, 0, 1, 1], [], []>} : vector<2x32xf32>, vector<32x128xf32>, vector<2x128xf32> -> vector<2x128xf32>
    %c7_i32_210 = arith.constant 7 : i32
    %418 = arith.subi %c7_i32_210, %c6_i32_206 : i32
    %419 = arith.index_cast %418 : i32 to index
    %c0_211 = arith.constant 0 : index
    %c0_212 = arith.constant 0 : index
    %420 = vector.load %arg11[%419, %c0_211, %c0_212] : memref<8x2x32xf32, #tpu.memory_space<vmem>>, vector<1x2x32xf32>
    %421 = vector.shape_cast %420 : vector<1x2x32xf32> to vector<2x32xf32>
    %cst_213 = arith.constant dense<0.000000e+00> : vector<2x128xf32>
    %422 = tpu.matmul %421, %321, %cst_213 {dimension_numbers = #tpu.dot_dimension_numbers<[1], [0], [0], [1], [0, 0, 1, 1], [], []>} : vector<2x32xf32>, vector<32x128xf32>, vector<2x128xf32> -> vector<2x128xf32>
    %423 = arith.addf %417, %422 : vector<2x128xf32>
    %424 = vector.broadcast %323 : vector<1x128xf32> to vector<2x128xf32>
    %425 = arith.addf %423, %424 : vector<2x128xf32>
    %426 = vector.shape_cast %425 : vector<2x128xf32> to vector<1x2x128xf32>
    %427 = arith.index_cast %c6_i32_206 : i32 to index
    %c0_214 = arith.constant 0 : index
    %c0_215 = arith.constant 0 : index
    %428 = vector.load %arg10[%427, %c0_214, %c0_215] : memref<8x2x128xf32, #tpu.memory_space<vmem>>, vector<1x2x128xf32>
    tpu.vector_store %arg10[%427, %c0_214, %c0_215], %426 {strides = array<i32>} : memref<8x2x128xf32, #tpu.memory_space<vmem>>, vector<1x2x128xf32>,
    %c7_i32_216 = arith.constant 7 : i32
    %429 = arith.index_cast %c7_i32_216 : i32 to index
    %c0_217 = arith.constant 0 : index
    %c0_218 = arith.constant 0 : index
    %430 = vector.load %arg11[%429, %c0_217, %c0_218] : memref<8x2x32xf32, #tpu.memory_space<vmem>>, vector<1x2x32xf32>
    %431 = vector.shape_cast %430 : vector<1x2x32xf32> to vector<2x32xf32>
    %cst_219 = arith.constant dense<0.000000e+00> : vector<2x128xf32>
    %432 = tpu.matmul %431, %319, %cst_219 {dimension_numbers = #tpu.dot_dimension_numbers<[1], [0], [0], [1], [0, 0, 1, 1], [], []>} : vector<2x32xf32>, vector<32x128xf32>, vector<2x128xf32> -> vector<2x128xf32>
    %c7_i32_220 = arith.constant 7 : i32
    %433 = arith.subi %c7_i32_220, %c7_i32_216 : i32
    %434 = arith.index_cast %433 : i32 to index
    %c0_221 = arith.constant 0 : index
    %c0_222 = arith.constant 0 : index
    %435 = vector.load %arg11[%434, %c0_221, %c0_222] : memref<8x2x32xf32, #tpu.memory_space<vmem>>, vector<1x2x32xf32>
    %436 = vector.shape_cast %435 : vector<1x2x32xf32> to vector<2x32xf32>
    %cst_223 = arith.constant dense<0.000000e+00> : vector<2x128xf32>
    %437 = tpu.matmul %436, %321, %cst_223 {dimension_numbers = #tpu.dot_dimension_numbers<[1], [0], [0], [1], [0, 0, 1, 1], [], []>} : vector<2x32xf32>, vector<32x128xf32>, vector<2x128xf32> -> vector<2x128xf32>
    %438 = arith.addf %432, %437 : vector<2x128xf32>
    %439 = vector.broadcast %323 : vector<1x128xf32> to vector<2x128xf32>
    %440 = arith.addf %438, %439 : vector<2x128xf32>
    %441 = vector.shape_cast %440 : vector<2x128xf32> to vector<1x2x128xf32>
    %442 = arith.index_cast %c7_i32_216 : i32 to index
    %c0_224 = arith.constant 0 : index
    %c0_225 = arith.constant 0 : index
    %443 = vector.load %arg10[%442, %c0_224, %c0_225] : memref<8x2x128xf32, #tpu.memory_space<vmem>>, vector<1x2x128xf32>
    tpu.vector_store %arg10[%442, %c0_224, %c0_225], %441 {strides = array<i32>} : memref<8x2x128xf32, #tpu.memory_space<vmem>>, vector<1x2x128xf32>,
    %c8_i32_226 = arith.constant 8 : i32
    %c1 = arith.constant 1 : index
    %c0_227 = arith.constant 0 : index
    %c0_228 = arith.constant 0 : index
    %444 = vector.load %arg5[%c1, %c0_227, %c0_228] : memref<2x32x128xf32, #tpu.memory_space<vmem>>, vector<1x32x128xf32>
    %445 = vector.shape_cast %444 : vector<1x32x128xf32> to vector<32x128xf32>
    %cst_229 = arith.constant 0.000000e+00 : f32
    %446 = vector.broadcast %cst_229 : f32 to vector<2x32xf32>
    %c0_i32_230 = arith.constant 0 : i32
    %447 = arith.index_cast %c0_i32_230 : i32 to index
    %c0_231 = arith.constant 0 : index
    %c0_232 = arith.constant 0 : index
    %448 = vector.load %arg10[%447, %c0_231, %c0_232] : memref<8x2x128xf32, #tpu.memory_space<vmem>>, vector<1x2x128xf32>
    %449 = vector.shape_cast %448 : vector<1x2x128xf32> to vector<2x128xf32>
    %cst_233 = arith.constant dense<0.000000e+00> : vector<2x128xf32>
    %450 = tpu.matmul %446, %445, %cst_233 {dimension_numbers = #tpu.dot_dimension_numbers<[1], [0], [0], [1], [0, 0, 1, 1], [], []>} : vector<2x32xf32>, vector<32x128xf32>, vector<2x128xf32> -> vector<2x128xf32>
    %451 = arith.addf %449, %450 : vector<2x128xf32>
    %452 = vector.extract_strided_slice %451 {offsets = [0, 0], sizes = [2, 96], strides = [1, 1]} : vector<2x128xf32> to vector<2x96xf32>
    %453 = arith.negf %452 : vector<2x96xf32>
    %454 = math.exp %453 : vector<2x96xf32>
    %cst_234 = arith.constant 1.000000e+00 : f32
    %455 = vector.broadcast %cst_234 : f32 to vector<2x96xf32>
    %456 = arith.addf %455, %454 : vector<2x96xf32>
    %457 = arith.divf %455, %456 : vector<2x96xf32>
    %458 = vector.extract_strided_slice %457 {offsets = [0, 0], sizes = [2, 32], strides = [1, 1]} : vector<2x96xf32> to vector<2x32xf32>
    %459 = vector.extract_strided_slice %457 {offsets = [0, 32], sizes = [2, 32], strides = [1, 1]} : vector<2x96xf32> to vector<2x32xf32>
    %460 = vector.extract_strided_slice %457 {offsets = [0, 64], sizes = [2, 32], strides = [1, 1]} : vector<2x96xf32> to vector<2x32xf32>
    %461 = vector.extract_strided_slice %451 {offsets = [0, 96], sizes = [2, 32], strides = [1, 1]} : vector<2x128xf32> to vector<2x32xf32>
    %462 = math.tanh %461 : vector<2x32xf32>
    %463 = arith.mulf %459, %446 : vector<2x32xf32>
    %464 = arith.mulf %458, %462 : vector<2x32xf32>
    %465 = arith.addf %463, %464 : vector<2x32xf32>
    %466 = math.tanh %465 : vector<2x32xf32>
    %467 = arith.mulf %460, %466 : vector<2x32xf32>
    %468 = vector.shape_cast %467 : vector<2x32xf32> to vector<1x2x32xf32>
    %469 = arith.index_cast %c0_i32_230 : i32 to index
    %c0_235 = arith.constant 0 : index
    %c0_236 = arith.constant 0 : index
    %470 = vector.load %arg9[%469, %c0_235, %c0_236] : memref<8x2x32xf32, #tpu.memory_space<vmem>>, vector<1x2x32xf32>
    tpu.vector_store %arg9[%469, %c0_235, %c0_236], %468 {strides = array<i32>} : memref<8x2x32xf32, #tpu.memory_space<vmem>>, vector<1x2x32xf32>,
    %c1_i32_237 = arith.constant 1 : i32
    %471 = arith.index_cast %c1_i32_237 : i32 to index
    %c0_238 = arith.constant 0 : index
    %c0_239 = arith.constant 0 : index
    %472 = vector.load %arg10[%471, %c0_238, %c0_239] : memref<8x2x128xf32, #tpu.memory_space<vmem>>, vector<1x2x128xf32>
    %473 = vector.shape_cast %472 : vector<1x2x128xf32> to vector<2x128xf32>
    %cst_240 = arith.constant dense<0.000000e+00> : vector<2x128xf32>
    %474 = tpu.matmul %467, %445, %cst_240 {dimension_numbers = #tpu.dot_dimension_numbers<[1], [0], [0], [1], [0, 0, 1, 1], [], []>} : vector<2x32xf32>, vector<32x128xf32>, vector<2x128xf32> -> vector<2x128xf32>
    %475 = arith.addf %473, %474 : vector<2x128xf32>
    %476 = vector.extract_strided_slice %475 {offsets = [0, 0], sizes = [2, 96], strides = [1, 1]} : vector<2x128xf32> to vector<2x96xf32>
    %477 = arith.negf %476 : vector<2x96xf32>
    %478 = math.exp %477 : vector<2x96xf32>
    %cst_241 = arith.constant 1.000000e+00 : f32
    %479 = vector.broadcast %cst_241 : f32 to vector<2x96xf32>
    %480 = arith.addf %479, %478 : vector<2x96xf32>
    %481 = arith.divf %479, %480 : vector<2x96xf32>
    %482 = vector.extract_strided_slice %481 {offsets = [0, 0], sizes = [2, 32], strides = [1, 1]} : vector<2x96xf32> to vector<2x32xf32>
    %483 = vector.extract_strided_slice %481 {offsets = [0, 32], sizes = [2, 32], strides = [1, 1]} : vector<2x96xf32> to vector<2x32xf32>
    %484 = vector.extract_strided_slice %481 {offsets = [0, 64], sizes = [2, 32], strides = [1, 1]} : vector<2x96xf32> to vector<2x32xf32>
    %485 = vector.extract_strided_slice %475 {offsets = [0, 96], sizes = [2, 32], strides = [1, 1]} : vector<2x128xf32> to vector<2x32xf32>
    %486 = math.tanh %485 : vector<2x32xf32>
    %487 = arith.mulf %483, %465 : vector<2x32xf32>
    %488 = arith.mulf %482, %486 : vector<2x32xf32>
    %489 = arith.addf %487, %488 : vector<2x32xf32>
    %490 = math.tanh %489 : vector<2x32xf32>
    %491 = arith.mulf %484, %490 : vector<2x32xf32>
    %492 = vector.shape_cast %491 : vector<2x32xf32> to vector<1x2x32xf32>
    %493 = arith.index_cast %c1_i32_237 : i32 to index
    %c0_242 = arith.constant 0 : index
    %c0_243 = arith.constant 0 : index
    %494 = vector.load %arg9[%493, %c0_242, %c0_243] : memref<8x2x32xf32, #tpu.memory_space<vmem>>, vector<1x2x32xf32>
    tpu.vector_store %arg9[%493, %c0_242, %c0_243], %492 {strides = array<i32>} : memref<8x2x32xf32, #tpu.memory_space<vmem>>, vector<1x2x32xf32>,
    %c2_i32_244 = arith.constant 2 : i32
    %495 = arith.index_cast %c2_i32_244 : i32 to index
    %c0_245 = arith.constant 0 : index
    %c0_246 = arith.constant 0 : index
    %496 = vector.load %arg10[%495, %c0_245, %c0_246] : memref<8x2x128xf32, #tpu.memory_space<vmem>>, vector<1x2x128xf32>
    %497 = vector.shape_cast %496 : vector<1x2x128xf32> to vector<2x128xf32>
    %cst_247 = arith.constant dense<0.000000e+00> : vector<2x128xf32>
    %498 = tpu.matmul %491, %445, %cst_247 {dimension_numbers = #tpu.dot_dimension_numbers<[1], [0], [0], [1], [0, 0, 1, 1], [], []>} : vector<2x32xf32>, vector<32x128xf32>, vector<2x128xf32> -> vector<2x128xf32>
    %499 = arith.addf %497, %498 : vector<2x128xf32>
    %500 = vector.extract_strided_slice %499 {offsets = [0, 0], sizes = [2, 96], strides = [1, 1]} : vector<2x128xf32> to vector<2x96xf32>
    %501 = arith.negf %500 : vector<2x96xf32>
    %502 = math.exp %501 : vector<2x96xf32>
    %cst_248 = arith.constant 1.000000e+00 : f32
    %503 = vector.broadcast %cst_248 : f32 to vector<2x96xf32>
    %504 = arith.addf %503, %502 : vector<2x96xf32>
    %505 = arith.divf %503, %504 : vector<2x96xf32>
    %506 = vector.extract_strided_slice %505 {offsets = [0, 0], sizes = [2, 32], strides = [1, 1]} : vector<2x96xf32> to vector<2x32xf32>
    %507 = vector.extract_strided_slice %505 {offsets = [0, 32], sizes = [2, 32], strides = [1, 1]} : vector<2x96xf32> to vector<2x32xf32>
    %508 = vector.extract_strided_slice %505 {offsets = [0, 64], sizes = [2, 32], strides = [1, 1]} : vector<2x96xf32> to vector<2x32xf32>
    %509 = vector.extract_strided_slice %499 {offsets = [0, 96], sizes = [2, 32], strides = [1, 1]} : vector<2x128xf32> to vector<2x32xf32>
    %510 = math.tanh %509 : vector<2x32xf32>
    %511 = arith.mulf %507, %489 : vector<2x32xf32>
    %512 = arith.mulf %506, %510 : vector<2x32xf32>
    %513 = arith.addf %511, %512 : vector<2x32xf32>
    %514 = math.tanh %513 : vector<2x32xf32>
    %515 = arith.mulf %508, %514 : vector<2x32xf32>
    %516 = vector.shape_cast %515 : vector<2x32xf32> to vector<1x2x32xf32>
    %517 = arith.index_cast %c2_i32_244 : i32 to index
    %c0_249 = arith.constant 0 : index
    %c0_250 = arith.constant 0 : index
    %518 = vector.load %arg9[%517, %c0_249, %c0_250] : memref<8x2x32xf32, #tpu.memory_space<vmem>>, vector<1x2x32xf32>
    tpu.vector_store %arg9[%517, %c0_249, %c0_250], %516 {strides = array<i32>} : memref<8x2x32xf32, #tpu.memory_space<vmem>>, vector<1x2x32xf32>,
    %c3_i32_251 = arith.constant 3 : i32
    %519 = arith.index_cast %c3_i32_251 : i32 to index
    %c0_252 = arith.constant 0 : index
    %c0_253 = arith.constant 0 : index
    %520 = vector.load %arg10[%519, %c0_252, %c0_253] : memref<8x2x128xf32, #tpu.memory_space<vmem>>, vector<1x2x128xf32>
    %521 = vector.shape_cast %520 : vector<1x2x128xf32> to vector<2x128xf32>
    %cst_254 = arith.constant dense<0.000000e+00> : vector<2x128xf32>
    %522 = tpu.matmul %515, %445, %cst_254 {dimension_numbers = #tpu.dot_dimension_numbers<[1], [0], [0], [1], [0, 0, 1, 1], [], []>} : vector<2x32xf32>, vector<32x128xf32>, vector<2x128xf32> -> vector<2x128xf32>
    %523 = arith.addf %521, %522 : vector<2x128xf32>
    %524 = vector.extract_strided_slice %523 {offsets = [0, 0], sizes = [2, 96], strides = [1, 1]} : vector<2x128xf32> to vector<2x96xf32>
    %525 = arith.negf %524 : vector<2x96xf32>
    %526 = math.exp %525 : vector<2x96xf32>
    %cst_255 = arith.constant 1.000000e+00 : f32
    %527 = vector.broadcast %cst_255 : f32 to vector<2x96xf32>
    %528 = arith.addf %527, %526 : vector<2x96xf32>
    %529 = arith.divf %527, %528 : vector<2x96xf32>
    %530 = vector.extract_strided_slice %529 {offsets = [0, 0], sizes = [2, 32], strides = [1, 1]} : vector<2x96xf32> to vector<2x32xf32>
    %531 = vector.extract_strided_slice %529 {offsets = [0, 32], sizes = [2, 32], strides = [1, 1]} : vector<2x96xf32> to vector<2x32xf32>
    %532 = vector.extract_strided_slice %529 {offsets = [0, 64], sizes = [2, 32], strides = [1, 1]} : vector<2x96xf32> to vector<2x32xf32>
    %533 = vector.extract_strided_slice %523 {offsets = [0, 96], sizes = [2, 32], strides = [1, 1]} : vector<2x128xf32> to vector<2x32xf32>
    %534 = math.tanh %533 : vector<2x32xf32>
    %535 = arith.mulf %531, %513 : vector<2x32xf32>
    %536 = arith.mulf %530, %534 : vector<2x32xf32>
    %537 = arith.addf %535, %536 : vector<2x32xf32>
    %538 = math.tanh %537 : vector<2x32xf32>
    %539 = arith.mulf %532, %538 : vector<2x32xf32>
    %540 = vector.shape_cast %539 : vector<2x32xf32> to vector<1x2x32xf32>
    %541 = arith.index_cast %c3_i32_251 : i32 to index
    %c0_256 = arith.constant 0 : index
    %c0_257 = arith.constant 0 : index
    %542 = vector.load %arg9[%541, %c0_256, %c0_257] : memref<8x2x32xf32, #tpu.memory_space<vmem>>, vector<1x2x32xf32>
    tpu.vector_store %arg9[%541, %c0_256, %c0_257], %540 {strides = array<i32>} : memref<8x2x32xf32, #tpu.memory_space<vmem>>, vector<1x2x32xf32>,
    %c4_i32_258 = arith.constant 4 : i32
    %543 = arith.index_cast %c4_i32_258 : i32 to index
    %c0_259 = arith.constant 0 : index
    %c0_260 = arith.constant 0 : index
    %544 = vector.load %arg10[%543, %c0_259, %c0_260] : memref<8x2x128xf32, #tpu.memory_space<vmem>>, vector<1x2x128xf32>
    %545 = vector.shape_cast %544 : vector<1x2x128xf32> to vector<2x128xf32>
    %cst_261 = arith.constant dense<0.000000e+00> : vector<2x128xf32>
    %546 = tpu.matmul %539, %445, %cst_261 {dimension_numbers = #tpu.dot_dimension_numbers<[1], [0], [0], [1], [0, 0, 1, 1], [], []>} : vector<2x32xf32>, vector<32x128xf32>, vector<2x128xf32> -> vector<2x128xf32>
    %547 = arith.addf %545, %546 : vector<2x128xf32>
    %548 = vector.extract_strided_slice %547 {offsets = [0, 0], sizes = [2, 96], strides = [1, 1]} : vector<2x128xf32> to vector<2x96xf32>
    %549 = arith.negf %548 : vector<2x96xf32>
    %550 = math.exp %549 : vector<2x96xf32>
    %cst_262 = arith.constant 1.000000e+00 : f32
    %551 = vector.broadcast %cst_262 : f32 to vector<2x96xf32>
    %552 = arith.addf %551, %550 : vector<2x96xf32>
    %553 = arith.divf %551, %552 : vector<2x96xf32>
    %554 = vector.extract_strided_slice %553 {offsets = [0, 0], sizes = [2, 32], strides = [1, 1]} : vector<2x96xf32> to vector<2x32xf32>
    %555 = vector.extract_strided_slice %553 {offsets = [0, 32], sizes = [2, 32], strides = [1, 1]} : vector<2x96xf32> to vector<2x32xf32>
    %556 = vector.extract_strided_slice %553 {offsets = [0, 64], sizes = [2, 32], strides = [1, 1]} : vector<2x96xf32> to vector<2x32xf32>
    %557 = vector.extract_strided_slice %547 {offsets = [0, 96], sizes = [2, 32], strides = [1, 1]} : vector<2x128xf32> to vector<2x32xf32>
    %558 = math.tanh %557 : vector<2x32xf32>
    %559 = arith.mulf %555, %537 : vector<2x32xf32>
    %560 = arith.mulf %554, %558 : vector<2x32xf32>
    %561 = arith.addf %559, %560 : vector<2x32xf32>
    %562 = math.tanh %561 : vector<2x32xf32>
    %563 = arith.mulf %556, %562 : vector<2x32xf32>
    %564 = vector.shape_cast %563 : vector<2x32xf32> to vector<1x2x32xf32>
    %565 = arith.index_cast %c4_i32_258 : i32 to index
    %c0_263 = arith.constant 0 : index
    %c0_264 = arith.constant 0 : index
    %566 = vector.load %arg9[%565, %c0_263, %c0_264] : memref<8x2x32xf32, #tpu.memory_space<vmem>>, vector<1x2x32xf32>
    tpu.vector_store %arg9[%565, %c0_263, %c0_264], %564 {strides = array<i32>} : memref<8x2x32xf32, #tpu.memory_space<vmem>>, vector<1x2x32xf32>,
    %c5_i32_265 = arith.constant 5 : i32
    %567 = arith.index_cast %c5_i32_265 : i32 to index
    %c0_266 = arith.constant 0 : index
    %c0_267 = arith.constant 0 : index
    %568 = vector.load %arg10[%567, %c0_266, %c0_267] : memref<8x2x128xf32, #tpu.memory_space<vmem>>, vector<1x2x128xf32>
    %569 = vector.shape_cast %568 : vector<1x2x128xf32> to vector<2x128xf32>
    %cst_268 = arith.constant dense<0.000000e+00> : vector<2x128xf32>
    %570 = tpu.matmul %563, %445, %cst_268 {dimension_numbers = #tpu.dot_dimension_numbers<[1], [0], [0], [1], [0, 0, 1, 1], [], []>} : vector<2x32xf32>, vector<32x128xf32>, vector<2x128xf32> -> vector<2x128xf32>
    %571 = arith.addf %569, %570 : vector<2x128xf32>
    %572 = vector.extract_strided_slice %571 {offsets = [0, 0], sizes = [2, 96], strides = [1, 1]} : vector<2x128xf32> to vector<2x96xf32>
    %573 = arith.negf %572 : vector<2x96xf32>
    %574 = math.exp %573 : vector<2x96xf32>
    %cst_269 = arith.constant 1.000000e+00 : f32
    %575 = vector.broadcast %cst_269 : f32 to vector<2x96xf32>
    %576 = arith.addf %575, %574 : vector<2x96xf32>
    %577 = arith.divf %575, %576 : vector<2x96xf32>
    %578 = vector.extract_strided_slice %577 {offsets = [0, 0], sizes = [2, 32], strides = [1, 1]} : vector<2x96xf32> to vector<2x32xf32>
    %579 = vector.extract_strided_slice %577 {offsets = [0, 32], sizes = [2, 32], strides = [1, 1]} : vector<2x96xf32> to vector<2x32xf32>
    %580 = vector.extract_strided_slice %577 {offsets = [0, 64], sizes = [2, 32], strides = [1, 1]} : vector<2x96xf32> to vector<2x32xf32>
    %581 = vector.extract_strided_slice %571 {offsets = [0, 96], sizes = [2, 32], strides = [1, 1]} : vector<2x128xf32> to vector<2x32xf32>
    %582 = math.tanh %581 : vector<2x32xf32>
    %583 = arith.mulf %579, %561 : vector<2x32xf32>
    %584 = arith.mulf %578, %582 : vector<2x32xf32>
    %585 = arith.addf %583, %584 : vector<2x32xf32>
    %586 = math.tanh %585 : vector<2x32xf32>
    %587 = arith.mulf %580, %586 : vector<2x32xf32>
    %588 = vector.shape_cast %587 : vector<2x32xf32> to vector<1x2x32xf32>
    %589 = arith.index_cast %c5_i32_265 : i32 to index
    %c0_270 = arith.constant 0 : index
    %c0_271 = arith.constant 0 : index
    %590 = vector.load %arg9[%589, %c0_270, %c0_271] : memref<8x2x32xf32, #tpu.memory_space<vmem>>, vector<1x2x32xf32>
    tpu.vector_store %arg9[%589, %c0_270, %c0_271], %588 {strides = array<i32>} : memref<8x2x32xf32, #tpu.memory_space<vmem>>, vector<1x2x32xf32>,
    %c6_i32_272 = arith.constant 6 : i32
    %591 = arith.index_cast %c6_i32_272 : i32 to index
    %c0_273 = arith.constant 0 : index
    %c0_274 = arith.constant 0 : index
    %592 = vector.load %arg10[%591, %c0_273, %c0_274] : memref<8x2x128xf32, #tpu.memory_space<vmem>>, vector<1x2x128xf32>
    %593 = vector.shape_cast %592 : vector<1x2x128xf32> to vector<2x128xf32>
    %cst_275 = arith.constant dense<0.000000e+00> : vector<2x128xf32>
    %594 = tpu.matmul %587, %445, %cst_275 {dimension_numbers = #tpu.dot_dimension_numbers<[1], [0], [0], [1], [0, 0, 1, 1], [], []>} : vector<2x32xf32>, vector<32x128xf32>, vector<2x128xf32> -> vector<2x128xf32>
    %595 = arith.addf %593, %594 : vector<2x128xf32>
    %596 = vector.extract_strided_slice %595 {offsets = [0, 0], sizes = [2, 96], strides = [1, 1]} : vector<2x128xf32> to vector<2x96xf32>
    %597 = arith.negf %596 : vector<2x96xf32>
    %598 = math.exp %597 : vector<2x96xf32>
    %cst_276 = arith.constant 1.000000e+00 : f32
    %599 = vector.broadcast %cst_276 : f32 to vector<2x96xf32>
    %600 = arith.addf %599, %598 : vector<2x96xf32>
    %601 = arith.divf %599, %600 : vector<2x96xf32>
    %602 = vector.extract_strided_slice %601 {offsets = [0, 0], sizes = [2, 32], strides = [1, 1]} : vector<2x96xf32> to vector<2x32xf32>
    %603 = vector.extract_strided_slice %601 {offsets = [0, 32], sizes = [2, 32], strides = [1, 1]} : vector<2x96xf32> to vector<2x32xf32>
    %604 = vector.extract_strided_slice %601 {offsets = [0, 64], sizes = [2, 32], strides = [1, 1]} : vector<2x96xf32> to vector<2x32xf32>
    %605 = vector.extract_strided_slice %595 {offsets = [0, 96], sizes = [2, 32], strides = [1, 1]} : vector<2x128xf32> to vector<2x32xf32>
    %606 = math.tanh %605 : vector<2x32xf32>
    %607 = arith.mulf %603, %585 : vector<2x32xf32>
    %608 = arith.mulf %602, %606 : vector<2x32xf32>
    %609 = arith.addf %607, %608 : vector<2x32xf32>
    %610 = math.tanh %609 : vector<2x32xf32>
    %611 = arith.mulf %604, %610 : vector<2x32xf32>
    %612 = vector.shape_cast %611 : vector<2x32xf32> to vector<1x2x32xf32>
    %613 = arith.index_cast %c6_i32_272 : i32 to index
    %c0_277 = arith.constant 0 : index
    %c0_278 = arith.constant 0 : index
    %614 = vector.load %arg9[%613, %c0_277, %c0_278] : memref<8x2x32xf32, #tpu.memory_space<vmem>>, vector<1x2x32xf32>
    tpu.vector_store %arg9[%613, %c0_277, %c0_278], %612 {strides = array<i32>} : memref<8x2x32xf32, #tpu.memory_space<vmem>>, vector<1x2x32xf32>,
    %c7_i32_279 = arith.constant 7 : i32
    %615 = arith.index_cast %c7_i32_279 : i32 to index
    %c0_280 = arith.constant 0 : index
    %c0_281 = arith.constant 0 : index
    %616 = vector.load %arg10[%615, %c0_280, %c0_281] : memref<8x2x128xf32, #tpu.memory_space<vmem>>, vector<1x2x128xf32>
    %617 = vector.shape_cast %616 : vector<1x2x128xf32> to vector<2x128xf32>
    %cst_282 = arith.constant dense<0.000000e+00> : vector<2x128xf32>
    %618 = tpu.matmul %611, %445, %cst_282 {dimension_numbers = #tpu.dot_dimension_numbers<[1], [0], [0], [1], [0, 0, 1, 1], [], []>} : vector<2x32xf32>, vector<32x128xf32>, vector<2x128xf32> -> vector<2x128xf32>
    %619 = arith.addf %617, %618 : vector<2x128xf32>
    %620 = vector.extract_strided_slice %619 {offsets = [0, 0], sizes = [2, 96], strides = [1, 1]} : vector<2x128xf32> to vector<2x96xf32>
    %621 = arith.negf %620 : vector<2x96xf32>
    %622 = math.exp %621 : vector<2x96xf32>
    %cst_283 = arith.constant 1.000000e+00 : f32
    %623 = vector.broadcast %cst_283 : f32 to vector<2x96xf32>
    %624 = arith.addf %623, %622 : vector<2x96xf32>
    %625 = arith.divf %623, %624 : vector<2x96xf32>
    %626 = vector.extract_strided_slice %625 {offsets = [0, 0], sizes = [2, 32], strides = [1, 1]} : vector<2x96xf32> to vector<2x32xf32>
    %627 = vector.extract_strided_slice %625 {offsets = [0, 32], sizes = [2, 32], strides = [1, 1]} : vector<2x96xf32> to vector<2x32xf32>
    %628 = vector.extract_strided_slice %625 {offsets = [0, 64], sizes = [2, 32], strides = [1, 1]} : vector<2x96xf32> to vector<2x32xf32>
    %629 = vector.extract_strided_slice %619 {offsets = [0, 96], sizes = [2, 32], strides = [1, 1]} : vector<2x128xf32> to vector<2x32xf32>
    %630 = math.tanh %629 : vector<2x32xf32>
    %631 = arith.mulf %627, %609 : vector<2x32xf32>
    %632 = arith.mulf %626, %630 : vector<2x32xf32>
    %633 = arith.addf %631, %632 : vector<2x32xf32>
    %634 = math.tanh %633 : vector<2x32xf32>
    %635 = arith.mulf %628, %634 : vector<2x32xf32>
    %636 = vector.shape_cast %635 : vector<2x32xf32> to vector<1x2x32xf32>
    %637 = arith.index_cast %c7_i32_279 : i32 to index
    %c0_284 = arith.constant 0 : index
    %c0_285 = arith.constant 0 : index
    %638 = vector.load %arg9[%637, %c0_284, %c0_285] : memref<8x2x32xf32, #tpu.memory_space<vmem>>, vector<1x2x32xf32>
    tpu.vector_store %arg9[%637, %c0_284, %c0_285], %636 {strides = array<i32>} : memref<8x2x32xf32, #tpu.memory_space<vmem>>, vector<1x2x32xf32>,
    %c8_i32_286 = arith.constant 8 : i32
    return
  }
  func.func @transform_0(%arg0: i32) -> (i32, i32, i32) {
    %c0_i32 = arith.constant 0 : i32
    %c0_i32_0 = arith.constant 0 : i32
    %c0_i32_1 = arith.constant 0 : i32
    %c0_i32_2 = arith.constant 0 : i32
    return %c0_i32, %c0_i32_0, %c0_i32_1 : i32, i32, i32
  }
  func.func @transform_1(%arg0: i32) -> (i32, i32) {
    %c0_i32 = arith.constant 0 : i32
    %c0_i32_0 = arith.constant 0 : i32
    %c0_i32_1 = arith.constant 0 : i32
    return %c0_i32, %c0_i32_0 : i32, i32
  }
  func.func @transform_2(%arg0: i32) -> (i32, i32) {
    %c0_i32 = arith.constant 0 : i32
    %c0_i32_0 = arith.constant 0 : i32
    %c0_i32_1 = arith.constant 0 : i32
    return %c0_i32, %c0_i32_0 : i32, i32
  }
  func.func @transform_3(%arg0: i32) -> (i32, i32) {
    %c0_i32 = arith.constant 0 : i32
    %c0_i32_0 = arith.constant 0 : i32
    %c0_i32_1 = arith.constant 0 : i32
    return %c0_i32, %c0_i32_0 : i32, i32
  }
  func.func @transform_4(%arg0: i32) -> (i32, i32, i32) {
    %c0_i32 = arith.constant 0 : i32
    %c0_i32_0 = arith.constant 0 : i32
    %c0_i32_1 = arith.constant 0 : i32
    %c0_i32_2 = arith.constant 0 : i32
    return %c0_i32, %c0_i32_0, %c0_i32_1 : i32, i32, i32
  }
  func.func @transform_5(%arg0: i32) -> (i32, i32, i32) {
    %c0_i32 = arith.constant 0 : i32
    %c0_i32_0 = arith.constant 0 : i32
    %c0_i32_1 = arith.constant 0 : i32
    %c0_i32_2 = arith.constant 0 : i32
    return %c0_i32, %c0_i32_0, %c0_i32_1 : i32, i32, i32
  }
  func.func @transform_6(%arg0: i32) -> (i32, i32, i32) {
    %c0_i32 = arith.constant 0 : i32
    %c0_i32_0 = arith.constant 0 : i32
    %c0_i32_1 = arith.constant 0 : i32
    %c0_i32_2 = arith.constant 0 : i32
    return %c0_i32, %c0_i32_0, %c0_i32_1 : i32, i32, i32
  }
  func.func @transform_7(%arg0: i32) -> (i32, i32, i32) {
    %c0_i32 = arith.constant 0 : i32
    %c0_i32_0 = arith.constant 0 : i32
    %c0_i32_1 = arith.constant 0 : i32
    %c0_i32_2 = arith.constant 0 : i32
    return %c0_i32, %c0_i32_0, %c0_i32_1 : i32, i32, i32
  }
  func.func @transform_8(%arg0: i32) -> (i32, i32, i32) {
    %c0_i32 = arith.constant 0 : i32
    %c0_i32_0 = arith.constant 0 : i32
    %c0_i32_1 = arith.constant 0 : i32
    %c0_i32_2 = arith.constant 0 : i32
    return %c0_i32, %c0_i32_0, %c0_i32_1 : i32, i32, i32
  }
}

</mosaic_0001>

<bundles_post_ra>
// kernel: bilstm_forward.1
= control target key start
LH: loop header
LB: loop body
LE: loop exit
PB: predicated region body
PF: predicated region fallthrough
CT: control target
= control target key end

     0   :  { %13 = vsyncpa [#allocation5], 0  ;;  %s5963_s0 = inlined_call_operand.vmem [shape: f32[8,2,16], index: 0, kind: input, shape index: {}]   ;;  %s5964_s1 = inlined_call_operand.hbm [shape: f32[16,128], index: 1, kind: input, shape index: {}]   ;;  %s5965_s2 = inlined_call_operand.hbm [shape: f32[16,128], index: 2, kind: input, shape index: {}]   ;;  %s5966_s3 = inlined_call_operand.vmem [shape: f32[1,128], index: 3, kind: input, shape index: {}]   ;;  %s5967_s4 = inlined_call_operand.hbm [shape: f32[2,32,128], index: 4, kind: input, shape index: {}]   ;;  %s5968_s5 = inlined_call_operand.vmem [shape: f32[1,32,128], index: 5, kind: input, shape index: {}]   ;;  %s5969_s6 = inlined_call_operand.hbm [shape: f32[1,32,128], index: 6, kind: input, shape index: {}]   ;;  %s5970_s7 = inlined_call_operand.vmem [shape: f32[1,1,128], index: 7, kind: input, shape index: {}]   ;;  %s5971_s8 = inlined_call_operand.vmem [shape: f32[8,2,32], index: 8, kind: output, shape index: {}]  }
   0x1   :  { %14 = vsyncpa [#allocation7], 0 }
   0x2   :  { %15 = vsyncpa [#allocation10], 0  ;;  %s5185_s27 = smov [#allocation6]   ;;  %s5186_s29 = smov [#allocation4]  }
   0x3   :  { %s35_s28 = sshll.u32 %s5185_s27, 4  ;;  %s23_s30 = sshll.u32 %s5186_s29, 4  ;;  %s36_s28 = int_to_ptr.vmem [resolvable:$true] %s35_s28  ;;  %s24_s30 = int_to_ptr.vmem [resolvable:$true] %s23_s30 }
   0x4   :  { %s5107_s9 = scalar_lea.vmem %s36_s28, 256  ;;  %p5112_p1 = scmp.lt.s32.totalorder %s36_s28, %s36_s28 }
   0x5   :  { %p5108_p0 = scmp.ne.s32.totalorder %s36_s28, %s5107_s9  ;;  %p5113_p2 = scmp.lt.s32.totalorder %s5107_s9, %s5107_s9 }
   0x7   :  { %p5114_p3 = por %p5113_p2, %p5112_p1 }
   0x9   :  { %p5115_p4 = pnand %p5114_p3, %p5108_p0 }
   0xb   :  { %5118 = shalt.err (!%p5115_p4)
}
   0xc   :  { %s5187_s10 = smov 128   ;;  %s5188_s11 = smov 8  }
   0xd   :  { %41 = dma.hbm_to_vmem [thread:$0]  %s5965_s2, 256, %s36_s28, [#allocation7], %s5187_s10, %s5187_s10, %s5188_s11  }
   0xe   :  { %s5127_s14 = scalar_lea.vmem %s24_s30, 256  ;;  %p5132_p6 = scmp.lt.s32.totalorder %s24_s30, %s24_s30 }
   0xf   :  { %p5128_p5 = scmp.ne.s32.totalorder %s24_s30, %s5127_s14  ;;  %p5133_p7 = scmp.lt.s32.totalorder %s5127_s14, %s5127_s14 }
  0x11   :  { %p5134_p8 = por %p5133_p7, %p5132_p6 }
  0x13   :  { %p5135_p9 = pnand %p5134_p8, %p5128_p5 }
  0x15   :  { %5138 = shalt.err (!%p5135_p9)
}
  0x16   :  { %29 = dma.hbm_to_vmem [thread:$0]  %s5964_s1, 256, %s24_s30, [#allocation5], %s5187_s10, %s5187_s10, %s5188_s11  }
  0x17   :  { %s5189_s17 = smov [#allocation8]   ;;  %s5190_s19 = smov [#allocation9]  }
  0x18   :  { %s49_s18 = sshll.u32 %s5189_s17, 4  ;;  %s63_s20 = sshll.u32 %s5190_s19, 4  ;;  %s50_s18 = int_to_ptr.vmem [resolvable:$true] %s49_s18  ;;  %s64_s20 = int_to_ptr.vmem [resolvable:$true] %s63_s20 }
  0x19   :  { %s5147_s2 = scalar_lea.vmem %s50_s18, 1024  ;;  %p5152_p11 = scmp.lt.s32.totalorder %s50_s18, %s50_s18 }
  0x1a   :  { %p5148_p10 = scmp.ne.s32.totalorder %s50_s18, %s5147_s2  ;;  %p5153_p12 = scmp.lt.s32.totalorder %s5147_s2, %s5147_s2 }
  0x1c   :  { %p5154_p13 = por %p5153_p12, %p5152_p11 }
  0x1e   :  { %p5155_p0 = pnand %p5154_p13, %p5148_p10 }
  0x20   :  { %5158 = shalt.err (!%p5155_p0)
}
  0x21   :  { %55 = dma.hbm_to_vmem [thread:$0]  %s5967_s4, 1024, %s50_s18, [#allocation7], %s5187_s10, %s5187_s10, %s5188_s11  }
  0x22   :  { %s5167_s1 = scalar_lea.vmem %s64_s20, 512  ;;  %p5172_p2 = scmp.lt.s32.totalorder %s64_s20, %s64_s20 }
  0x23   :  { %p5168_p1 = scmp.ne.s32.totalorder %s64_s20, %s5167_s1  ;;  %p5173_p3 = scmp.lt.s32.totalorder %s5167_s1, %s5167_s1 }
  0x25   :  { %p5174_p4 = por %p5173_p3, %p5172_p2 }
  0x27   :  { %p5175_p5 = pnand %p5174_p4, %p5168_p1 }
  0x29   :  { %5178 = shalt.err (!%p5175_p5)
}
  0x2a   :  { %69 = dma.hbm_to_vmem [thread:$0]  %s5969_s6, 512, %s64_s20, [#allocation10], %s5187_s10, %s5187_s10, %s5188_s11  }
  0x2b   :  { %5179 = dma.done.wait [#allocation5], 256  }
  0x2c   :  { %5180 = vsyncadd [#allocation5], 4294967040 }
  0x2d   :  { %5181 = dma.done.wait [#allocation7], 1280  }
  0x2e   :  { %5182 = vsyncadd [#allocation7], 4294966016 }
  0x2f   :  { %5183 = dma.done.wait [#allocation10], 512  }
  0x30   :  { %5184 = vsyncadd [#allocation10], 4294966784  ;;  %v5191_v0 = vmov 0.0   ;;  %vm5192_vm0 = vmmov 0   ;;  %v5270_v1 = vld [vmem:[#allocation6 + $0x8] sm:$0xff]  ;;  %v5272_v2 = vld [vmem:[#allocation4 + $0x8] sm:$0xff] }
  0x31   :  { %4497 = vmatprep.subr.mxu0 %v5191_v0  ;;  %4504 = vmatprep.subr.mxu1 %v5191_v0  ;;  %v5274_v3 = vld [vmem:[#allocation6] sm:$0xff]  ;;  %v4204_v4 = vld [vmem:[%s5963_s0 + $0xe] sm:$0x3]  ;;  %vm92_vm1 = vcmask 130048   ;;  %v5281_v5 = vld [vmem:[#allocation4] sm:$0xff]  ;;  %s5194_s30 = smov 64  }
  0x32   :  { %4501 = vmatprep.mubr.msk.f32.mxu0 %vm5192_vm0, %v5191_v0  ;;  %4508 = vmatprep.mubr.msk.f32.mxu1 %vm5192_vm0, %v5191_v0  ;;  %v89_v6 = vld [vmem:[%s5963_s0] sm:$0x3]  ;;  %v4209_v7 = vld [vmem:[%s5963_s0 + $0xc] sm:$0x3]  ;;  %v4208_v8 = vld [vmem:[%s5963_s0 + $0x2] sm:$0x3] }
  0x33   :  { %4498 = vmatpush3.msra.mxu0 %v5270_v1  ;;  %4505 = vmatpush3.msra.mxu1 %v5272_v2  ;;  %v4213_v9 = vld [vmem:[%s5963_s0 + $0xa] sm:$0x3]  ;;  %v4212_v10 = vld [vmem:[%s5963_s0 + $0x4] sm:$0x3]  ;;  %v4217_v11 = vld [vmem:[%s5963_s0 + $0x8] sm:$0x3] }
  0x34   :  { %4499 = vmatprep.subr.mxu0 %v5191_v0  ;;  %4506 = vmatprep.subr.mxu1 %v5191_v0  ;;  %v4216_v12 = vld [vmem:[%s5963_s0 + $0x6] sm:$0x3]  ;;  %v4220_v14 = vld [vmem:[%s5963_s0 + $0x8] sm:$0x3]  ;;  %v4225_v15 = vld [vmem:[%s5963_s0 + $0x4] sm:$0x3] }
  0x35   :  { %4500 = vmatpush3.msra.mxu0 %v5274_v3  ;;  %4507 = vmatpush3.msra.mxu1 %v5281_v5  ;;  %v4221_v13 = vld [vmem:[%s5963_s0 + $0x6] sm:$0x3]  ;;  %v4224_v16 = vld [vmem:[%s5963_s0 + $0xa] sm:$0x3]  ;;  %v4229_v17 = vld [vmem:[%s5963_s0 + $0x2] sm:$0x3] }
  0x36   :  { %4502 = vmatmul.mubr.msk.f32.vlgmr.msra.gmra.mxu0 %vm92_vm1, %v4204_v4  ;;  %4511 = vmatprep.subr.mxu0 %v5191_v0  ;;  %v4228_v18 = vld [vmem:[%s5963_s0 + $0xc] sm:$0x3]  ;;  %v1160_v19 = vld [vmem:[%s5963_s0] sm:$0x3]  ;;  %v4232_v20 = vld [vmem:[%s5963_s0 + $0xe] sm:$0x3] }
  0x37   :  { %4509 = vmatmul.mubr.msk.f32.vlgmr.msra.gmra.mxu1 %vm92_vm1, %v89_v6  ;;  %4512 = vmatpush3.msra.mxu0 %v5270_v1  ;;  %v5427_v21 = vld [vmem:[#allocation8 + $0x18] sm:$0xff]  ;;  %v5434_v22 = vld [vmem:[#allocation8 + $0x10] sm:$0xff]  ;;  %v5439_v23 = vld [vmem:[#allocation8 + $0x8] sm:$0xff]  ;;  %vm1418_vm2 = vcmask 254976   ;;  %vm1315_vm3 = vcmask 261120  }
  0x38   :  { %4518 = vmatprep.subr.mxu1 %v5191_v0  ;;  %4513 = vmatprep.subr.mxu0 %v5191_v0  ;;  %v5446_v24 = vld [vmem:[#allocation8] sm:$0xff] }
  0x39   :  { %4519 = vmatpush3.msra.mxu1 %v5272_v2  ;;  %4514 = vmatpush3.msra.mxu0 %v5274_v3  ;;  %v4207_v26 = vld [vmem:[%s5966_s3] ss:$0 sm:$0xff]  ;;  %s5193_s3 = smov 32  }
  0x3a   :  { %4515 = vmatprep.mubr.msk.f32.mxu0 %vm5192_vm0, %v5191_v0  ;;  %4520 = vmatprep.subr.mxu1 %v5191_v0 }
  0x3b   :  { %4516 = vmatmul.mubr.msk.f32.vlgmr.msra.gmra.mxu0 %vm92_vm1, %v4209_v7  ;;  %4521 = vmatpush3.msra.mxu1 %v5281_v5 }
  0x3c   :  { %4522 = vmatprep.mubr.msk.f32.mxu1 %vm5192_vm0, %v5191_v0  ;;  %4525 = vmatprep.subr.mxu0 %v5191_v0 }
  0x3d   :  { %4523 = vmatmul.mubr.msk.f32.vlgmr.msra.gmra.mxu1 %vm92_vm1, %v4208_v8  ;;  %4526 = vmatpush3.msra.mxu0 %v5270_v1 }
  0x3e   :  { %4532 = vmatprep.subr.mxu1 %v5191_v0  ;;  %4527 = vmatprep.subr.mxu0 %v5191_v0 }
  0x3f   :  { %4533 = vmatpush3.msra.mxu1 %v5272_v2  ;;  %4528 = vmatpush3.msra.mxu0 %v5274_v3 }
  0x40   :  { %4529 = vmatprep.mubr.msk.f32.mxu0 %vm5192_vm0, %v5191_v0  ;;  %4534 = vmatprep.subr.mxu1 %v5191_v0 }
  0x41   :  { %4530 = vmatmul.mubr.msk.f32.vlgmr.msra.gmra.mxu0 %vm92_vm1, %v4213_v9  ;;  %4535 = vmatpush3.msra.mxu1 %v5281_v5 }
  0x42   :  { %4536 = vmatprep.mubr.msk.f32.mxu1 %vm5192_vm0, %v5191_v0  ;;  %4539 = vmatprep.subr.mxu0 %v5191_v0 }
  0x43   :  { %4537 = vmatmul.mubr.msk.f32.vlgmr.msra.gmra.mxu1 %vm92_vm1, %v4212_v10  ;;  %4540 = vmatpush3.msra.mxu0 %v5270_v1 }
  0x44   :  { %4546 = vmatprep.subr.mxu1 %v5191_v0  ;;  %4541 = vmatprep.subr.mxu0 %v5191_v0 }
  0x45   :  { %4547 = vmatpush3.msra.mxu1 %v5272_v2  ;;  %4542 = vmatpush3.msra.mxu0 %v5274_v3 }
  0x46   :  { %4543 = vmatprep.mubr.msk.f32.mxu0 %vm5192_vm0, %v5191_v0  ;;  %4548 = vmatprep.subr.mxu1 %v5191_v0 }
  0x47   :  { %4544 = vmatmul.mubr.msk.f32.vlgmr.msra.gmra.mxu0 %vm92_vm1, %v4217_v11  ;;  %4549 = vmatpush3.msra.mxu1 %v5281_v5 }
  0x48   :  { %4550 = vmatprep.mubr.msk.f32.mxu1 %vm5192_vm0, %v5191_v0  ;;  %4553 = vmatprep.subr.mxu0 %v5191_v0 }
  0x49   :  { %4551 = vmatmul.mubr.msk.f32.vlgmr.msra.gmra.mxu1 %vm92_vm1, %v4216_v12  ;;  %4554 = vmatpush3.msra.mxu0 %v5270_v1 }
  0x4a   :  { %4560 = vmatprep.subr.mxu1 %v5191_v0  ;;  %4555 = vmatprep.subr.mxu0 %v5191_v0 }
  0x4b   :  { %4561 = vmatpush3.msra.mxu1 %v5272_v2  ;;  %4556 = vmatpush3.msra.mxu0 %v5274_v3 }
  0x4c   :  { %4557 = vmatprep.mubr.msk.f32.mxu0 %vm5192_vm0, %v5191_v0  ;;  %4562 = vmatprep.subr.mxu1 %v5191_v0 }
  0x4d   :  { %4558 = vmatmul.mubr.msk.f32.vlgmr.msra.gmra.mxu0 %vm92_vm1, %v4221_v13  ;;  %4563 = vmatpush3.msra.mxu1 %v5281_v5 }
  0x4e   :  { %4564 = vmatprep.mubr.msk.f32.mxu1 %vm5192_vm0, %v5191_v0  ;;  %4567 = vmatprep.subr.mxu0 %v5191_v0 }
  0x4f   :  { %4565 = vmatmul.mubr.msk.f32.vlgmr.msra.gmra.mxu1 %vm92_vm1, %v4220_v14  ;;  %4568 = vmatpush3.msra.mxu0 %v5270_v1 }
  0x50   :  { %4574 = vmatprep.subr.mxu1 %v5191_v0  ;;  %4569 = vmatprep.subr.mxu0 %v5191_v0 }
  0x51   :  { %4575 = vmatpush3.msra.mxu1 %v5272_v2  ;;  %4570 = vmatpush3.msra.mxu0 %v5274_v3 }
  0x52   :  { %4571 = vmatprep.mubr.msk.f32.mxu0 %vm5192_vm0, %v5191_v0  ;;  %4576 = vmatprep.subr.mxu1 %v5191_v0 }
  0x53   :  { %4572 = vmatmul.mubr.msk.f32.vlgmr.msra.gmra.mxu0 %vm92_vm1, %v4225_v15  ;;  %4577 = vmatpush3.msra.mxu1 %v5281_v5 }
  0x54   :  { %4578 = vmatprep.mubr.msk.f32.mxu1 %vm5192_vm0, %v5191_v0  ;;  %4581 = vmatprep.subr.mxu0 %v5191_v0 }
  0x55   :  { %4579 = vmatmul.mubr.msk.f32.vlgmr.msra.gmra.mxu1 %vm92_vm1, %v4224_v16  ;;  %4582 = vmatpush3.msra.mxu0 %v5270_v1 }
  0x56   :  { %4588 = vmatprep.subr.mxu1 %v5191_v0  ;;  %4583 = vmatprep.subr.mxu0 %v5191_v0 }
  0x57   :  { %4589 = vmatpush3.msra.mxu1 %v5272_v2  ;;  %4584 = vmatpush3.msra.mxu0 %v5274_v3 }
  0x58   :  { %4585 = vmatprep.mubr.msk.f32.mxu0 %vm5192_vm0, %v5191_v0  ;;  %4590 = vmatprep.subr.mxu1 %v5191_v0 }
  0x59   :  { %4586 = vmatmul.mubr.msk.f32.vlgmr.msra.gmra.mxu0 %vm92_vm1, %v4229_v17  ;;  %4591 = vmatpush3.msra.mxu1 %v5281_v5 }
  0x5a   :  { %4592 = vmatprep.mubr.msk.f32.mxu1 %vm5192_vm0, %v5191_v0  ;;  %4595 = vmatprep.subr.mxu0 %v5191_v0 }
  0x5b   :  { %4593 = vmatmul.mubr.msk.f32.vlgmr.msra.gmra.mxu1 %vm92_vm1, %v4228_v18  ;;  %4596 = vmatpush3.msra.mxu0 %v5270_v1 }
  0x5c   :  { %4602 = vmatprep.subr.mxu1 %v5191_v0  ;;  %4597 = vmatprep.subr.mxu0 %v5191_v0 }
  0x5d   :  { %4603 = vmatpush3.msra.mxu1 %v5272_v2  ;;  %4598 = vmatpush3.msra.mxu0 %v5274_v3 }
  0x5e   :  { %4599 = vmatprep.mubr.msk.f32.mxu0 %vm5192_vm0, %v5191_v0  ;;  %4604 = vmatprep.subr.mxu1 %v5191_v0 }
  0x5f   :  { %4600 = vmatmul.mubr.msk.f32.vlgmr.msra.gmra.mxu0 %vm92_vm1, %v1160_v19  ;;  %4605 = vmatpush3.msra.mxu1 %v5281_v5 }
  0x60   :  { %4606 = vmatprep.mubr.msk.f32.mxu1 %vm5192_vm0, %v5191_v0  ;;  %4609 = vmatprep.subr.mxu0 %v5191_v0 }
  0x61   :  { %4607 = vmatmul.mubr.msk.f32.vlgmr.msra.gmra.mxu1 %vm92_vm1, %v4232_v20  ;;  %4610 = vmatpush3.msra.mxu0 %v5427_v21 }
  0x62   :  { %4611 = vmatprep.subr.mxu0 %v5191_v0  ;;  %4617 = vmatprep.mubr.msk.f32.mxu0 %vm5192_vm0, %v5191_v0 }
  0x63   :  { %4612 = vmatpush3.msra.mxu0 %v5434_v22  ;;  %4620 = vmatprep.subr.mxu1 %v5191_v0 }
  0x64   :  { %4613 = vmatprep.subr.mxu0 %v5191_v0  ;;  %4621 = vmatpush3.msra.mxu1 %v5427_v21 }
  0x65   :  { %4614 = vmatpush3.msra.mxu0 %v5439_v23  ;;  %4622 = vmatprep.subr.mxu1 %v5191_v0 }
  0x66   :  { %4615 = vmatprep.subr.mxu0 %v5191_v0  ;;  %4623 = vmatpush3.msra.mxu1 %v5434_v22 }
  0x67   :  { %4616 = vmatpush3.msra.mxu0 %v5446_v24  ;;  %4624 = vmatprep.subr.mxu1 %v5191_v0 }
  0x68   :  { %4618 = vmatmul.mubr.f32.vlgmr.msra.gmra.mxu0 %v5191_v0  ;;  %4625 = vmatpush3.msra.mxu1 %v5439_v23 }
  0x69   :  { %4626 = vmatprep.subr.mxu1 %v5191_v0  ;;  %4628 = vmatprep.mubr.msk.f32.mxu1 %vm5192_vm0, %v5191_v0 }
  0x6a   :  { %4627 = vmatpush3.msra.mxu1 %v5446_v24  ;;  %4631 = vmatprep.subr.mxu0 %v5191_v0 }
  0x6b   :  { %4632 = vmatpush3.msra.mxu0 %v5427_v21  ;;  %4639 = vmatprep.mubr.msk.f32.mxu0 %vm5192_vm0, %v5191_v0 }
  0x6c   :  { %4633 = vmatprep.subr.mxu0 %v5191_v0  ;;  %4642 = vmatprep.subr.mxu1 %v5191_v0 }
  0x6d   :  { %4634 = vmatpush3.msra.mxu0 %v5434_v22 }
  0x6e   :  { %4635 = vmatprep.subr.mxu0 %v5191_v0 }
  0x6f   :  { %4636 = vmatpush3.msra.mxu0 %v5439_v23 }
  0x70   :  { %4637 = vmatprep.subr.mxu0 %v5191_v0 }
  0x71   :  { %4638 = vmatpush3.msra.mxu0 %v5446_v24 }
  0x72   :  { %4653 = vmatprep.subr.mxu0 %v5191_v0 }
  0xf6   :  { %v162_v25 = vpop.f32.mrf.mxu0 }
  0xf7   :  { %v235_v27 = vpop.f32.mrf.mxu1 }
  0xf8   :  { %v236_v28 = vadd.f32 %v235_v27, %v162_v25  ;;  %v4503_v29 = vpop.f32.mrf.mxu0 }
  0xf9   :  { %v4510_v30 = vpop.f32.mrf.mxu1 }
  0xfa   :  { %v245_v31 = vadd.f32 %v4207_v26, %v236_v28 }
  0xfb   :  { %v320_v32 = vpop.f32.mrf.mxu0 }
  0xfc   :  { %246 = vst [vmem:[#allocation2] sm:$0x3] %v245_v31 }
  0xfd   :  { %v393_v33 = vpop.f32.mrf.mxu1  ;;  %v4517_v34 = vpop.f32.mrf.mxu0 }
  0xfe   :  { %v394_v35 = vadd.f32 %v393_v33, %v320_v32 }
  0xff   :  { %v4524_v36 = vpop.f32.mrf.mxu1 }
 0x100   :  { %v397_v37 = vadd.f32 %v4207_v26, %v394_v35 }
 0x101   :  { %v473_v38 = vpop.f32.mrf.mxu0 }
 0x102   :  { %399 = vst [vmem:[#allocation2 + $0x2] sm:$0x3] %v397_v37 }
 0x103   :  { %v546_v39 = vpop.f32.mrf.mxu1  ;;  %v4531_v40 = vpop.f32.mrf.mxu0  ;;  %v1314_v11 = vld [vmem:[#allocation2] sm:$0x3] }
 0x104   :  { %v547_v41 = vadd.f32 %v546_v39, %v473_v38 }
 0x105   :  { %v4538_v42 = vpop.f32.mrf.mxu1 }
 0x106   :  { %v550_v43 = vadd.f32 %v4207_v26, %v547_v41 }
 0x107   :  { %v626_v44 = vpop.f32.mrf.mxu0 }
 0x108   :  { %552 = vst [vmem:[#allocation2 + $0x4] sm:$0x3] %v550_v43 }
 0x109   :  { %v699_v45 = vpop.f32.mrf.mxu1  ;;  %v4545_v46 = vpop.f32.mrf.mxu0  ;;  %v1420_v33 = vld [vmem:[#allocation2 + $0x2] sm:$0x3] }
 0x10a   :  { %v700_v47 = vadd.f32 %v699_v45, %v626_v44 }
 0x10b   :  { %v4552_v48 = vpop.f32.mrf.mxu1 }
 0x10c   :  { %v703_v49 = vadd.f32 %v4207_v26, %v700_v47 }
 0x10d   :  { %v777_v50 = vpop.f32.mrf.mxu0 }
 0x10e   :  { %705 = vst [vmem:[#allocation2 + $0x6] sm:$0x3] %v703_v49 }
 0x10f   :  { %v850_v51 = vpop.f32.mrf.mxu1  ;;  %v4559_v52 = vpop.f32.mrf.mxu0 }
 0x110   :  { %v851_v53 = vadd.f32 %v850_v51, %v777_v50  ;;  %v1524_v51 = vld [vmem:[#allocation2 + $0x4] sm:$0x3] }
 0x111   :  { %v4566_v54 = vpop.f32.mrf.mxu1 }
 0x112   :  { %v854_v55 = vadd.f32 %v4207_v26, %v851_v53 }
 0x113   :  { %v928_v56 = vpop.f32.mrf.mxu0 }
 0x114   :  { %856 = vst [vmem:[#allocation2 + $0x8] sm:$0x3] %v854_v55 }
 0x115   :  { %v1001_v57 = vpop.f32.mrf.mxu1  ;;  %v4573_v58 = vpop.f32.mrf.mxu0 }
 0x116   :  { %v1002_v59 = vadd.f32 %v1001_v57, %v928_v56 }
 0x117   :  { %v4580_v60 = vpop.f32.mrf.mxu1 }
 0x118   :  { %v1005_v61 = vadd.f32 %v4207_v26, %v1002_v59 }
 0x119   :  { %v1079_v62 = vpop.f32.mrf.mxu0 }
 0x11a   :  { %1007 = vst [vmem:[#allocation2 + $0xa] sm:$0x3] %v1005_v61 }
 0x11b   :  { %v1152_v63 = vpop.f32.mrf.mxu1  ;;  %v4587_v1 = vpop.f32.mrf.mxu0 }
 0x11c   :  { %v1153_v2 = vadd.f32 %v1152_v63, %v1079_v62 }
 0x11d   :  { %v4594_v3 = vpop.f32.mrf.mxu1 }
 0x11e   :  { %v1156_v4 = vadd.f32 %v4207_v26, %v1153_v2 }
 0x11f   :  { %v1230_v5 = vpop.f32.mrf.mxu0 }
 0x120   :  { %1158 = vst [vmem:[#allocation2 + $0xc] sm:$0x3] %v1156_v4 }
 0x121   :  { %v1303_v6 = vpop.f32.mrf.mxu1  ;;  %v4601_v7 = vpop.f32.mrf.mxu0 }
 0x122   :  { %v1304_v8 = vadd.f32 %v1303_v6, %v1230_v5  ;;  %v1628_v6 = vld [vmem:[#allocation2 + $0x6] sm:$0x3] }
 0x123   :  { %v4608_v9 = vpop.f32.mrf.mxu1 }
 0x124   :  { %v1307_v10 = vadd.f32 %v4207_v26, %v1304_v8 }
 0x126   :  { %1309 = vst [vmem:[#allocation2 + $0xe] sm:$0x3] %v1307_v10 }
 0x128   :  { %v1385_v12 = vpop.f32.mrf.mxu0 }
 0x129   :  { %v1389_v13 = vadd.f32 %v1385_v12, %v1314_v11 }
 0x12a   :  { %v4619_v14 = vpop.f32.mrf.mxu0 }
 0x12b   :  { %4971 = vtanh.f32 %v1389_v13  ;;  %v4235_v16 = vmul.f32 -1.442695, %v1389_v13 }
 0x12d   :  { %4973 = vpow2.f32 %v4235_v16 }
 0x138   :  { %v4972_v15 = vpop.eup %4971 }
 0x139   :  { %1399 = vrot.lane.b32.xlu0 %v4972_v15, %s5193_s3 }
 0x13a   :  { %v4974_v17 = vpop.eup %4973 }
 0x13b   :  { %v1393_v18 = vadd.f32 1.0, %v4974_v17 }
 0x13d   :  { %4975 = vrcp.f32 %v1393_v18 }
 0x14a   :  { %v4976_v19 = vpop.eup %4975 }
 0x14b   :  { %v1397_v26 = vmul.f32 0.0, %v4976_v19 }
 0x1ab   :  { %v1400_v20 = vpop.permute.xlu0 %1399 }
 0x1ac   :  { %v1402_v25 = vmul.f32 %v4976_v19, %v1400_v20 }
 0x1ae   :  { %1404 = vrot.lane.b32.xlu0 %v1402_v25, %s5193_s3 }
 0x220   :  { %v1405_v27 = vpop.permute.xlu0 %1404 }
 0x221   :  { %v1407_v28 = vadd.f32 %v1405_v27, %v1397_v26 }
 0x223   :  { %4977 = vtanh.f32 %v1407_v28 }
 0x230   :  { %v4978_v29 = vpop.eup %4977 }
 0x231   :  { %1410 = vrot.lane.b32.xlu1 %v4978_v29, %s5193_s3 }
 0x2a3   :  { %v1411_v30 = vpop.permute.xlu1 %1410 }
 0x2a4   :  { %v1413_v31 = vmul.f32 %v4976_v19, %v1411_v30 }
 0x2a6   :  { %1415 = vrot.lane.b32.xlu1 %v1413_v31, %s5194_s30 }
 0x318   :  { %v1416_v32 = vpop.permute.xlu1 %1415 }
 0x319   :  { %1419 = vst.msk [vmem:[#allocation3] sm:$0x3] %vm1418_vm2, %v1416_v32  ;;  %4629 = vmatmul.mubr.msk.f32.vlgmr.msra.gmra.mxu1 %vm1315_vm3, %v1416_v32 }
 0x31a   :  { %4643 = vmatpush3.msra.mxu1 %v5427_v21  ;;  %4650 = vmatprep.mubr.msk.f32.mxu1 %vm5192_vm0, %v5191_v0 }
 0x31b   :  { %4644 = vmatprep.subr.mxu1 %v5191_v0 }
 0x31c   :  { %4645 = vmatpush3.msra.mxu1 %v5434_v22 }
 0x31d   :  { %4646 = vmatprep.subr.mxu1 %v5191_v0 }
 0x31e   :  { %4647 = vmatpush3.msra.mxu1 %v5439_v23 }
 0x31f   :  { %4648 = vmatprep.subr.mxu1 %v5191_v0 }
 0x320   :  { %4649 = vmatpush3.msra.mxu1 %v5446_v24 }
 0x321   :  { %4664 = vmatprep.subr.mxu1 %v5191_v0 }
 0x3d9   :  { %v1489_v34 = vpop.f32.mrf.mxu1 }
 0x3da   :  { %v1493_v35 = vadd.f32 %v1489_v34, %v1420_v33 }
 0x3db   :  { %v4630_v36 = vpop.f32.mrf.mxu1 }
 0x3dc   :  { %4979 = vtanh.f32 %v1493_v35  ;;  %v4237_v38 = vmul.f32 -1.442695, %v1493_v35 }
 0x3de   :  { %4981 = vpow2.f32 %v4237_v38 }
 0x3e9   :  { %v4980_v37 = vpop.eup %4979 }
 0x3ea   :  { %1503 = vrot.lane.b32.xlu0 %v4980_v37, %s5193_s3 }
 0x3eb   :  { %v4982_v39 = vpop.eup %4981 }
 0x3ec   :  { %v1497_v40 = vadd.f32 1.0, %v4982_v39 }
 0x3ee   :  { %4983 = vrcp.f32 %v1497_v40 }
 0x3fb   :  { %v4984_v41 = vpop.eup %4983 }
 0x3fc   :  { %v1501_v44 = vmul.f32 %v4984_v41, %v1407_v28  ;;  %v1732_v28 = vld [vmem:[#allocation2 + $0x8] sm:$0x3] }
 0x45c   :  { %v1504_v42 = vpop.permute.xlu0 %1503 }
 0x45d   :  { %v1506_v43 = vmul.f32 %v4984_v41, %v1504_v42 }
 0x45f   :  { %1508 = vrot.lane.b32.xlu1 %v1506_v43, %s5193_s3 }
 0x4d1   :  { %v1509_v45 = vpop.permute.xlu1 %1508 }
 0x4d2   :  { %v1511_v46 = vadd.f32 %v1509_v45, %v1501_v44 }
 0x4d4   :  { %4985 = vtanh.f32 %v1511_v46 }
 0x4e1   :  { %v4986_v47 = vpop.eup %4985 }
 0x4e2   :  { %1514 = vrot.lane.b32.xlu0 %v4986_v47, %s5193_s3 }
 0x554   :  { %v1515_v48 = vpop.permute.xlu0 %1514 }
 0x555   :  { %v1517_v49 = vmul.f32 %v4984_v41, %v1515_v48 }
 0x557   :  { %1519 = vrot.lane.b32.xlu1 %v1517_v49, %s5194_s30 }
 0x5c9   :  { %v1520_v50 = vpop.permute.xlu1 %1519 }
 0x5ca   :  { %1523 = vst.msk [vmem:[#allocation3 + $0x2] sm:$0x3] %vm1418_vm2, %v1520_v50  ;;  %4640 = vmatmul.mubr.msk.f32.vlgmr.msra.gmra.mxu0 %vm1315_vm3, %v1520_v50 }
 0x5cb   :  { %4654 = vmatpush3.msra.mxu0 %v5427_v21  ;;  %4661 = vmatprep.mubr.msk.f32.mxu0 %vm5192_vm0, %v5191_v0 }
 0x5cc   :  { %4655 = vmatprep.subr.mxu0 %v5191_v0 }
 0x5cd   :  { %4656 = vmatpush3.msra.mxu0 %v5434_v22 }
 0x5ce   :  { %4657 = vmatprep.subr.mxu0 %v5191_v0 }
 0x5cf   :  { %4658 = vmatpush3.msra.mxu0 %v5439_v23 }
 0x5d0   :  { %4659 = vmatprep.subr.mxu0 %v5191_v0 }
 0x5d1   :  { %4660 = vmatpush3.msra.mxu0 %v5446_v24 }
 0x5d2   :  { %4675 = vmatprep.subr.mxu0 %v5191_v0 }
 0x68a   :  { %v1593_v52 = vpop.f32.mrf.mxu0 }
 0x68b   :  { %v1597_v53 = vadd.f32 %v1593_v52, %v1524_v51 }
 0x68c   :  { %v4641_v54 = vpop.f32.mrf.mxu0 }
 0x68d   :  { %4987 = vtanh.f32 %v1597_v53  ;;  %v4239_v56 = vmul.f32 -1.442695, %v1597_v53 }
 0x68f   :  { %4989 = vpow2.f32 %v4239_v56 }
 0x69a   :  { %v4988_v55 = vpop.eup %4987 }
 0x69b   :  { %1607 = vrot.lane.b32.xlu0 %v4988_v55, %s5193_s3 }
 0x69c   :  { %v4990_v57 = vpop.eup %4989 }
 0x69d   :  { %v1601_v58 = vadd.f32 1.0, %v4990_v57 }
 0x69f   :  { %4991 = vrcp.f32 %v1601_v58 }
 0x6ac   :  { %v4992_v59 = vpop.eup %4991 }
 0x6ad   :  { %v1605_v62 = vmul.f32 %v4992_v59, %v1511_v46  ;;  %v1836_v46 = vld [vmem:[#allocation2 + $0xa] sm:$0x3] }
 0x70d   :  { %v1608_v60 = vpop.permute.xlu0 %1607 }
 0x70e   :  { %v1610_v61 = vmul.f32 %v4992_v59, %v1608_v60  ;;  %v1940_v60 = vld [vmem:[#allocation2 + $0xc] sm:$0x3] }
 0x710   :  { %1612 = vrot.lane.b32.xlu1 %v1610_v61, %s5193_s3 }
 0x782   :  { %v1613_v63 = vpop.permute.xlu1 %1612 }
 0x783   :  { %v1615_v1 = vadd.f32 %v1613_v63, %v1605_v62 }
 0x785   :  { %4993 = vtanh.f32 %v1615_v1 }
 0x792   :  { %v4994_v2 = vpop.eup %4993 }
 0x793   :  { %1618 = vrot.lane.b32.xlu0 %v4994_v2, %s5193_s3 }
 0x805   :  { %v1619_v3 = vpop.permute.xlu0 %1618 }
 0x806   :  { %v1621_v4 = vmul.f32 %v4992_v59, %v1619_v3 }
 0x808   :  { %1623 = vrot.lane.b32.xlu1 %v1621_v4, %s5194_s30 }
 0x87a   :  { %v1624_v5 = vpop.permute.xlu1 %1623 }
 0x87b   :  { %1627 = vst.msk [vmem:[#allocation3 + $0x4] sm:$0x3] %vm1418_vm2, %v1624_v5  ;;  %4651 = vmatmul.mubr.msk.f32.vlgmr.msra.gmra.mxu1 %vm1315_vm3, %v1624_v5 }
 0x87c   :  { %4665 = vmatpush3.msra.mxu1 %v5427_v21  ;;  %4672 = vmatprep.mubr.msk.f32.mxu1 %vm5192_vm0, %v5191_v0 }
 0x87d   :  { %4666 = vmatprep.subr.mxu1 %v5191_v0 }
 0x87e   :  { %4667 = vmatpush3.msra.mxu1 %v5434_v22 }
 0x87f   :  { %4668 = vmatprep.subr.mxu1 %v5191_v0 }
 0x880   :  { %4669 = vmatpush3.msra.mxu1 %v5439_v23 }
 0x881   :  { %4670 = vmatprep.subr.mxu1 %v5191_v0 }
 0x882   :  { %4671 = vmatpush3.msra.mxu1 %v5446_v24 }
 0x883   :  { %4686 = vmatprep.subr.mxu1 %v5191_v0 }
 0x93b   :  { %v1697_v7 = vpop.f32.mrf.mxu1 }
 0x93c   :  { %v1701_v8 = vadd.f32 %v1697_v7, %v1628_v6 }
 0x93d   :  { %v4652_v9 = vpop.f32.mrf.mxu1 }
 0x93e   :  { %4995 = vtanh.f32 %v1701_v8  ;;  %v4241_v11 = vmul.f32 -1.442695, %v1701_v8 }
 0x940   :  { %4997 = vpow2.f32 %v4241_v11 }
 0x94b   :  { %v4996_v10 = vpop.eup %4995 }
 0x94c   :  { %1711 = vrot.lane.b32.xlu0 %v4996_v10, %s5193_s3 }
 0x94d   :  { %v4998_v12 = vpop.eup %4997 }
 0x94e   :  { %v1705_v13 = vadd.f32 1.0, %v4998_v12 }
 0x950   :  { %4999 = vrcp.f32 %v1705_v13 }
 0x95d   :  { %v5000_v14 = vpop.eup %4999 }
 0x95e   :  { %v1709_v17 = vmul.f32 %v5000_v14, %v1615_v1 }
 0x9be   :  { %v1712_v15 = vpop.permute.xlu0 %1711 }
 0x9bf   :  { %v1714_v16 = vmul.f32 %v5000_v14, %v1712_v15 }
 0x9c1   :  { %1716 = vrot.lane.b32.xlu1 %v1714_v16, %s5193_s3  ;;  %v5581_v16 = vld [vmem:[%s5968_s5 + $0x10] sm:$0xff] }
 0xa33   :  { %v1717_v18 = vpop.permute.xlu1 %1716 }
 0xa34   :  { %v1719_v19 = vadd.f32 %v1717_v18, %v1709_v17  ;;  %v5590_v17 = vld [vmem:[%s5968_s5 + $0x8] sm:$0xff]  ;;  %v5597_v18 = vld [vmem:[%s5968_s5] sm:$0xff] }
 0xa36   :  { %5001 = vtanh.f32 %v1719_v19 }
 0xa43   :  { %v5002_v20 = vpop.eup %5001 }
 0xa44   :  { %1722 = vrot.lane.b32.xlu0 %v5002_v20, %s5193_s3  ;;  %v2313_v20 = vld [vmem:[#allocation3 + $0x2] sm:$0x3] }
 0xab6   :  { %v1723_v25 = vpop.permute.xlu0 %1722 }
 0xab7   :  { %v1725_v26 = vmul.f32 %v5000_v14, %v1723_v25  ;;  %v5574_v14 = vld [vmem:[%s5968_s5 + $0x18] sm:$0xff]  ;;  %v2463_v25 = vld [vmem:[#allocation3 + $0x4] sm:$0x3] }
 0xab9   :  { %1727 = vrot.lane.b32.xlu1 %v1725_v26, %s5194_s30 }
 0xb2b   :  { %v1728_v27 = vpop.permute.xlu1 %1727 }
 0xb2c   :  { %1731 = vst.msk [vmem:[#allocation3 + $0x6] sm:$0x3] %vm1418_vm2, %v1728_v27  ;;  %4662 = vmatmul.mubr.msk.f32.vlgmr.msra.gmra.mxu0 %vm1315_vm3, %v1728_v27 }
 0xb2d   :  { %4676 = vmatpush3.msra.mxu0 %v5427_v21  ;;  %4683 = vmatprep.mubr.msk.f32.mxu0 %vm5192_vm0, %v5191_v0 }
 0xb2e   :  { %4677 = vmatprep.subr.mxu0 %v5191_v0 }
 0xb2f   :  { %4678 = vmatpush3.msra.mxu0 %v5434_v22 }
 0xb30   :  { %4679 = vmatprep.subr.mxu0 %v5191_v0 }
 0xb31   :  { %4680 = vmatpush3.msra.mxu0 %v5439_v23 }
 0xb32   :  { %4681 = vmatprep.subr.mxu0 %v5191_v0 }
 0xb33   :  { %4682 = vmatpush3.msra.mxu0 %v5446_v24  ;;  %v2613_v26 = vld [vmem:[#allocation3 + $0x6] sm:$0x3] }
 0xb34   :  { %4697 = vmatprep.subr.mxu0 %v5191_v0 }
 0xbec   :  { %v1801_v29 = vpop.f32.mrf.mxu0 }
 0xbed   :  { %v1805_v30 = vadd.f32 %v1801_v29, %v1732_v28 }
 0xbee   :  { %v4663_v31 = vpop.f32.mrf.mxu0 }
 0xbef   :  { %5003 = vtanh.f32 %v1805_v30  ;;  %v4243_v33 = vmul.f32 -1.442695, %v1805_v30  ;;  %v2044_v30 = vld [vmem:[#allocation2 + $0xe] sm:$0x3] }
 0xbf1   :  { %5005 = vpow2.f32 %v4243_v33 }
 0xbfc   :  { %v5004_v32 = vpop.eup %5003 }
 0xbfd   :  { %1815 = vrot.lane.b32.xlu0 %v5004_v32, %s5193_s3 }
 0xbfe   :  { %v5006_v34 = vpop.eup %5005 }
 0xbff   :  { %v1809_v35 = vadd.f32 1.0, %v5006_v34 }
 0xc01   :  { %5007 = vrcp.f32 %v1809_v35 }
 0xc0e   :  { %v5008_v36 = vpop.eup %5007 }
 0xc0f   :  { %v1813_v39 = vmul.f32 %v5008_v36, %v1719_v19  ;;  %v2157_v19 = vld [vmem:[#allocation3] sm:$0x3] }
 0xc6f   :  { %v1816_v37 = vpop.permute.xlu0 %1815 }
 0xc70   :  { %v1818_v38 = vmul.f32 %v5008_v36, %v1816_v37 }
 0xc72   :  { %1820 = vrot.lane.b32.xlu1 %v1818_v38, %s5193_s3 }
 0xce4   :  { %v1821_v40 = vpop.permute.xlu1 %1820 }
 0xce5   :  { %v1823_v41 = vadd.f32 %v1821_v40, %v1813_v39 }
 0xce7   :  { %5009 = vtanh.f32 %v1823_v41 }
 0xcf4   :  { %v5010_v42 = vpop.eup %5009 }
 0xcf5   :  { %1826 = vrot.lane.b32.xlu0 %v5010_v42, %s5193_s3 }
 0xd67   :  { %v1827_v43 = vpop.permute.xlu0 %1826 }
 0xd68   :  { %v1829_v44 = vmul.f32 %v5008_v36, %v1827_v43 }
 0xd6a   :  { %1831 = vrot.lane.b32.xlu1 %v1829_v44, %s5194_s30 }
 0xddc   :  { %v1832_v45 = vpop.permute.xlu1 %1831 }
 0xddd   :  { %1835 = vst.msk [vmem:[#allocation3 + $0x8] sm:$0x3] %vm1418_vm2, %v1832_v45  ;;  %4673 = vmatmul.mubr.msk.f32.vlgmr.msra.gmra.mxu1 %vm1315_vm3, %v1832_v45 }
 0xdde   :  { %4687 = vmatpush3.msra.mxu1 %v5427_v21  ;;  %4694 = vmatprep.mubr.msk.f32.mxu1 %vm5192_vm0, %v5191_v0 }
 0xddf   :  { %4688 = vmatprep.subr.mxu1 %v5191_v0 }
 0xde0   :  { %4689 = vmatpush3.msra.mxu1 %v5434_v22 }
 0xde1   :  { %4690 = vmatprep.subr.mxu1 %v5191_v0 }
 0xde2   :  { %4691 = vmatpush3.msra.mxu1 %v5439_v23 }
 0xde3   :  { %4692 = vmatprep.subr.mxu1 %v5191_v0 }
 0xde4   :  { %4693 = vmatpush3.msra.mxu1 %v5446_v24  ;;  %v2763_v27 = vld [vmem:[#allocation3 + $0x8] sm:$0x3] }
 0xde5   :  { %4708 = vmatprep.subr.mxu1 %v5191_v0 }
 0xe9d   :  { %v1905_v47 = vpop.f32.mrf.mxu1 }
 0xe9e   :  { %v1909_v21 = vadd.f32 %v1905_v47, %v1836_v46 }
 0xe9f   :  { %v4674_v48 = vpop.f32.mrf.mxu1 }
 0xea0   :  { %5011 = vtanh.f32 %v1909_v21  ;;  %v4245_v50 = vmul.f32 -1.442695, %v1909_v21 }
 0xea2   :  { %5013 = vpow2.f32 %v4245_v50 }
 0xead   :  { %v5012_v49 = vpop.eup %5011 }
 0xeae   :  { %1919 = vrot.lane.b32.xlu0 %v5012_v49, %s5193_s3 }
 0xeaf   :  { %v5014_v22 = vpop.eup %5013 }
 0xeb0   :  { %v1913_v51 = vadd.f32 1.0, %v5014_v22 }
 0xeb2   :  { %5015 = vrcp.f32 %v1913_v51 }
 0xebf   :  { %v5016_v23 = vpop.eup %5015 }
 0xec0   :  { %v1917_v24 = vmul.f32 %v5016_v23, %v1823_v41 }
 0xf20   :  { %v1920_v52 = vpop.permute.xlu0 %1919 }
 0xf21   :  { %v1922_v53 = vmul.f32 %v5016_v23, %v1920_v52 }
 0xf23   :  { %1924 = vrot.lane.b32.xlu1 %v1922_v53, %s5193_s3 }
 0xf95   :  { %v1925_v54 = vpop.permute.xlu1 %1924 }
 0xf96   :  { %v1927_v55 = vadd.f32 %v1925_v54, %v1917_v24 }
 0xf98   :  { %5017 = vtanh.f32 %v1927_v55 }
 0xfa5   :  { %v5018_v56 = vpop.eup %5017 }
 0xfa6   :  { %1930 = vrot.lane.b32.xlu0 %v5018_v56, %s5193_s3  ;;  %v5700_v56 = vld [vmem:[#allocation9 + $0x10] sm:$0xff] }
0x1018   :  { %v1931_v57 = vpop.permute.xlu0 %1930 }
0x1019   :  { %v1933_v58 = vmul.f32 %v5016_v23, %v1931_v57  ;;  %v5704_v57 = vld [vmem:[#allocation9 + $0x8] sm:$0xff] }
0x101b   :  { %1935 = vrot.lane.b32.xlu1 %v1933_v58, %s5194_s30  ;;  %v5708_v58 = vld [vmem:[#allocation9] sm:$0xff] }
0x108d   :  { %v1936_v59 = vpop.permute.xlu1 %1935 }
0x108e   :  { %1939 = vst.msk [vmem:[#allocation3 + $0xa] sm:$0x3] %vm1418_vm2, %v1936_v59  ;;  %4684 = vmatmul.mubr.msk.f32.vlgmr.msra.gmra.mxu0 %vm1315_vm3, %v1936_v59 }
0x108f   :  { %4705 = vmatprep.mubr.msk.f32.mxu0 %vm5192_vm0, %v5191_v0 }
0x1095   :  { %v2913_v28 = vld [vmem:[#allocation3 + $0xa] sm:$0x3] }
0x114e   :  { %v2009_v61 = vpop.f32.mrf.mxu0 }
0x114f   :  { %v2013_v62 = vadd.f32 %v2009_v61, %v1940_v60 }
0x1150   :  { %v4685_v63 = vpop.f32.mrf.mxu0 }
0x1151   :  { %5019 = vtanh.f32 %v2013_v62  ;;  %v4247_v2 = vmul.f32 -1.442695, %v2013_v62 }
0x1153   :  { %5021 = vpow2.f32 %v4247_v2  ;;  %v5726_v2 = vld [vmem:[#allocation8 + $0x30] sm:$0xff] }
0x115e   :  { %v5020_v1 = vpop.eup %5019 }
0x115f   :  { %2023 = vrot.lane.b32.xlu0 %v5020_v1, %s5193_s3  ;;  %v5721_v1 = vld [vmem:[#allocation8 + $0x38] sm:$0xff] }
0x1160   :  { %v5022_v3 = vpop.eup %5021 }
0x1161   :  { %v2017_v4 = vadd.f32 1.0, %v5022_v3  ;;  %v5732_v3 = vld [vmem:[#allocation8 + $0x28] sm:$0xff] }
0x1163   :  { %5023 = vrcp.f32 %v2017_v4 }
0x1170   :  { %v5024_v5 = vpop.eup %5023 }
0x1171   :  { %v2021_v8 = vmul.f32 %v5024_v5, %v1927_v55  ;;  %v5698_v55 = vld [vmem:[#allocation9 + $0x18] sm:$0xff] }
0x1172   :  { %4698 = vmatpush3.msra.mxu0 %v5698_v55 }
0x1173   :  { %4699 = vmatprep.subr.mxu0 %v5191_v0 }
0x1174   :  { %4700 = vmatpush3.msra.mxu0 %v5700_v56 }
0x1175   :  { %4701 = vmatprep.subr.mxu0 %v5191_v0 }
0x1176   :  { %4702 = vmatpush3.msra.mxu0 %v5704_v57 }
0x1177   :  { %4703 = vmatprep.subr.mxu0 %v5191_v0 }
0x1178   :  { %4704 = vmatpush3.msra.mxu0 %v5708_v58 }
0x1179   :  { %4719 = vmatprep.subr.mxu0 %v5191_v0 }
0x11d1   :  { %v2024_v6 = vpop.permute.xlu0 %2023 }
0x11d2   :  { %v2026_v7 = vmul.f32 %v5024_v5, %v2024_v6  ;;  %v2464_v6 = vld [vmem:[#allocation3 + $0xa] sm:$0x3] }
0x11d4   :  { %2028 = vrot.lane.b32.xlu1 %v2026_v7, %s5193_s3  ;;  %v2614_v7 = vld [vmem:[#allocation3 + $0x8] sm:$0x3] }
0x1246   :  { %v2029_v9 = vpop.permute.xlu1 %2028 }
0x1247   :  { %v5566_v10 = vadd.f32 %v2029_v9, %v2021_v8  ;;  %v2764_v8 = vld [vmem:[#allocation3 + $0x6] sm:$0x3]  ;;  %v2914_v9 = vld [vmem:[#allocation3 + $0x4] sm:$0x3] }
0x1249   :  { %5025 = vtanh.f32 %v5566_v10 }
0x1256   :  { %v5026_v11 = vpop.eup %5025 }
0x1257   :  { %2034 = vrot.lane.b32.xlu0 %v5026_v11, %s5193_s3  ;;  %v3214_v11 = vld [vmem:[#allocation3] sm:$0x3] }
0x12c9   :  { %v2035_v12 = vpop.permute.xlu0 %2034 }
0x12ca   :  { %v2037_v13 = vmul.f32 %v5024_v5, %v2035_v12  ;;  %v5744_v5 = vld [vmem:[#allocation8 + $0x20] sm:$0xff] }
0x12cb   :  { %v4252_v12 = vld [vmem:[%s5970_s7] ss:$0 sm:$0xff] }
0x12cc   :  { %2039 = vrot.lane.b32.xlu1 %v2037_v13, %s5194_s30 }
0x133e   :  { %v2040_v15 = vpop.permute.xlu1 %2039 }
0x133f   :  { %2043 = vst.msk [vmem:[#allocation3 + $0xc] sm:$0x3] %vm1418_vm2, %v2040_v15  ;;  %4695 = vmatmul.mubr.msk.f32.vlgmr.msra.gmra.mxu1 %vm1315_vm3, %v2040_v15 }
0x1340   :  { %4709 = vmatpush3.msra.mxu1 %v5574_v14  ;;  %4716 = vmatprep.mubr.msk.f32.mxu1 %vm5192_vm0, %v5191_v0 }
0x1341   :  { %4710 = vmatprep.subr.mxu1 %v5191_v0 }
0x1342   :  { %4711 = vmatpush3.msra.mxu1 %v5581_v16 }
0x1343   :  { %4712 = vmatprep.subr.mxu1 %v5191_v0 }
0x1344   :  { %4713 = vmatpush3.msra.mxu1 %v5590_v17 }
0x1345   :  { %4714 = vmatprep.subr.mxu1 %v5191_v0 }
0x1346   :  { %4715 = vmatpush3.msra.mxu1 %v5597_v18  ;;  %v3063_v29 = vld [vmem:[#allocation3 + $0xc] sm:$0x3] }
0x1347   :  { %4717 = vmatmul.mubr.msk.f32.vlgmr.msra.gmra.mxu1 %vm1315_vm3, %v2157_v19  ;;  %4730 = vmatprep.subr.mxu1 %v5191_v0  ;;  %v2314_v4 = vld [vmem:[#allocation3 + $0xc] sm:$0x3] }
0x1348   :  { %4731 = vmatpush3.msra.mxu1 %v5574_v14  ;;  %4738 = vmatprep.mubr.msk.f32.mxu1 %vm5192_vm0, %v5191_v0 }
0x1349   :  { %4732 = vmatprep.subr.mxu1 %v5191_v0 }
0x134a   :  { %4733 = vmatpush3.msra.mxu1 %v5581_v16 }
0x134b   :  { %4734 = vmatprep.subr.mxu1 %v5191_v0 }
0x134c   :  { %4735 = vmatpush3.msra.mxu1 %v5590_v17 }
0x134d   :  { %4736 = vmatprep.subr.mxu1 %v5191_v0 }
0x134e   :  { %4737 = vmatpush3.msra.mxu1 %v5597_v18 }
0x134f   :  { %4739 = vmatmul.mubr.msk.f32.vlgmr.msra.gmra.mxu1 %vm1315_vm3, %v2313_v20  ;;  %4752 = vmatprep.subr.mxu1 %v5191_v0 }
0x1350   :  { %4753 = vmatpush3.msra.mxu1 %v5574_v14  ;;  %4760 = vmatprep.mubr.msk.f32.mxu1 %vm5192_vm0, %v5191_v0 }
0x1351   :  { %4754 = vmatprep.subr.mxu1 %v5191_v0 }
0x1352   :  { %4755 = vmatpush3.msra.mxu1 %v5581_v16 }
0x1353   :  { %4756 = vmatprep.subr.mxu1 %v5191_v0 }
0x1354   :  { %4757 = vmatpush3.msra.mxu1 %v5590_v17 }
0x1355   :  { %4758 = vmatprep.subr.mxu1 %v5191_v0 }
0x1356   :  { %4759 = vmatpush3.msra.mxu1 %v5597_v18 }
0x1357   :  { %4761 = vmatmul.mubr.msk.f32.vlgmr.msra.gmra.mxu1 %vm1315_vm3, %v2463_v25  ;;  %4774 = vmatprep.subr.mxu1 %v5191_v0 }
0x1358   :  { %4775 = vmatpush3.msra.mxu1 %v5574_v14  ;;  %4782 = vmatprep.mubr.msk.f32.mxu1 %vm5192_vm0, %v5191_v0 }
0x1359   :  { %4776 = vmatprep.subr.mxu1 %v5191_v0 }
0x135a   :  { %4777 = vmatpush3.msra.mxu1 %v5581_v16 }
0x135b   :  { %4778 = vmatprep.subr.mxu1 %v5191_v0 }
0x135c   :  { %4779 = vmatpush3.msra.mxu1 %v5590_v17 }
0x135d   :  { %4780 = vmatprep.subr.mxu1 %v5191_v0 }
0x135e   :  { %4781 = vmatpush3.msra.mxu1 %v5597_v18 }
0x135f   :  { %4783 = vmatmul.mubr.msk.f32.vlgmr.msra.gmra.mxu1 %vm1315_vm3, %v2613_v26  ;;  %4796 = vmatprep.subr.mxu1 %v5191_v0 }
0x1360   :  { %4797 = vmatpush3.msra.mxu1 %v5574_v14  ;;  %4804 = vmatprep.mubr.msk.f32.mxu1 %vm5192_vm0, %v5191_v0 }
0x1361   :  { %4798 = vmatprep.subr.mxu1 %v5191_v0 }
0x1362   :  { %4799 = vmatpush3.msra.mxu1 %v5581_v16 }
0x1363   :  { %4800 = vmatprep.subr.mxu1 %v5191_v0 }
0x1364   :  { %4801 = vmatpush3.msra.mxu1 %v5590_v17 }
0x1365   :  { %4802 = vmatprep.subr.mxu1 %v5191_v0 }
0x1366   :  { %4803 = vmatpush3.msra.mxu1 %v5597_v18 }
0x1367   :  { %4805 = vmatmul.mubr.msk.f32.vlgmr.msra.gmra.mxu1 %vm1315_vm3, %v2763_v27  ;;  %4818 = vmatprep.subr.mxu1 %v5191_v0 }
0x1368   :  { %4819 = vmatpush3.msra.mxu1 %v5574_v14  ;;  %4826 = vmatprep.mubr.msk.f32.mxu1 %vm5192_vm0, %v5191_v0 }
0x1369   :  { %4820 = vmatprep.subr.mxu1 %v5191_v0 }
0x136a   :  { %4821 = vmatpush3.msra.mxu1 %v5581_v16 }
0x136b   :  { %4822 = vmatprep.subr.mxu1 %v5191_v0 }
0x136c   :  { %4823 = vmatpush3.msra.mxu1 %v5590_v17 }
0x136d   :  { %4824 = vmatprep.subr.mxu1 %v5191_v0 }
0x136e   :  { %4825 = vmatpush3.msra.mxu1 %v5597_v18 }
0x136f   :  { %4827 = vmatmul.mubr.msk.f32.vlgmr.msra.gmra.mxu1 %vm1315_vm3, %v2913_v28  ;;  %4840 = vmatprep.subr.mxu1 %v5191_v0 }
0x1370   :  { %4841 = vmatpush3.msra.mxu1 %v5574_v14  ;;  %4848 = vmatprep.mubr.msk.f32.mxu1 %vm5192_vm0, %v5191_v0 }
0x1371   :  { %4842 = vmatprep.subr.mxu1 %v5191_v0 }
0x1372   :  { %4843 = vmatpush3.msra.mxu1 %v5581_v16 }
0x1373   :  { %4844 = vmatprep.subr.mxu1 %v5191_v0 }
0x1374   :  { %4845 = vmatpush3.msra.mxu1 %v5590_v17 }
0x1375   :  { %4846 = vmatprep.subr.mxu1 %v5191_v0 }
0x1376   :  { %4847 = vmatpush3.msra.mxu1 %v5597_v18 }
0x1377   :  { %4849 = vmatmul.mubr.msk.f32.vlgmr.msra.gmra.mxu1 %vm1315_vm3, %v3063_v29  ;;  %4862 = vmatprep.subr.mxu1 %v5191_v0 }
0x1378   :  { %4863 = vmatpush3.msra.mxu1 %v5574_v14  ;;  %4870 = vmatprep.mubr.msk.f32.mxu1 %vm5192_vm0, %v5191_v0 }
0x1379   :  { %4864 = vmatprep.subr.mxu1 %v5191_v0 }
0x137a   :  { %4865 = vmatpush3.msra.mxu1 %v5581_v16 }
0x137b   :  { %4866 = vmatprep.subr.mxu1 %v5191_v0 }
0x137c   :  { %4867 = vmatpush3.msra.mxu1 %v5590_v17 }
0x137d   :  { %4868 = vmatprep.subr.mxu1 %v5191_v0 }
0x137e   :  { %4869 = vmatpush3.msra.mxu1 %v5597_v18 }
0x137f   :  { %4884 = vmatprep.subr.mxu1 %v5191_v0 }
0x13ff   :  { %v2113_v31 = vpop.f32.mrf.mxu1 }
0x1400   :  { %v2117_v32 = vadd.f32 %v2113_v31, %v2044_v30 }
0x1401   :  { %v4696_v33 = vpop.f32.mrf.mxu1 }
0x1402   :  { %5027 = vtanh.f32 %v2117_v32  ;;  %v4249_v48 = vmul.f32 -1.442695, %v2117_v32 }
0x1404   :  { %5029 = vpow2.f32 %v4249_v48 }
0x1407   :  { %v5680_v34 = vpop.f32.mrf.mxu1 }
0x1409   :  { %v4718_v35 = vpop.f32.mrf.mxu1 }
0x140f   :  { %v5028_v36 = vpop.eup %5027  ;;  %v5682_v37 = vpop.f32.mrf.mxu1 }
0x1410   :  { %2127 = vrot.lane.b32.xlu0 %v5028_v36, %s5193_s3 }
0x1411   :  { %v4740_v38 = vpop.f32.mrf.mxu1  ;;  %v5030_v49 = vpop.eup %5029 }
0x1412   :  { %v2121_v50 = vadd.f32 1.0, %v5030_v49 }
0x1414   :  { %5031 = vrcp.f32 %v2121_v50 }
0x1417   :  { %v5685_v39 = vpop.f32.mrf.mxu1 }
0x1419   :  { %v4762_v40 = vpop.f32.mrf.mxu1 }
0x141f   :  { %v5687_v41 = vpop.f32.mrf.mxu1 }
0x1421   :  { %v4784_v42 = vpop.f32.mrf.mxu1  ;;  %v5032_v22 = vpop.eup %5031 }
0x1422   :  { %v2125_v52 = vmul.f32 %v5032_v22, %v5566_v10  ;;  %v3064_v10 = vld [vmem:[#allocation3 + $0x2] sm:$0x3] }
0x1427   :  { %v5689_v43 = vpop.f32.mrf.mxu1 }
0x1429   :  { %v4806_v44 = vpop.f32.mrf.mxu1 }
0x142f   :  { %v5691_v45 = vpop.f32.mrf.mxu1 }
0x1431   :  { %v4828_v46 = vpop.f32.mrf.mxu1 }
0x1437   :  { %v5693_v47 = vpop.f32.mrf.mxu1 }
0x1439   :  { %v4850_v21 = vpop.f32.mrf.mxu1 }
0x1482   :  { %v2128_v51 = vpop.permute.xlu0 %2127 }
0x1483   :  { %v2130_v23 = vmul.f32 %v5032_v22, %v2128_v51 }
0x1485   :  { %2132 = vrot.lane.b32.xlu1 %v2130_v23, %s5193_s3 }
0x14f7   :  { %v2133_v53 = vpop.permute.xlu1 %2132 }
0x14f8   :  { %v2135_v24 = vadd.f32 %v2133_v53, %v2125_v52 }
0x14fa   :  { %5033 = vtanh.f32 %v2135_v24 }
0x1507   :  { %v5034_v54 = vpop.eup %5033 }
0x1508   :  { %2138 = vrot.lane.b32.xlu0 %v5034_v54, %s5193_s3 }
0x157a   :  { %v2139_v59 = vpop.permute.xlu0 %2138 }
0x157b   :  { %v2141_v60 = vmul.f32 %v5032_v22, %v2139_v59 }
0x157d   :  { %2143 = vrot.lane.b32.xlu1 %v2141_v60, %s5194_s30 }
0x15ef   :  { %v2144_v61 = vpop.permute.xlu1 %2143 }
0x15f0   :  { %2147 = vst.msk [vmem:[#allocation3 + $0xe] sm:$0x3] %vm1418_vm2, %v2144_v61 }
0x15f7   :  { %v2158_v62 = vld [vmem:[#allocation3 + $0xe] sm:$0x3] }
0x15f8   :  { %v3213_v63 = vld [vmem:[#allocation3 + $0xe] sm:$0x3]  ;;  %4706 = vmatmul.mubr.msk.f32.vlgmr.msra.gmra.mxu0 %vm1315_vm3, %v2158_v62 }
0x15f9   :  { %4871 = vmatmul.mubr.msk.f32.vlgmr.msra.gmra.mxu1 %vm1315_vm3, %v3213_v63  ;;  %4720 = vmatpush3.msra.mxu0 %v5698_v55 }
0x15fa   :  { %4727 = vmatprep.mubr.msk.f32.mxu0 %vm5192_vm0, %v5191_v0  ;;  %4721 = vmatprep.subr.mxu0 %v5191_v0 }
0x15fb   :  { %4885 = vmatpush3.msra.mxu1 %v5721_v1  ;;  %4722 = vmatpush3.msra.mxu0 %v5700_v56 }
0x15fc   :  { %4886 = vmatprep.subr.mxu1 %v5191_v0  ;;  %4723 = vmatprep.subr.mxu0 %v5191_v0 }
0x15fd   :  { %4887 = vmatpush3.msra.mxu1 %v5726_v2  ;;  %4724 = vmatpush3.msra.mxu0 %v5704_v57 }
0x15fe   :  { %4888 = vmatprep.subr.mxu1 %v5191_v0  ;;  %4725 = vmatprep.subr.mxu0 %v5191_v0 }
0x15ff   :  { %4889 = vmatpush3.msra.mxu1 %v5732_v3  ;;  %4726 = vmatpush3.msra.mxu0 %v5708_v58 }
0x1600   :  { %4890 = vmatprep.subr.mxu1 %v5191_v0  ;;  %4728 = vmatmul.mubr.msk.f32.vlgmr.msra.gmra.mxu0 %vm1315_vm3, %v2314_v4 }
0x1601   :  { %4741 = vmatprep.subr.mxu0 %v5191_v0  ;;  %4749 = vmatprep.mubr.msk.f32.mxu0 %vm5192_vm0, %v5191_v0 }
0x1602   :  { %4742 = vmatpush3.msra.mxu0 %v5698_v55  ;;  %4891 = vmatpush3.msra.mxu1 %v5744_v5 }
0x1603   :  { %4743 = vmatprep.subr.mxu0 %v5191_v0  ;;  %4892 = vmatprep.mubr.msk.f32.mxu1 %vm5192_vm0, %v5191_v0 }
0x1604   :  { %4744 = vmatpush3.msra.mxu0 %v5700_v56  ;;  %4906 = vmatprep.subr.mxu1 %v5191_v0 }
0x1605   :  { %4745 = vmatprep.subr.mxu0 %v5191_v0 }
0x1606   :  { %4746 = vmatpush3.msra.mxu0 %v5704_v57 }
0x1607   :  { %4747 = vmatprep.subr.mxu0 %v5191_v0 }
0x1608   :  { %4748 = vmatpush3.msra.mxu0 %v5708_v58 }
0x1609   :  { %4750 = vmatmul.mubr.msk.f32.vlgmr.msra.gmra.mxu0 %vm1315_vm3, %v2464_v6  ;;  %4763 = vmatprep.subr.mxu0 %v5191_v0 }
0x160a   :  { %4764 = vmatpush3.msra.mxu0 %v5698_v55  ;;  %4771 = vmatprep.mubr.msk.f32.mxu0 %vm5192_vm0, %v5191_v0 }
0x160b   :  { %4765 = vmatprep.subr.mxu0 %v5191_v0 }
0x160c   :  { %4766 = vmatpush3.msra.mxu0 %v5700_v56 }
0x160d   :  { %4767 = vmatprep.subr.mxu0 %v5191_v0 }
0x160e   :  { %4768 = vmatpush3.msra.mxu0 %v5704_v57 }
0x160f   :  { %4769 = vmatprep.subr.mxu0 %v5191_v0 }
0x1610   :  { %4770 = vmatpush3.msra.mxu0 %v5708_v58 }
0x1611   :  { %4772 = vmatmul.mubr.msk.f32.vlgmr.msra.gmra.mxu0 %vm1315_vm3, %v2614_v7  ;;  %4785 = vmatprep.subr.mxu0 %v5191_v0 }
0x1612   :  { %4786 = vmatpush3.msra.mxu0 %v5698_v55  ;;  %4793 = vmatprep.mubr.msk.f32.mxu0 %vm5192_vm0, %v5191_v0 }
0x1613   :  { %4787 = vmatprep.subr.mxu0 %v5191_v0 }
0x1614   :  { %4788 = vmatpush3.msra.mxu0 %v5700_v56 }
0x1615   :  { %4789 = vmatprep.subr.mxu0 %v5191_v0 }
0x1616   :  { %4790 = vmatpush3.msra.mxu0 %v5704_v57 }
0x1617   :  { %4791 = vmatprep.subr.mxu0 %v5191_v0 }
0x1618   :  { %4792 = vmatpush3.msra.mxu0 %v5708_v58 }
0x1619   :  { %4794 = vmatmul.mubr.msk.f32.vlgmr.msra.gmra.mxu0 %vm1315_vm3, %v2764_v8  ;;  %4807 = vmatprep.subr.mxu0 %v5191_v0 }
0x161a   :  { %4808 = vmatpush3.msra.mxu0 %v5698_v55  ;;  %4815 = vmatprep.mubr.msk.f32.mxu0 %vm5192_vm0, %v5191_v0 }
0x161b   :  { %4809 = vmatprep.subr.mxu0 %v5191_v0 }
0x161c   :  { %4810 = vmatpush3.msra.mxu0 %v5700_v56 }
0x161d   :  { %4811 = vmatprep.subr.mxu0 %v5191_v0 }
0x161e   :  { %4812 = vmatpush3.msra.mxu0 %v5704_v57 }
0x161f   :  { %4813 = vmatprep.subr.mxu0 %v5191_v0 }
0x1620   :  { %4814 = vmatpush3.msra.mxu0 %v5708_v58 }
0x1621   :  { %4816 = vmatmul.mubr.msk.f32.vlgmr.msra.gmra.mxu0 %vm1315_vm3, %v2914_v9  ;;  %4829 = vmatprep.subr.mxu0 %v5191_v0 }
0x1622   :  { %4830 = vmatpush3.msra.mxu0 %v5698_v55  ;;  %4837 = vmatprep.mubr.msk.f32.mxu0 %vm5192_vm0, %v5191_v0 }
0x1623   :  { %4831 = vmatprep.subr.mxu0 %v5191_v0 }
0x1624   :  { %4832 = vmatpush3.msra.mxu0 %v5700_v56 }
0x1625   :  { %4833 = vmatprep.subr.mxu0 %v5191_v0 }
0x1626   :  { %4834 = vmatpush3.msra.mxu0 %v5704_v57 }
0x1627   :  { %4835 = vmatprep.subr.mxu0 %v5191_v0 }
0x1628   :  { %4836 = vmatpush3.msra.mxu0 %v5708_v58 }
0x1629   :  { %4838 = vmatmul.mubr.msk.f32.vlgmr.msra.gmra.mxu0 %vm1315_vm3, %v3064_v10  ;;  %4851 = vmatprep.subr.mxu0 %v5191_v0 }
0x162a   :  { %4852 = vmatpush3.msra.mxu0 %v5698_v55  ;;  %4859 = vmatprep.mubr.msk.f32.mxu0 %vm5192_vm0, %v5191_v0 }
0x162b   :  { %4853 = vmatprep.subr.mxu0 %v5191_v0 }
0x162c   :  { %4854 = vmatpush3.msra.mxu0 %v5700_v56 }
0x162d   :  { %4855 = vmatprep.subr.mxu0 %v5191_v0 }
0x162e   :  { %4856 = vmatpush3.msra.mxu0 %v5704_v57 }
0x162f   :  { %4857 = vmatprep.subr.mxu0 %v5191_v0 }
0x1630   :  { %4858 = vmatpush3.msra.mxu0 %v5708_v58 }
0x1631   :  { %4860 = vmatmul.mubr.msk.f32.vlgmr.msra.gmra.mxu0 %vm1315_vm3, %v3214_v11  ;;  %4873 = vmatprep.subr.mxu0 %v5191_v0 }
0x1632   :  { %4874 = vmatpush3.msra.mxu0 %v5721_v1  ;;  %4881 = vmatprep.mubr.msk.f32.mxu0 %vm5192_vm0, %v5191_v0 }
0x1633   :  { %4875 = vmatprep.subr.mxu0 %v5191_v0 }
0x1634   :  { %4876 = vmatpush3.msra.mxu0 %v5726_v2 }
0x1635   :  { %4877 = vmatprep.subr.mxu0 %v5191_v0 }
0x1636   :  { %4878 = vmatpush3.msra.mxu0 %v5732_v3 }
0x1637   :  { %4879 = vmatprep.subr.mxu0 %v5191_v0 }
0x1638   :  { %4880 = vmatpush3.msra.mxu0 %v5744_v5 }
0x1639   :  { %4882 = vmatmul.mubr.f32.vlgmr.msra.gmra.mxu0 %v5191_v0  ;;  %4895 = vmatprep.subr.mxu0 %v5191_v0 }
0x163a   :  { %4896 = vmatpush3.msra.mxu0 %v5721_v1  ;;  %4903 = vmatprep.mubr.msk.f32.mxu0 %vm5192_vm0, %v5191_v0 }
0x163b   :  { %4897 = vmatprep.subr.mxu0 %v5191_v0 }
0x163c   :  { %4898 = vmatpush3.msra.mxu0 %v5726_v2 }
0x163d   :  { %4899 = vmatprep.subr.mxu0 %v5191_v0 }
0x163e   :  { %4900 = vmatpush3.msra.mxu0 %v5732_v3 }
0x163f   :  { %4901 = vmatprep.subr.mxu0 %v5191_v0 }
0x1640   :  { %4902 = vmatpush3.msra.mxu0 %v5744_v5 }
0x1641   :  { %4917 = vmatprep.subr.mxu0 %v5191_v0 }
0x16b8   :  { %v2228_v13 = vpop.f32.mrf.mxu0 }
0x16b9   :  { %v3357_v14 = vpop.f32.mrf.mxu1  ;;  %v2302_v15 = vadd.f32 %v5680_v34, %v2228_v13 }
0x16ba   :  { %v4707_v16 = vpop.f32.mrf.mxu0 }
0x16bb   :  { %v4872_v17 = vpop.f32.mrf.mxu1  ;;  %v2311_v18 = vadd.f32 %v4252_v12, %v2302_v15 }
0x16bd   :  { %2312 = vst [vmem:[#allocation2] sm:$0x3] %v2311_v18 }
0x16c0   :  { %v2384_v19 = vpop.f32.mrf.mxu0 }
0x16c1   :  { %v2458_v20 = vadd.f32 %v5682_v37, %v2384_v19 }
0x16c2   :  { %v4729_v25 = vpop.f32.mrf.mxu0 }
0x16c3   :  { %v2461_v26 = vadd.f32 %v4252_v12, %v2458_v20 }
0x16c5   :  { %2462 = vst [vmem:[#allocation2 + $0x2] sm:$0x3] %v2461_v26 }
0x16c9   :  { %v2534_v27 = vpop.f32.mrf.mxu0 }
0x16ca   :  { %v2608_v28 = vadd.f32 %v5685_v39, %v2534_v27 }
0x16cb   :  { %v4751_v29 = vpop.f32.mrf.mxu0 }
0x16cc   :  { %v2611_v30 = vadd.f32 %v4252_v12, %v2608_v28  ;;  %v3469_v6 = vld [vmem:[#allocation2 + $0x2] sm:$0x3] }
0x16ce   :  { %2612 = vst [vmem:[#allocation2 + $0x4] sm:$0x3] %v2611_v30 }
0x16d1   :  { %v2684_v31 = vpop.f32.mrf.mxu0 }
0x16d2   :  { %v2758_v32 = vadd.f32 %v5687_v41, %v2684_v31 }
0x16d3   :  { %v4773_v33 = vpop.f32.mrf.mxu0 }
0x16d4   :  { %v2761_v34 = vadd.f32 %v4252_v12, %v2758_v32 }
0x16d5   :  { %v3573_v28 = vld [vmem:[#allocation2 + $0x4] sm:$0x3] }
0x16d6   :  { %2762 = vst [vmem:[#allocation2 + $0x6] sm:$0x3] %v2761_v34 }
0x16d9   :  { %v2834_v35 = vpop.f32.mrf.mxu0 }
0x16da   :  { %v2908_v36 = vadd.f32 %v5689_v43, %v2834_v35  ;;  %v3368_v43 = vld [vmem:[#allocation2] sm:$0x3] }
0x16db   :  { %v4795_v38 = vpop.f32.mrf.mxu0 }
0x16dc   :  { %v2911_v37 = vadd.f32 %v4252_v12, %v2908_v36 }
0x16de   :  { %2912 = vst [vmem:[#allocation2 + $0x8] sm:$0x3] %v2911_v37 }
0x16e1   :  { %v2984_v40 = vpop.f32.mrf.mxu0 }
0x16e2   :  { %v3058_v42 = vadd.f32 %v5691_v45, %v2984_v40 }
0x16e3   :  { %v4817_v44 = vpop.f32.mrf.mxu0 }
0x16e4   :  { %v3061_v39 = vadd.f32 %v4252_v12, %v3058_v42 }
0x16e6   :  { %3062 = vst [vmem:[#allocation2 + $0xa] sm:$0x3] %v3061_v39 }
0x16e9   :  { %v3134_v46 = vpop.f32.mrf.mxu0 }
0x16ea   :  { %v3208_v21 = vadd.f32 %v5693_v47, %v3134_v46 }
0x16eb   :  { %v4839_v48 = vpop.f32.mrf.mxu0 }
0x16ec   :  { %v3211_v41 = vadd.f32 %v4252_v12, %v3208_v21 }
0x16ee   :  { %3212 = vst [vmem:[#allocation2 + $0xc] sm:$0x3] %v3211_v41  ;;  %v3677_v41 = vld [vmem:[#allocation2 + $0x6] sm:$0x3] }
0x16f1   :  { %v3284_v49 = vpop.f32.mrf.mxu0 }
0x16f2   :  { %v3358_v50 = vadd.f32 %v3357_v14, %v3284_v49 }
0x16f3   :  { %v4861_v22 = vpop.f32.mrf.mxu0 }
0x16f4   :  { %v3361_v51 = vadd.f32 %v4252_v12, %v3358_v50 }
0x16f6   :  { %3362 = vst [vmem:[#allocation2 + $0xe] sm:$0x3] %v3361_v51 }
0x16f9   :  { %v3435_v23 = vpop.f32.mrf.mxu0 }
0x16fa   :  { %v3439_v52 = vadd.f32 %v3435_v23, %v3368_v43 }
0x16fb   :  { %v4883_v53 = vpop.f32.mrf.mxu0 }
0x16fc   :  { %5035 = vtanh.f32 %v3439_v52  ;;  %v4267_v24 = vmul.f32 -1.442695, %v3439_v52 }
0x16fe   :  { %5037 = vpow2.f32 %v4267_v24 }
0x1709   :  { %v5036_v45 = vpop.eup %5035 }
0x170a   :  { %3449 = vrot.lane.b32.xlu0 %v5036_v45, %s5193_s3 }
0x170b   :  { %v5038_v54 = vpop.eup %5037 }
0x170c   :  { %v3443_v47 = vadd.f32 1.0, %v5038_v54 }
0x170e   :  { %5039 = vrcp.f32 %v3443_v47 }
0x171b   :  { %v5040_v55 = vpop.eup %5039 }
0x171c   :  { %v3447_v58 = vmul.f32 0.0, %v5040_v55 }
0x177c   :  { %v3450_v56 = vpop.permute.xlu0 %3449 }
0x177d   :  { %v3452_v57 = vmul.f32 %v5040_v55, %v3450_v56 }
0x177f   :  { %3454 = vrot.lane.b32.xlu1 %v3452_v57, %s5193_s3 }
0x17f1   :  { %v3455_v59 = vpop.permute.xlu1 %3454 }
0x17f2   :  { %v3457_v60 = vadd.f32 %v3455_v59, %v3447_v58 }
0x17f4   :  { %5041 = vtanh.f32 %v3457_v60 }
0x1801   :  { %v5042_v61 = vpop.eup %5041 }
0x1802   :  { %3460 = vrot.lane.b32.xlu0 %v5042_v61, %s5193_s3 }
0x1874   :  { %v3461_v62 = vpop.permute.xlu0 %3460 }
0x1875   :  { %v3463_v63 = vmul.f32 %v5040_v55, %v3461_v62 }
0x1877   :  { %3465 = vrot.lane.b32.xlu1 %v3463_v63, %s5194_s30 }
0x18e9   :  { %v3466_v4 = vpop.permute.xlu1 %3465 }
0x18ea   :  { %3468 = vst.msk [vmem:[%s5971_s8] sm:$0x3] %vm1418_vm2, %v3466_v4  ;;  %4893 = vmatmul.mubr.msk.f32.vlgmr.msra.gmra.mxu1 %vm1315_vm3, %v3466_v4 }
0x18eb   :  { %4907 = vmatpush3.msra.mxu1 %v5721_v1  ;;  %4914 = vmatprep.mubr.msk.f32.mxu1 %vm5192_vm0, %v5191_v0 }
0x18ec   :  { %4908 = vmatprep.subr.mxu1 %v5191_v0 }
0x18ed   :  { %4909 = vmatpush3.msra.mxu1 %v5726_v2 }
0x18ee   :  { %4910 = vmatprep.subr.mxu1 %v5191_v0 }
0x18ef   :  { %4911 = vmatpush3.msra.mxu1 %v5732_v3 }
0x18f0   :  { %4912 = vmatprep.subr.mxu1 %v5191_v0 }
0x18f1   :  { %4913 = vmatpush3.msra.mxu1 %v5744_v5 }
0x18f2   :  { %4928 = vmatprep.subr.mxu1 %v5191_v0 }
0x19aa   :  { %v3538_v7 = vpop.f32.mrf.mxu1 }
0x19ab   :  { %v3542_v8 = vadd.f32 %v3538_v7, %v3469_v6 }
0x19ac   :  { %v4894_v9 = vpop.f32.mrf.mxu1 }
0x19ad   :  { %5043 = vtanh.f32 %v3542_v8  ;;  %v4269_v11 = vmul.f32 -1.442695, %v3542_v8 }
0x19af   :  { %5045 = vpow2.f32 %v4269_v11 }
0x19ba   :  { %v5044_v10 = vpop.eup %5043 }
0x19bb   :  { %3552 = vrot.lane.b32.xlu0 %v5044_v10, %s5193_s3 }
0x19bc   :  { %v5046_v12 = vpop.eup %5045 }
0x19bd   :  { %v3546_v13 = vadd.f32 1.0, %v5046_v12 }
0x19bf   :  { %5047 = vrcp.f32 %v3546_v13 }
0x19cc   :  { %v5048_v14 = vpop.eup %5047 }
0x19cd   :  { %v3550_v17 = vmul.f32 %v5048_v14, %v3457_v60  ;;  %v3781_v60 = vld [vmem:[#allocation2 + $0x8] sm:$0x3] }
0x1a2d   :  { %v3553_v15 = vpop.permute.xlu0 %3552 }
0x1a2e   :  { %v3555_v16 = vmul.f32 %v5048_v14, %v3553_v15 }
0x1a30   :  { %3557 = vrot.lane.b32.xlu1 %v3555_v16, %s5193_s3 }
0x1aa2   :  { %v3558_v18 = vpop.permute.xlu1 %3557 }
0x1aa3   :  { %v3560_v19 = vadd.f32 %v3558_v18, %v3550_v17 }
0x1aa5   :  { %5049 = vtanh.f32 %v3560_v19 }
0x1ab2   :  { %v5050_v20 = vpop.eup %5049 }
0x1ab3   :  { %3563 = vrot.lane.b32.xlu0 %v5050_v20, %s5193_s3 }
0x1b25   :  { %v3564_v25 = vpop.permute.xlu0 %3563 }
0x1b26   :  { %v3566_v26 = vmul.f32 %v5048_v14, %v3564_v25 }
0x1b28   :  { %3568 = vrot.lane.b32.xlu1 %v3566_v26, %s5194_s30 }
0x1b9a   :  { %v3569_v27 = vpop.permute.xlu1 %3568 }
0x1b9b   :  { %4270 = vst.msk [vmem:[%s5971_s8 + $0x2] sm:$0x3] %vm1418_vm2, %v3569_v27  ;;  %4904 = vmatmul.mubr.msk.f32.vlgmr.msra.gmra.mxu0 %vm1315_vm3, %v3569_v27 }
0x1b9c   :  { %4918 = vmatpush3.msra.mxu0 %v5721_v1  ;;  %4925 = vmatprep.mubr.msk.f32.mxu0 %vm5192_vm0, %v5191_v0 }
0x1b9d   :  { %4919 = vmatprep.subr.mxu0 %v5191_v0 }
0x1b9e   :  { %4920 = vmatpush3.msra.mxu0 %v5726_v2 }
0x1b9f   :  { %4921 = vmatprep.subr.mxu0 %v5191_v0 }
0x1ba0   :  { %4922 = vmatpush3.msra.mxu0 %v5732_v3 }
0x1ba1   :  { %4923 = vmatprep.subr.mxu0 %v5191_v0 }
0x1ba2   :  { %4924 = vmatpush3.msra.mxu0 %v5744_v5 }
0x1ba3   :  { %4939 = vmatprep.subr.mxu0 %v5191_v0 }
0x1c5b   :  { %v3642_v29 = vpop.f32.mrf.mxu0 }
0x1c5c   :  { %v3646_v30 = vadd.f32 %v3642_v29, %v3573_v28 }
0x1c5d   :  { %v4905_v31 = vpop.f32.mrf.mxu0 }
0x1c5e   :  { %5051 = vtanh.f32 %v3646_v30  ;;  %v4272_v33 = vmul.f32 -1.442695, %v3646_v30 }
0x1c60   :  { %5053 = vpow2.f32 %v4272_v33 }
0x1c6b   :  { %v5052_v32 = vpop.eup %5051 }
0x1c6c   :  { %3656 = vrot.lane.b32.xlu0 %v5052_v32, %s5193_s3 }
0x1c6d   :  { %v5054_v34 = vpop.eup %5053 }
0x1c6e   :  { %v3650_v35 = vadd.f32 1.0, %v5054_v34 }
0x1c70   :  { %5055 = vrcp.f32 %v3650_v35 }
0x1c7d   :  { %v5056_v36 = vpop.eup %5055 }
0x1c7e   :  { %v3654_v40 = vmul.f32 %v5056_v36, %v3560_v19  ;;  %v3885_v19 = vld [vmem:[#allocation2 + $0xa] sm:$0x3] }
0x1cde   :  { %v3657_v38 = vpop.permute.xlu0 %3656 }
0x1cdf   :  { %v3659_v37 = vmul.f32 %v5056_v36, %v3657_v38 }
0x1ce1   :  { %3661 = vrot.lane.b32.xlu1 %v3659_v37, %s5193_s3 }
0x1d53   :  { %v3662_v42 = vpop.permute.xlu1 %3661 }
0x1d54   :  { %v3664_v44 = vadd.f32 %v3662_v42, %v3654_v40 }
0x1d56   :  { %5057 = vtanh.f32 %v3664_v44 }
0x1d63   :  { %v5058_v39 = vpop.eup %5057 }
0x1d64   :  { %3667 = vrot.lane.b32.xlu0 %v5058_v39, %s5193_s3 }
0x1dd6   :  { %v3668_v46 = vpop.permute.xlu0 %3667 }
0x1dd7   :  { %v3670_v21 = vmul.f32 %v5056_v36, %v3668_v46  ;;  %v3989_v36 = vld [vmem:[#allocation2 + $0xc] sm:$0x3] }
0x1dd9   :  { %3672 = vrot.lane.b32.xlu1 %v3670_v21, %s5194_s30 }
0x1e4b   :  { %v3673_v48 = vpop.permute.xlu1 %3672 }
0x1e4c   :  { %4273 = vst.msk [vmem:[%s5971_s8 + $0x4] sm:$0x3] %vm1418_vm2, %v3673_v48  ;;  %4915 = vmatmul.mubr.msk.f32.vlgmr.msra.gmra.mxu1 %vm1315_vm3, %v3673_v48 }
0x1e4d   :  { %4929 = vmatpush3.msra.mxu1 %v5721_v1  ;;  %4936 = vmatprep.mubr.msk.f32.mxu1 %vm5192_vm0, %v5191_v0 }
0x1e4e   :  { %4930 = vmatprep.subr.mxu1 %v5191_v0 }
0x1e4f   :  { %4931 = vmatpush3.msra.mxu1 %v5726_v2 }
0x1e50   :  { %4932 = vmatprep.subr.mxu1 %v5191_v0 }
0x1e51   :  { %4933 = vmatpush3.msra.mxu1 %v5732_v3 }
0x1e52   :  { %4934 = vmatprep.subr.mxu1 %v5191_v0 }
0x1e53   :  { %4935 = vmatpush3.msra.mxu1 %v5744_v5 }
0x1e54   :  { %4950 = vmatprep.subr.mxu1 %v5191_v0 }
0x1f0c   :  { %v3746_v49 = vpop.f32.mrf.mxu1 }
0x1f0d   :  { %v3750_v50 = vadd.f32 %v3746_v49, %v3677_v41 }
0x1f0e   :  { %v4916_v22 = vpop.f32.mrf.mxu1 }
0x1f0f   :  { %5059 = vtanh.f32 %v3750_v50  ;;  %v4275_v43 = vmul.f32 -1.442695, %v3750_v50 }
0x1f11   :  { %5061 = vpow2.f32 %v4275_v43 }
0x1f1c   :  { %v5060_v51 = vpop.eup %5059 }
0x1f1d   :  { %3760 = vrot.lane.b32.xlu0 %v5060_v51, %s5193_s3 }
0x1f1e   :  { %v5062_v23 = vpop.eup %5061 }
0x1f1f   :  { %v3754_v52 = vadd.f32 1.0, %v5062_v23 }
0x1f21   :  { %5063 = vrcp.f32 %v3754_v52 }
0x1f2e   :  { %v5064_v53 = vpop.eup %5063 }
0x1f2f   :  { %v3758_v54 = vmul.f32 %v5064_v53, %v3664_v44 }
0x1f8f   :  { %v3761_v45 = vpop.permute.xlu0 %3760 }
0x1f90   :  { %v3763_v24 = vmul.f32 %v5064_v53, %v3761_v45 }
0x1f92   :  { %3765 = vrot.lane.b32.xlu1 %v3763_v24, %s5193_s3 }
0x2004   :  { %v3766_v47 = vpop.permute.xlu1 %3765 }
0x2005   :  { %v3768_v55 = vadd.f32 %v3766_v47, %v3758_v54 }
0x2007   :  { %5065 = vtanh.f32 %v3768_v55 }
0x2014   :  { %v5066_v56 = vpop.eup %5065 }
0x2015   :  { %3771 = vrot.lane.b32.xlu0 %v5066_v56, %s5193_s3 }
0x2087   :  { %v3772_v57 = vpop.permute.xlu0 %3771 }
0x2088   :  { %v3774_v58 = vmul.f32 %v5064_v53, %v3772_v57  ;;  %v4093_v53 = vld [vmem:[#allocation2 + $0xe] sm:$0x3] }
0x208a   :  { %3776 = vrot.lane.b32.xlu1 %v3774_v58, %s5194_s30 }
0x20fc   :  { %v3777_v59 = vpop.permute.xlu1 %3776 }
0x20fd   :  { %4276 = vst.msk [vmem:[%s5971_s8 + $0x6] sm:$0x3] %vm1418_vm2, %v3777_v59  ;;  %4926 = vmatmul.mubr.msk.f32.vlgmr.msra.gmra.mxu0 %vm1315_vm3, %v3777_v59 }
0x20fe   :  { %4940 = vmatpush3.msra.mxu0 %v5721_v1  ;;  %4947 = vmatprep.mubr.msk.f32.mxu0 %vm5192_vm0, %v5191_v0 }
0x20ff   :  { %4941 = vmatprep.subr.mxu0 %v5191_v0 }
0x2100   :  { %4942 = vmatpush3.msra.mxu0 %v5726_v2 }
0x2101   :  { %4943 = vmatprep.subr.mxu0 %v5191_v0 }
0x2102   :  { %4944 = vmatpush3.msra.mxu0 %v5732_v3 }
0x2103   :  { %4945 = vmatprep.subr.mxu0 %v5191_v0 }
0x2104   :  { %4946 = vmatpush3.msra.mxu0 %v5744_v5 }
0x21bd   :  { %v3850_v61 = vpop.f32.mrf.mxu0 }
0x21be   :  { %v3854_v62 = vadd.f32 %v3850_v61, %v3781_v60 }
0x21bf   :  { %v4927_v63 = vpop.f32.mrf.mxu0 }
0x21c0   :  { %5067 = vtanh.f32 %v3854_v62  ;;  %v4278_v6 = vmul.f32 -1.442695, %v3854_v62 }
0x21c2   :  { %5069 = vpow2.f32 %v4278_v6 }
0x21cd   :  { %v5068_v4 = vpop.eup %5067 }
0x21ce   :  { %3864 = vrot.lane.b32.xlu0 %v5068_v4, %s5193_s3 }
0x21cf   :  { %v5070_v7 = vpop.eup %5069 }
0x21d0   :  { %v3858_v8 = vadd.f32 1.0, %v5070_v7 }
0x21d2   :  { %5071 = vrcp.f32 %v3858_v8 }
0x21df   :  { %v5072_v9 = vpop.eup %5071 }
0x21e0   :  { %v3862_v12 = vmul.f32 %v5072_v9, %v3768_v55 }
0x2240   :  { %v3865_v10 = vpop.permute.xlu0 %3864 }
0x2241   :  { %v3867_v11 = vmul.f32 %v5072_v9, %v3865_v10 }
0x2243   :  { %3869 = vrot.lane.b32.xlu1 %v3867_v11, %s5193_s3 }
0x22b5   :  { %v3870_v13 = vpop.permute.xlu1 %3869 }
0x22b6   :  { %v3872_v14 = vadd.f32 %v3870_v13, %v3862_v12 }
0x22b8   :  { %5073 = vtanh.f32 %v3872_v14 }
0x22c5   :  { %v5074_v15 = vpop.eup %5073 }
0x22c6   :  { %3875 = vrot.lane.b32.xlu0 %v5074_v15, %s5193_s3 }
0x2338   :  { %v3876_v16 = vpop.permute.xlu0 %3875 }
0x2339   :  { %v3878_v17 = vmul.f32 %v5072_v9, %v3876_v16 }
0x233b   :  { %3880 = vrot.lane.b32.xlu1 %v3878_v17, %s5194_s30 }
0x23ad   :  { %v3881_v18 = vpop.permute.xlu1 %3880 }
0x23ae   :  { %4279 = vst.msk [vmem:[%s5971_s8 + $0x8] sm:$0x3] %vm1418_vm2, %v3881_v18  ;;  %4937 = vmatmul.mubr.msk.f32.vlgmr.msra.gmra.mxu1 %vm1315_vm3, %v3881_v18 }
0x23af   :  { %4951 = vmatpush3.msra.mxu1 %v5721_v1  ;;  %4958 = vmatprep.mubr.msk.f32.mxu1 %vm5192_vm0, %v5191_v0 }
0x23b0   :  { %4952 = vmatprep.subr.mxu1 %v5191_v0 }
0x23b1   :  { %4953 = vmatpush3.msra.mxu1 %v5726_v2 }
0x23b2   :  { %4954 = vmatprep.subr.mxu1 %v5191_v0 }
0x23b3   :  { %4955 = vmatpush3.msra.mxu1 %v5732_v3 }
0x23b4   :  { %4956 = vmatprep.subr.mxu1 %v5191_v0 }
0x23b5   :  { %4957 = vmatpush3.msra.mxu1 %v5744_v5 }
0x246e   :  { %v3954_v20 = vpop.f32.mrf.mxu1 }
0x246f   :  { %v3958_v25 = vadd.f32 %v3954_v20, %v3885_v19 }
0x2470   :  { %v4938_v26 = vpop.f32.mrf.mxu1 }
0x2471   :  { %5075 = vtanh.f32 %v3958_v25  ;;  %v4281_v27 = vmul.f32 -1.442695, %v3958_v25 }
0x2473   :  { %5077 = vpow2.f32 %v4281_v27 }
0x247e   :  { %v5076_v1 = vpop.eup %5075 }
0x247f   :  { %3968 = vrot.lane.b32.xlu0 %v5076_v1, %s5193_s3 }
0x2480   :  { %v5078_v28 = vpop.eup %5077 }
0x2481   :  { %v3962_v2 = vadd.f32 1.0, %v5078_v28 }
0x2483   :  { %5079 = vrcp.f32 %v3962_v2 }
0x2490   :  { %v5080_v29 = vpop.eup %5079 }
0x2491   :  { %v3966_v0 = vmul.f32 %v5080_v29, %v3872_v14 }
0x24f1   :  { %v3969_v30 = vpop.permute.xlu0 %3968 }
0x24f2   :  { %v3971_v3 = vmul.f32 %v5080_v29, %v3969_v30 }
0x24f4   :  { %3973 = vrot.lane.b32.xlu1 %v3971_v3, %s5193_s3 }
0x2566   :  { %v3974_v5 = vpop.permute.xlu1 %3973 }
0x2567   :  { %v3976_v31 = vadd.f32 %v3974_v5, %v3966_v0 }
0x2569   :  { %5081 = vtanh.f32 %v3976_v31 }
0x2576   :  { %v5082_v32 = vpop.eup %5081 }
0x2577   :  { %3979 = vrot.lane.b32.xlu0 %v5082_v32, %s5193_s3 }
0x25e9   :  { %v3980_v33 = vpop.permute.xlu0 %3979 }
0x25ea   :  { %v3982_v34 = vmul.f32 %v5080_v29, %v3980_v33 }
0x25ec   :  { %3984 = vrot.lane.b32.xlu1 %v3982_v34, %s5194_s30 }
0x265e   :  { %v3985_v35 = vpop.permute.xlu1 %3984 }
0x265f   :  { %4282 = vst.msk [vmem:[%s5971_s8 + $0xa] sm:$0x3] %vm1418_vm2, %v3985_v35  ;;  %4948 = vmatmul.mubr.msk.f32.vlgmr.msra.gmra.mxu0 %vm1315_vm3, %v3985_v35 }
0x271f   :  { %v4058_v38 = vpop.f32.mrf.mxu0 }
0x2720   :  { %v4062_v37 = vadd.f32 %v4058_v38, %v3989_v36 }
0x2721   :  { %v4949_v40 = vpop.f32.mrf.mxu0 }
0x2722   :  { %5083 = vtanh.f32 %v4062_v37  ;;  %v4284_v44 = vmul.f32 -1.442695, %v4062_v37 }
0x2724   :  { %5085 = vpow2.f32 %v4284_v44 }
0x272f   :  { %v5084_v42 = vpop.eup %5083 }
0x2730   :  { %4072 = vrot.lane.b32.xlu0 %v5084_v42, %s5193_s3 }
0x2731   :  { %v5086_v39 = vpop.eup %5085 }
0x2732   :  { %v4066_v46 = vadd.f32 1.0, %v5086_v39 }
0x2734   :  { %5087 = vrcp.f32 %v4066_v46 }
0x2741   :  { %v5088_v21 = vpop.eup %5087 }
0x2742   :  { %v4070_v49 = vmul.f32 %v5088_v21, %v3976_v31 }
0x27a2   :  { %v4073_v48 = vpop.permute.xlu0 %4072 }
0x27a3   :  { %v4075_v41 = vmul.f32 %v5088_v21, %v4073_v48 }
0x27a5   :  { %4077 = vrot.lane.b32.xlu1 %v4075_v41, %s5193_s3 }
0x2817   :  { %v4078_v50 = vpop.permute.xlu1 %4077 }
0x2818   :  { %v4080_v22 = vadd.f32 %v4078_v50, %v4070_v49 }
0x281a   :  { %5089 = vtanh.f32 %v4080_v22 }
0x2827   :  { %v5090_v51 = vpop.eup %5089 }
0x2828   :  { %4083 = vrot.lane.b32.xlu0 %v5090_v51, %s5193_s3 }
0x289a   :  { %v4084_v43 = vpop.permute.xlu0 %4083 }
0x289b   :  { %v4086_v23 = vmul.f32 %v5088_v21, %v4084_v43 }
0x289d   :  { %4088 = vrot.lane.b32.xlu1 %v4086_v23, %s5194_s30 }
0x290f   :  { %v4089_v52 = vpop.permute.xlu1 %4088 }
0x2910   :  { %4285 = vst.msk [vmem:[%s5971_s8 + $0xc] sm:$0x3] %vm1418_vm2, %v4089_v52  ;;  %4959 = vmatmul.mubr.msk.f32.vlgmr.msra.gmra.mxu1 %vm1315_vm3, %v4089_v52 }
0x29d0   :  { %v4162_v45 = vpop.f32.mrf.mxu1 }
0x29d1   :  { %v4166_v24 = vadd.f32 %v4162_v45, %v4093_v53 }
0x29d2   :  { %v4960_v54 = vpop.f32.mrf.mxu1 }
0x29d3   :  { %5091 = vtanh.f32 %v4166_v24  ;;  %v4287_v55 = vmul.f32 -1.442695, %v4166_v24 }
0x29d5   :  { %5093 = vpow2.f32 %v4287_v55 }
0x29e0   :  { %v5092_v47 = vpop.eup %5091 }
0x29e1   :  { %4176 = vrot.lane.b32.xlu0 %v5092_v47, %s5193_s3 }
0x29e2   :  { %v5094_v56 = vpop.eup %5093 }
0x29e3   :  { %v4170_v57 = vadd.f32 1.0, %v5094_v56 }
0x29e5   :  { %5095 = vrcp.f32 %v4170_v57 }
0x29f2   :  { %v5096_v58 = vpop.eup %5095 }
0x29f3   :  { %v4174_v61 = vmul.f32 %v5096_v58, %v4080_v22 }
0x2a53   :  { %v4177_v59 = vpop.permute.xlu0 %4176 }
0x2a54   :  { %v4179_v60 = vmul.f32 %v5096_v58, %v4177_v59 }
0x2a56   :  { %4181 = vrot.lane.b32.xlu1 %v4179_v60, %s5193_s3 }
0x2ac8   :  { %v4182_v62 = vpop.permute.xlu1 %4181 }
0x2ac9   :  { %v4184_v63 = vadd.f32 %v4182_v62, %v4174_v61 }
0x2acb   :  { %5097 = vtanh.f32 %v4184_v63 }
0x2ad8   :  { %v5098_v4 = vpop.eup %5097 }
0x2ad9   :  { %4187 = vrot.lane.b32.xlu0 %v5098_v4, %s5193_s3 }
0x2b4b   :  { %v4188_v6 = vpop.permute.xlu0 %4187 }
0x2b4c   :  { %v4190_v7 = vmul.f32 %v5096_v58, %v4188_v6 }
0x2b4e   :  { %4192 = vrot.lane.b32.xlu1 %v4190_v7, %s5194_s30 }
0x2bc0   :  { %v4193_v8 = vpop.permute.xlu1 %4192 }
0x2bc1   :  { %4288 = vst.msk [vmem:[%s5971_s8 + $0xe] sm:$0x3] %vm1418_vm2, %v4193_v8 }
0x2bc2   :  { %4201 = vsyncpa [#allocation5], 1 }
0x2bc3   :  { %4202 = vsyncpa [#allocation7], 1 }
0x2bc4   :  { %4203 = vsyncpa [#allocation10], 1 }

</bundles_post_ra>
